<compile_context>
chip_gen: v6e
topology: v6e:2x2x1
jax: 0.10.0
libtpu: 0.0.40
codegen_flags: <defaults>
</compile_context>

<pallas_src>
import functools

import jax
import jax.numpy as jnp
from jax.experimental import pallas as pl
from jax.experimental.pallas import tpu as pltpu

EPS = 1e-5  # torch BatchNorm default

# indices into the packed per-o2-channel scalar operand sc (9, o2, 1, 1)
BC, GC, BEC, B2, G2, BE2, B3, G3, BE3 = range(9)


def _bn_moments(y, reduce_axes, inv_n):
    """Fused (all-channel) BatchNorm statistics.

    Returns (mean, inv_std) with keepdims shapes so they broadcast back onto y.
    Single-axis sums are chained minor-axis-first: one lane reduce, one (tiny)
    sublane reduce, then plain vreg adds over the leading (page) axis.
    """
    s1 = y
    s2 = y * y
    for ax in sorted(reduce_axes, reverse=True):
        s1 = jnp.sum(s1, axis=ax, keepdims=True)
        s2 = jnp.sum(s2, axis=ax, keepdims=True)
    mean = s1 * inv_n
    var = jnp.maximum(s2 * inv_n - mean * mean, 0.0)   # guard cancellation
    return mean, jax.lax.rsqrt(var + EPS)


# ----------------------------------------------------------------------------
# Fused Pallas kernel: whole PreCNN forward in one invocation.
# ----------------------------------------------------------------------------
def precnn_kernel(xa_ref, xb_ref, w1_ref, bgb1_ref, wc_ref, w2_ref, w3_ref,
                  sc_ref, wl_ref, bl_ref, o_ref, *, c, o1, o2, B, T):
    L1 = T - 2           # width of every branch's output (c == 5)
    KC = c - 2           # branch-2 kernel size
    HP = c - KC + 1      # branch-2 output height (= 3)
    L3 = T - c + 1       # branch-3 conv width == Linear input size

    # ---- shared time-shifted views of x (few lane-offset loads, reused) ----
    # xb is x viewed as (B, 1, c, T): input rows live on sublanes.
    x14 = [xb_ref[:, :, :, v:v + L1] for v in range(KC)]   # (B,1,c,L1)
    x12 = [xb_ref[:, :, :, v:v + L3] for v in range(c)]    # (B,1,c,L3)

    # =====================================================================
    # Branch 1, stage 1: c parallel Conv1d(1, o1, 3) + Tanh + BatchNorm1d.
    # One vectorized value (B, c, o1, L1); 3 shifted broadcast-FMA terms.
    # xa is x viewed as (B, c, 1, T) so the o1 axis is the sublane axis.
    # =====================================================================
    y = None
    for j in range(3):
        term = w1_ref[j] * xa_ref[:, :, :, j:j + L1]        # (c,o1,1)*(B,c,1,L1)
        y = term if y is None else y + term                 # (B,c,o1,L1)
    y = jnp.tanh(y + bgb1_ref[0])                           # + bias (c,o1,1)
    mean, inv_std = _bn_moments(y, (0, 3), 1.0 / (B * L1))  # per (i, o1) channel
    scale = bgb1_ref[1] * inv_std                           # gamma * rsqrt(var+eps)
    shift = bgb1_ref[2] - mean * scale
    z = y * scale + shift                                   # (B,c,o1,L1)

    # =====================================================================
    # Branch 1, stage 2: Conv2d(c, o2, 1) + Tanh + BatchNorm2d
    # vectorized over o2 -> one block store into rows [0, o1)
    # =====================================================================
    f = None
    for i in range(c):
        term = wc_ref[i] * z[:, i:i + 1]                    # (o2,1,1)*(B,1,o1,L1)
        f = term if f is None else f + term                 # (B,o2,o1,L1)
    f = jnp.tanh(f + sc_ref[BC])
    mean, inv_std = _bn_moments(f, (0, 2, 3), 1.0 / (B * o1 * L1))
    scale = sc_ref[GC] * inv_std
    shift = sc_ref[BEC] - mean * scale
    o_ref[:, :, 0:o1, :] = f * scale + shift

    # =====================================================================
    # Branch 2: Conv2d(1, o2, KC) + Tanh + BatchNorm2d
    # vectorized over o2 -> one block store into rows [o1, o1 + HP)
    # =====================================================================
    f = None
    for u in range(KC):
        for v in range(KC):
            term = w2_ref[u * KC + v] * x14[v][:, :, u:u + HP, :]
            f = term if f is None else f + term             # (B,o2,HP,L1)
    f = jnp.tanh(f + sc_ref[B2])
    mean, inv_std = _bn_moments(f, (0, 2, 3), 1.0 / (B * HP * L1))
    scale = sc_ref[G2] * inv_std
    shift = sc_ref[BE2] - mean * scale
    o_ref[:, :, o1:o1 + HP, :] = f * scale + shift

    # =====================================================================
    # Branch 3: Conv2d(1, o2, c) + Tanh + BatchNorm2d + Flatten + Linear
    # conv vectorized over o2 AND the kernel-row axis u (5 terms + 1 sublane
    # reduce), Linear as one batched matmul -> one store into row o1 + HP
    # =====================================================================
    t3 = None
    for v in range(c):
        term = w3_ref[v] * x12[v]                           # (o2,c,1)*(B,1,c,L3)
        t3 = term if t3 is None else t3 + term              # (B,o2,c,L3)
    f = jnp.sum(t3, axis=2, keepdims=True)                  # (B,o2,1,L3)
    f = jnp.tanh(f + sc_ref[B3])
    mean, inv_std = _bn_moments(f, (0, 2, 3), 1.0 / (B * L3))
    scale = sc_ref[G3] * inv_std
    shift = sc_ref[BE3] - mean * scale
    g = f * scale + shift                                   # (B,o2,1,L3)

    # fused Linear(L3 -> L1): batched (1,L3)@(L3,L1) over the B*o2 rows
    g2 = g.reshape(B * o2, 1, L3)                           # leading-dims-only reshape
    wlb = jnp.broadcast_to(wl_ref[...], (B * o2, L3, L1))
    y5 = jnp.einsum('gok,gkn->gon', g2, wlb,
                    preferred_element_type=jnp.float32)     # (B*o2,1,L1)
    y5 = y5.reshape(B, o2, 1, L1) + bl_ref[...]
    o_ref[:, :, o1 + HP:o1 + HP + 1, :] = y5


# ----------------------------------------------------------------------------
# Host wrapper
# ----------------------------------------------------------------------------
def precnn_forward(x, w1p, bgb1p, wcp, w2p, w3p, sc, wl, bl, *, c, t, o1, o2):
    assert c == 5, "torch concat along dim=2 only type-checks for c == 5"
    B = x.shape[0]
    L1 = t - 2
    H = o1 + 3 + 1
    xa = x.reshape(B, c, 1, t)   # o1 on sublanes for branch-1 stage-1
    xb = x.reshape(B, 1, c, t)   # input rows on sublanes for branches 2 & 3
    kernel = functools.partial(precnn_kernel, c=c, o1=o1, o2=o2, B=B, T=t)
    vmem = pl.BlockSpec(memory_space=pltpu.MemorySpace.VMEM)
    return pl.pallas_call(
        kernel,
        out_shape=jax.ShapeDtypeStruct((B, o2, H, L1), jnp.float32),
        in_specs=[vmem] * 10,
        out_specs=vmem,
    )(xa, xb, w1p, bgb1p, wcp, w2p, w3p, sc, wl, bl)


def pack_params(p, *, c, t, o1, o2):
    """Pack torch-shaped params into broadcast-ready VMEM operands (done once)."""
    KC = c - 2
    L1 = t - 2
    L3 = t - c + 1
    f32 = jnp.float32
    # conv1 weights (c, o1, 3)[i,q,j] -> (3, c, o1, 1)[j,i,q,0]
    w1p = jnp.transpose(p["conv1_w"], (2, 0, 1))[..., None].astype(f32)
    # conv1 bias / BN1d gamma / beta, each (c, o1) -> (3, c, o1, 1)
    bgb1p = jnp.stack([p["conv1_b"], p["bn1_g"], p["bn1_b"]],
                      axis=0)[..., None].astype(f32)
    # Conv2d(c,o2,1) weights (o2, c)[m,i] -> (c, o2, 1, 1)[i,m,0,0]
    wcp = p["convc_w"].T[..., None, None].astype(f32)
    # Conv2d(1,o2,KC) weights (o2, KC, KC)[m,u,v] -> (KC*KC, o2, 1, 1)
    w2p = p["conv2_w"].reshape(o2, KC * KC).T[..., None, None].astype(f32)
    # Conv2d(1,o2,c) weights (o2, c, c)[m,u,v] -> (c, o2, c, 1)[v,m,u,0]
    w3p = jnp.transpose(p["conv3_w"], (2, 0, 1))[..., None].astype(f32)
    # per-o2-channel scalars: conv biases + BN gammas/betas -> (9, o2, 1, 1)
    sc = jnp.stack([p["convc_b"], p["bnc_g"], p["bnc_b"],
                    p["conv2_b"], p["bn2_g"], p["bn2_b"],
                    p["conv3_b"], p["bn3_g"], p["bn3_b"]],
                   axis=0)[..., None, None].astype(f32)
    # Linear(L3 -> L1): torch weight (L1, L3) -> (1, L3, L1); bias -> (1,1,1,L1)
    wl = p["lin_w"].T.reshape(1, L3, L1).astype(f32)
    bl = p["lin_b"].reshape(1, 1, 1, L1).astype(f32)
    return w1p, bgb1p, wcp, w2p, w3p, sc, wl, bl


def init_params(key, c, t, o1, o2):
    ks = jax.random.split(key, 10)

    def rnd(k, shape, scale=0.1):
        return scale * jax.random.normal(k, shape, dtype=jnp.float32)

    return {
        # c parallel Conv1d(1, o1, 3): weight[o,0,j] stored as (c, o1, 3)
        "conv1_w": rnd(ks[0], (c, o1, 3)),
        "conv1_b": rnd(ks[1], (c, o1)),
        "bn1_g": jnp.ones((c, o1), jnp.float32),
        "bn1_b": jnp.zeros((c, o1), jnp.float32),
        # Conv2d(c, o2, 1): weight[m,i,0,0] stored as (o2, c)
        "convc_w": rnd(ks[2], (o2, c)),
        "convc_b": rnd(ks[3], (o2,)),
        "bnc_g": jnp.ones((o2,), jnp.float32),
        "bnc_b": jnp.zeros((o2,), jnp.float32),
        # Conv2d(1, o2, c-2)
        "conv2_w": rnd(ks[4], (o2, c - 2, c - 2)),
        "conv2_b": rnd(ks[5], (o2,)),
        "bn2_g": jnp.ones((o2,), jnp.float32),
        "bn2_b": jnp.zeros((o2,), jnp.float32),
        # Conv2d(1, o2, c)
        "conv3_w": rnd(ks[6], (o2, c, c)),
        "conv3_b": rnd(ks[7], (o2,)),
        "bn3_g": jnp.ones((o2,), jnp.float32),
        "bn3_b": jnp.zeros((o2,), jnp.float32),
        # Linear(t-c+1, t-2): torch weight (out, in)
        "lin_w": rnd(ks[8], (t - 2, t - c + 1)),
        "lin_b": rnd(ks[9], (t - 2,)),
    }


if __name__ == "__main__":
    B, C, T, O1, O2 = 2, 5, 16, 8, 4   # C must be 5 for the torch concat to be valid

    key = jax.random.PRNGKey(0)
    kx, kp = jax.random.split(key)
    x = jax.random.normal(kx, (B, C, T), dtype=jnp.float32)
    params = init_params(kp, C, T, O1, O2)
    packed = pack_params(params, c=C, t=T, o1=O1, o2=O2)

    fwd = jax.jit(functools.partial(precnn_forward, c=C, t=T, o1=O1, o2=O2))
    out = fwd(x, *packed)
    out = jax.block_until_ready(out)

    assert out.shape == (B, O2, O1 + 3 + 1, T - 2), out.shape
    assert out.dtype == jnp.float32
    print("KERNEL_OK")
</pallas_src>

<mosaic_0001>
module attributes {stable_mosaic.version = 11 : i64} {
  func.func @precnn_kernel(%arg0: memref<2x5x1x16xf32, #tpu.memory_space<vmem>>, %arg1: memref<2x1x5x16xf32, #tpu.memory_space<vmem>>, %arg2: memref<3x5x8x1xf32, #tpu.memory_space<vmem>>, %arg3: memref<3x5x8x1xf32, #tpu.memory_space<vmem>>, %arg4: memref<5x4x1x1xf32, #tpu.memory_space<vmem>>, %arg5: memref<9x4x1x1xf32, #tpu.memory_space<vmem>>, %arg6: memref<5x4x5x1xf32, #tpu.memory_space<vmem>>, %arg7: memref<9x4x1x1xf32, #tpu.memory_space<vmem>>, %arg8: memref<1x12x14xf32, #tpu.memory_space<vmem>>, %arg9: memref<1x1x1x14xf32, #tpu.memory_space<vmem>>, %arg10: memref<2x4x12x14xf32, #tpu.memory_space<vmem>>) attributes {dimension_semantics = [], scalar_prefetch = 0 : i64, scratch_operands = 0 : i64, tpu.core_type = #tpu.core_type<tc>} {
    %c0 = arith.constant 0 : index
    %c0_0 = arith.constant 0 : index
    %c0_1 = arith.constant 0 : index
    %c0_2 = arith.constant 0 : index
    %0 = vector.load %arg1[%c0, %c0_0, %c0_1, %c0_2] : memref<2x1x5x16xf32, #tpu.memory_space<vmem>>, vector<2x1x5x14xf32>
    %c0_3 = arith.constant 0 : index
    %c0_4 = arith.constant 0 : index
    %c0_5 = arith.constant 0 : index
    %c1 = arith.constant 1 : index
    %1 = vector.load %arg1[%c0_3, %c0_4, %c0_5, %c1] : memref<2x1x5x16xf32, #tpu.memory_space<vmem>>, vector<2x1x5x14xf32>
    %c0_6 = arith.constant 0 : index
    %c0_7 = arith.constant 0 : index
    %c0_8 = arith.constant 0 : index
    %c2 = arith.constant 2 : index
    %2 = vector.load %arg1[%c0_6, %c0_7, %c0_8, %c2] : memref<2x1x5x16xf32, #tpu.memory_space<vmem>>, vector<2x1x5x14xf32>
    %c0_9 = arith.constant 0 : index
    %c0_10 = arith.constant 0 : index
    %c0_11 = arith.constant 0 : index
    %c0_12 = arith.constant 0 : index
    %3 = vector.load %arg1[%c0_9, %c0_10, %c0_11, %c0_12] : memref<2x1x5x16xf32, #tpu.memory_space<vmem>>, vector<2x1x5x12xf32>
    %c0_13 = arith.constant 0 : index
    %c0_14 = arith.constant 0 : index
    %c0_15 = arith.constant 0 : index
    %c1_16 = arith.constant 1 : index
    %4 = vector.load %arg1[%c0_13, %c0_14, %c0_15, %c1_16] : memref<2x1x5x16xf32, #tpu.memory_space<vmem>>, vector<2x1x5x12xf32>
    %c0_17 = arith.constant 0 : index
    %c0_18 = arith.constant 0 : index
    %c0_19 = arith.constant 0 : index
    %c2_20 = arith.constant 2 : index
    %5 = vector.load %arg1[%c0_17, %c0_18, %c0_19, %c2_20] : memref<2x1x5x16xf32, #tpu.memory_space<vmem>>, vector<2x1x5x12xf32>
    %c0_21 = arith.constant 0 : index
    %c0_22 = arith.constant 0 : index
    %c0_23 = arith.constant 0 : index
    %c3 = arith.constant 3 : index
    %6 = vector.load %arg1[%c0_21, %c0_22, %c0_23, %c3] : memref<2x1x5x16xf32, #tpu.memory_space<vmem>>, vector<2x1x5x12xf32>
    %c0_24 = arith.constant 0 : index
    %c0_25 = arith.constant 0 : index
    %c0_26 = arith.constant 0 : index
    %c4 = arith.constant 4 : index
    %7 = vector.load %arg1[%c0_24, %c0_25, %c0_26, %c4] : memref<2x1x5x16xf32, #tpu.memory_space<vmem>>, vector<2x1x5x12xf32>
    %c0_27 = arith.constant 0 : index
    %c0_28 = arith.constant 0 : index
    %c0_29 = arith.constant 0 : index
    %c0_30 = arith.constant 0 : index
    %8 = vector.load %arg2[%c0_27, %c0_28, %c0_29, %c0_30] : memref<3x5x8x1xf32, #tpu.memory_space<vmem>>, vector<1x5x8x1xf32>
    %9 = vector.shape_cast %8 : vector<1x5x8x1xf32> to vector<5x8x1xf32>
    %c0_31 = arith.constant 0 : index
    %c0_32 = arith.constant 0 : index
    %c0_33 = arith.constant 0 : index
    %c0_34 = arith.constant 0 : index
    %10 = vector.load %arg0[%c0_31, %c0_32, %c0_33, %c0_34] : memref<2x5x1x16xf32, #tpu.memory_space<vmem>>, vector<2x5x1x14xf32>
    %11 = vector.shape_cast %9 : vector<5x8x1xf32> to vector<1x5x8x1xf32>
    %12 = vector.broadcast %11 : vector<1x5x8x1xf32> to vector<2x5x8x14xf32>
    %13 = vector.broadcast %10 : vector<2x5x1x14xf32> to vector<2x5x8x14xf32>
    %14 = arith.mulf %12, %13 : vector<2x5x8x14xf32>
    %c1_35 = arith.constant 1 : index
    %c0_36 = arith.constant 0 : index
    %c0_37 = arith.constant 0 : index
    %c0_38 = arith.constant 0 : index
    %15 = vector.load %arg2[%c1_35, %c0_36, %c0_37, %c0_38] : memref<3x5x8x1xf32, #tpu.memory_space<vmem>>, vector<1x5x8x1xf32>
    %16 = vector.shape_cast %15 : vector<1x5x8x1xf32> to vector<5x8x1xf32>
    %c0_39 = arith.constant 0 : index
    %c0_40 = arith.constant 0 : index
    %c0_41 = arith.constant 0 : index
    %c1_42 = arith.constant 1 : index
    %17 = vector.load %arg0[%c0_39, %c0_40, %c0_41, %c1_42] : memref<2x5x1x16xf32, #tpu.memory_space<vmem>>, vector<2x5x1x14xf32>
    %18 = vector.shape_cast %16 : vector<5x8x1xf32> to vector<1x5x8x1xf32>
    %19 = vector.broadcast %18 : vector<1x5x8x1xf32> to vector<2x5x8x14xf32>
    %20 = vector.broadcast %17 : vector<2x5x1x14xf32> to vector<2x5x8x14xf32>
    %21 = arith.mulf %19, %20 : vector<2x5x8x14xf32>
    %22 = arith.addf %14, %21 : vector<2x5x8x14xf32>
    %c2_43 = arith.constant 2 : index
    %c0_44 = arith.constant 0 : index
    %c0_45 = arith.constant 0 : index
    %c0_46 = arith.constant 0 : index
    %23 = vector.load %arg2[%c2_43, %c0_44, %c0_45, %c0_46] : memref<3x5x8x1xf32, #tpu.memory_space<vmem>>, vector<1x5x8x1xf32>
    %24 = vector.shape_cast %23 : vector<1x5x8x1xf32> to vector<5x8x1xf32>
    %c0_47 = arith.constant 0 : index
    %c0_48 = arith.constant 0 : index
    %c0_49 = arith.constant 0 : index
    %c2_50 = arith.constant 2 : index
    %25 = vector.load %arg0[%c0_47, %c0_48, %c0_49, %c2_50] : memref<2x5x1x16xf32, #tpu.memory_space<vmem>>, vector<2x5x1x14xf32>
    %26 = vector.shape_cast %24 : vector<5x8x1xf32> to vector<1x5x8x1xf32>
    %27 = vector.broadcast %26 : vector<1x5x8x1xf32> to vector<2x5x8x14xf32>
    %28 = vector.broadcast %25 : vector<2x5x1x14xf32> to vector<2x5x8x14xf32>
    %29 = arith.mulf %27, %28 : vector<2x5x8x14xf32>
    %30 = arith.addf %22, %29 : vector<2x5x8x14xf32>
    %c0_51 = arith.constant 0 : index
    %c0_52 = arith.constant 0 : index
    %c0_53 = arith.constant 0 : index
    %c0_54 = arith.constant 0 : index
    %31 = vector.load %arg3[%c0_51, %c0_52, %c0_53, %c0_54] : memref<3x5x8x1xf32, #tpu.memory_space<vmem>>, vector<1x5x8x1xf32>
    %32 = vector.shape_cast %31 : vector<1x5x8x1xf32> to vector<5x8x1xf32>
    %33 = vector.shape_cast %32 : vector<5x8x1xf32> to vector<1x5x8x1xf32>
    %34 = vector.broadcast %33 : vector<1x5x8x1xf32> to vector<2x5x8x14xf32>
    %35 = arith.addf %30, %34 : vector<2x5x8x14xf32>
    %36 = math.tanh %35 : vector<2x5x8x14xf32>
    %37 = arith.mulf %36, %36 : vector<2x5x8x14xf32>
    %cst = arith.constant dense<0.000000e+00> : vector<2x5x8xf32>
    %38 = vector.multi_reduction <add>, %36, %cst [3] : vector<2x5x8x14xf32> to vector<2x5x8xf32>
    %39 = vector.shape_cast %38 : vector<2x5x8xf32> to vector<2x5x8x1xf32>
    %cst_55 = arith.constant dense<0.000000e+00> : vector<2x5x8xf32>
    %40 = vector.multi_reduction <add>, %37, %cst_55 [3] : vector<2x5x8x14xf32> to vector<2x5x8xf32>
    %41 = vector.shape_cast %40 : vector<2x5x8xf32> to vector<2x5x8x1xf32>
    %cst_56 = arith.constant dense<0.000000e+00> : vector<5x8x1xf32>
    %42 = vector.multi_reduction <add>, %39, %cst_56 [0] : vector<2x5x8x1xf32> to vector<5x8x1xf32>
    %43 = vector.shape_cast %42 : vector<5x8x1xf32> to vector<1x5x8x1xf32>
    %cst_57 = arith.constant dense<0.000000e+00> : vector<5x8x1xf32>
    %44 = vector.multi_reduction <add>, %41, %cst_57 [0] : vector<2x5x8x1xf32> to vector<5x8x1xf32>
    %45 = vector.shape_cast %44 : vector<5x8x1xf32> to vector<1x5x8x1xf32>
    %cst_58 = arith.constant 0.0357142873 : f32
    %46 = vector.broadcast %cst_58 : f32 to vector<1x5x8x1xf32>
    %47 = arith.mulf %43, %46 : vector<1x5x8x1xf32>
    %cst_59 = arith.constant 0.0357142873 : f32
    %48 = vector.broadcast %cst_59 : f32 to vector<1x5x8x1xf32>
    %49 = arith.mulf %45, %48 : vector<1x5x8x1xf32>
    %50 = arith.mulf %47, %47 : vector<1x5x8x1xf32>
    %51 = arith.subf %49, %50 : vector<1x5x8x1xf32>
    %cst_60 = arith.constant 0.000000e+00 : f32
    %52 = vector.broadcast %cst_60 : f32 to vector<1x5x8x1xf32>
    %53 = arith.maximumf %51, %52 : vector<1x5x8x1xf32>
    %cst_61 = arith.constant 9.99999974E-6 : f32
    %54 = vector.broadcast %cst_61 : f32 to vector<1x5x8x1xf32>
    %55 = arith.addf %53, %54 : vector<1x5x8x1xf32>
    %56 = math.rsqrt %55 : vector<1x5x8x1xf32>
    %c1_62 = arith.constant 1 : index
    %c0_63 = arith.constant 0 : index
    %c0_64 = arith.constant 0 : index
    %c0_65 = arith.constant 0 : index
    %57 = vector.load %arg3[%c1_62, %c0_63, %c0_64, %c0_65] : memref<3x5x8x1xf32, #tpu.memory_space<vmem>>, vector<1x5x8x1xf32>
    %58 = vector.shape_cast %57 : vector<1x5x8x1xf32> to vector<5x8x1xf32>
    %59 = vector.shape_cast %58 : vector<5x8x1xf32> to vector<1x5x8x1xf32>
    %60 = arith.mulf %59, %56 : vector<1x5x8x1xf32>
    %c2_66 = arith.constant 2 : index
    %c0_67 = arith.constant 0 : index
    %c0_68 = arith.constant 0 : index
    %c0_69 = arith.constant 0 : index
    %61 = vector.load %arg3[%c2_66, %c0_67, %c0_68, %c0_69] : memref<3x5x8x1xf32, #tpu.memory_space<vmem>>, vector<1x5x8x1xf32>
    %62 = vector.shape_cast %61 : vector<1x5x8x1xf32> to vector<5x8x1xf32>
    %63 = arith.mulf %47, %60 : vector<1x5x8x1xf32>
    %64 = vector.shape_cast %62 : vector<5x8x1xf32> to vector<1x5x8x1xf32>
    %65 = arith.subf %64, %63 : vector<1x5x8x1xf32>
    %66 = vector.broadcast %60 : vector<1x5x8x1xf32> to vector<2x5x8x14xf32>
    %67 = arith.mulf %36, %66 : vector<2x5x8x14xf32>
    %68 = vector.broadcast %65 : vector<1x5x8x1xf32> to vector<2x5x8x14xf32>
    %69 = arith.addf %67, %68 : vector<2x5x8x14xf32>
    %c0_70 = arith.constant 0 : index
    %c0_71 = arith.constant 0 : index
    %c0_72 = arith.constant 0 : index
    %c0_73 = arith.constant 0 : index
    %70 = vector.load %arg4[%c0_70, %c0_71, %c0_72, %c0_73] : memref<5x4x1x1xf32, #tpu.memory_space<vmem>>, vector<1x4x1x1xf32>
    %71 = vector.shape_cast %70 : vector<1x4x1x1xf32> to vector<4x1x1xf32>
    %72 = vector.extract_strided_slice %69 {offsets = [0, 0, 0, 0], sizes = [2, 1, 8, 14], strides = [1, 1, 1, 1]} : vector<2x5x8x14xf32> to vector<2x1x8x14xf32>
    %73 = vector.shape_cast %71 : vector<4x1x1xf32> to vector<1x4x1x1xf32>
    %74 = vector.broadcast %73 : vector<1x4x1x1xf32> to vector<2x4x8x14xf32>
    %75 = vector.broadcast %72 : vector<2x1x8x14xf32> to vector<2x4x8x14xf32>
    %76 = arith.mulf %74, %75 : vector<2x4x8x14xf32>
    %c1_74 = arith.constant 1 : index
    %c0_75 = arith.constant 0 : index
    %c0_76 = arith.constant 0 : index
    %c0_77 = arith.constant 0 : index
    %77 = vector.load %arg4[%c1_74, %c0_75, %c0_76, %c0_77] : memref<5x4x1x1xf32, #tpu.memory_space<vmem>>, vector<1x4x1x1xf32>
    %78 = vector.shape_cast %77 : vector<1x4x1x1xf32> to vector<4x1x1xf32>
    %79 = vector.extract_strided_slice %69 {offsets = [0, 1, 0, 0], sizes = [2, 1, 8, 14], strides = [1, 1, 1, 1]} : vector<2x5x8x14xf32> to vector<2x1x8x14xf32>
    %80 = vector.shape_cast %78 : vector<4x1x1xf32> to vector<1x4x1x1xf32>
    %81 = vector.broadcast %80 : vector<1x4x1x1xf32> to vector<2x4x8x14xf32>
    %82 = vector.broadcast %79 : vector<2x1x8x14xf32> to vector<2x4x8x14xf32>
    %83 = arith.mulf %81, %82 : vector<2x4x8x14xf32>
    %84 = arith.addf %76, %83 : vector<2x4x8x14xf32>
    %c2_78 = arith.constant 2 : index
    %c0_79 = arith.constant 0 : index
    %c0_80 = arith.constant 0 : index
    %c0_81 = arith.constant 0 : index
    %85 = vector.load %arg4[%c2_78, %c0_79, %c0_80, %c0_81] : memref<5x4x1x1xf32, #tpu.memory_space<vmem>>, vector<1x4x1x1xf32>
    %86 = vector.shape_cast %85 : vector<1x4x1x1xf32> to vector<4x1x1xf32>
    %87 = vector.extract_strided_slice %69 {offsets = [0, 2, 0, 0], sizes = [2, 1, 8, 14], strides = [1, 1, 1, 1]} : vector<2x5x8x14xf32> to vector<2x1x8x14xf32>
    %88 = vector.shape_cast %86 : vector<4x1x1xf32> to vector<1x4x1x1xf32>
    %89 = vector.broadcast %88 : vector<1x4x1x1xf32> to vector<2x4x8x14xf32>
    %90 = vector.broadcast %87 : vector<2x1x8x14xf32> to vector<2x4x8x14xf32>
    %91 = arith.mulf %89, %90 : vector<2x4x8x14xf32>
    %92 = arith.addf %84, %91 : vector<2x4x8x14xf32>
    %c3_82 = arith.constant 3 : index
    %c0_83 = arith.constant 0 : index
    %c0_84 = arith.constant 0 : index
    %c0_85 = arith.constant 0 : index
    %93 = vector.load %arg4[%c3_82, %c0_83, %c0_84, %c0_85] : memref<5x4x1x1xf32, #tpu.memory_space<vmem>>, vector<1x4x1x1xf32>
    %94 = vector.shape_cast %93 : vector<1x4x1x1xf32> to vector<4x1x1xf32>
    %95 = vector.extract_strided_slice %69 {offsets = [0, 3, 0, 0], sizes = [2, 1, 8, 14], strides = [1, 1, 1, 1]} : vector<2x5x8x14xf32> to vector<2x1x8x14xf32>
    %96 = vector.shape_cast %94 : vector<4x1x1xf32> to vector<1x4x1x1xf32>
    %97 = vector.broadcast %96 : vector<1x4x1x1xf32> to vector<2x4x8x14xf32>
    %98 = vector.broadcast %95 : vector<2x1x8x14xf32> to vector<2x4x8x14xf32>
    %99 = arith.mulf %97, %98 : vector<2x4x8x14xf32>
    %100 = arith.addf %92, %99 : vector<2x4x8x14xf32>
    %c4_86 = arith.constant 4 : index
    %c0_87 = arith.constant 0 : index
    %c0_88 = arith.constant 0 : index
    %c0_89 = arith.constant 0 : index
    %101 = vector.load %arg4[%c4_86, %c0_87, %c0_88, %c0_89] : memref<5x4x1x1xf32, #tpu.memory_space<vmem>>, vector<1x4x1x1xf32>
    %102 = vector.shape_cast %101 : vector<1x4x1x1xf32> to vector<4x1x1xf32>
    %103 = vector.extract_strided_slice %69 {offsets = [0, 4, 0, 0], sizes = [2, 1, 8, 14], strides = [1, 1, 1, 1]} : vector<2x5x8x14xf32> to vector<2x1x8x14xf32>
    %104 = vector.shape_cast %102 : vector<4x1x1xf32> to vector<1x4x1x1xf32>
    %105 = vector.broadcast %104 : vector<1x4x1x1xf32> to vector<2x4x8x14xf32>
    %106 = vector.broadcast %103 : vector<2x1x8x14xf32> to vector<2x4x8x14xf32>
    %107 = arith.mulf %105, %106 : vector<2x4x8x14xf32>
    %108 = arith.addf %100, %107 : vector<2x4x8x14xf32>
    %c0_90 = arith.constant 0 : index
    %c0_91 = arith.constant 0 : index
    %c0_92 = arith.constant 0 : index
    %c0_93 = arith.constant 0 : index
    %109 = vector.load %arg7[%c0_90, %c0_91, %c0_92, %c0_93] : memref<9x4x1x1xf32, #tpu.memory_space<vmem>>, vector<1x4x1x1xf32>
    %110 = vector.shape_cast %109 : vector<1x4x1x1xf32> to vector<4x1x1xf32>
    %111 = vector.shape_cast %110 : vector<4x1x1xf32> to vector<1x4x1x1xf32>
    %112 = vector.broadcast %111 : vector<1x4x1x1xf32> to vector<2x4x8x14xf32>
    %113 = arith.addf %108, %112 : vector<2x4x8x14xf32>
    %114 = math.tanh %113 : vector<2x4x8x14xf32>
    %115 = arith.mulf %114, %114 : vector<2x4x8x14xf32>
    %cst_94 = arith.constant dense<0.000000e+00> : vector<2x4x8xf32>
    %116 = vector.multi_reduction <add>, %114, %cst_94 [3] : vector<2x4x8x14xf32> to vector<2x4x8xf32>
    %117 = vector.shape_cast %116 : vector<2x4x8xf32> to vector<2x4x8x1xf32>
    %cst_95 = arith.constant dense<0.000000e+00> : vector<2x4x8xf32>
    %118 = vector.multi_reduction <add>, %115, %cst_95 [3] : vector<2x4x8x14xf32> to vector<2x4x8xf32>
    %119 = vector.shape_cast %118 : vector<2x4x8xf32> to vector<2x4x8x1xf32>
    %cst_96 = arith.constant dense<0.000000e+00> : vector<2x4x1xf32>
    %120 = vector.multi_reduction <add>, %117, %cst_96 [2] : vector<2x4x8x1xf32> to vector<2x4x1xf32>
    %121 = vector.shape_cast %120 : vector<2x4x1xf32> to vector<2x4x1x1xf32>
    %cst_97 = arith.constant dense<0.000000e+00> : vector<2x4x1xf32>
    %122 = vector.multi_reduction <add>, %119, %cst_97 [2] : vector<2x4x8x1xf32> to vector<2x4x1xf32>
    %123 = vector.shape_cast %122 : vector<2x4x1xf32> to vector<2x4x1x1xf32>
    %cst_98 = arith.constant dense<0.000000e+00> : vector<4x1x1xf32>
    %124 = vector.multi_reduction <add>, %121, %cst_98 [0] : vector<2x4x1x1xf32> to vector<4x1x1xf32>
    %125 = vector.shape_cast %124 : vector<4x1x1xf32> to vector<1x4x1x1xf32>
    %cst_99 = arith.constant dense<0.000000e+00> : vector<4x1x1xf32>
    %126 = vector.multi_reduction <add>, %123, %cst_99 [0] : vector<2x4x1x1xf32> to vector<4x1x1xf32>
    %127 = vector.shape_cast %126 : vector<4x1x1xf32> to vector<1x4x1x1xf32>
    %cst_100 = arith.constant 0.00446428591 : f32
    %128 = vector.broadcast %cst_100 : f32 to vector<1x4x1x1xf32>
    %129 = arith.mulf %125, %128 : vector<1x4x1x1xf32>
    %cst_101 = arith.constant 0.00446428591 : f32
    %130 = vector.broadcast %cst_101 : f32 to vector<1x4x1x1xf32>
    %131 = arith.mulf %127, %130 : vector<1x4x1x1xf32>
    %132 = arith.mulf %129, %129 : vector<1x4x1x1xf32>
    %133 = arith.subf %131, %132 : vector<1x4x1x1xf32>
    %cst_102 = arith.constant 0.000000e+00 : f32
    %134 = vector.broadcast %cst_102 : f32 to vector<1x4x1x1xf32>
    %135 = arith.maximumf %133, %134 : vector<1x4x1x1xf32>
    %cst_103 = arith.constant 9.99999974E-6 : f32
    %136 = vector.broadcast %cst_103 : f32 to vector<1x4x1x1xf32>
    %137 = arith.addf %135, %136 : vector<1x4x1x1xf32>
    %138 = math.rsqrt %137 : vector<1x4x1x1xf32>
    %c1_104 = arith.constant 1 : index
    %c0_105 = arith.constant 0 : index
    %c0_106 = arith.constant 0 : index
    %c0_107 = arith.constant 0 : index
    %139 = vector.load %arg7[%c1_104, %c0_105, %c0_106, %c0_107] : memref<9x4x1x1xf32, #tpu.memory_space<vmem>>, vector<1x4x1x1xf32>
    %140 = vector.shape_cast %139 : vector<1x4x1x1xf32> to vector<4x1x1xf32>
    %141 = vector.shape_cast %140 : vector<4x1x1xf32> to vector<1x4x1x1xf32>
    %142 = arith.mulf %141, %138 : vector<1x4x1x1xf32>
    %c2_108 = arith.constant 2 : index
    %c0_109 = arith.constant 0 : index
    %c0_110 = arith.constant 0 : index
    %c0_111 = arith.constant 0 : index
    %143 = vector.load %arg7[%c2_108, %c0_109, %c0_110, %c0_111] : memref<9x4x1x1xf32, #tpu.memory_space<vmem>>, vector<1x4x1x1xf32>
    %144 = vector.shape_cast %143 : vector<1x4x1x1xf32> to vector<4x1x1xf32>
    %145 = arith.mulf %129, %142 : vector<1x4x1x1xf32>
    %146 = vector.shape_cast %144 : vector<4x1x1xf32> to vector<1x4x1x1xf32>
    %147 = arith.subf %146, %145 : vector<1x4x1x1xf32>
    %148 = vector.broadcast %142 : vector<1x4x1x1xf32> to vector<2x4x8x14xf32>
    %149 = arith.mulf %114, %148 : vector<2x4x8x14xf32>
    %150 = vector.broadcast %147 : vector<1x4x1x1xf32> to vector<2x4x8x14xf32>
    %151 = arith.addf %149, %150 : vector<2x4x8x14xf32>
    %c0_112 = arith.constant 0 : index
    %c0_113 = arith.constant 0 : index
    %c0_114 = arith.constant 0 : index
    %c0_115 = arith.constant 0 : index
    %152 = vector.load %arg10[%c0_112, %c0_113, %c0_114, %c0_115] : memref<2x4x12x14xf32, #tpu.memory_space<vmem>>, vector<2x4x8x14xf32>
    tpu.vector_store %arg10[%c0_112, %c0_113, %c0_114, %c0_115], %151 {strides = array<i32>} : memref<2x4x12x14xf32, #tpu.memory_space<vmem>>, vector<2x4x8x14xf32>,
    %c0_116 = arith.constant 0 : index
    %c0_117 = arith.constant 0 : index
    %c0_118 = arith.constant 0 : index
    %c0_119 = arith.constant 0 : index
    %153 = vector.load %arg5[%c0_116, %c0_117, %c0_118, %c0_119] : memref<9x4x1x1xf32, #tpu.memory_space<vmem>>, vector<1x4x1x1xf32>
    %154 = vector.shape_cast %153 : vector<1x4x1x1xf32> to vector<4x1x1xf32>
    %155 = vector.extract_strided_slice %0 {offsets = [0, 0, 0, 0], sizes = [2, 1, 3, 14], strides = [1, 1, 1, 1]} : vector<2x1x5x14xf32> to vector<2x1x3x14xf32>
    %156 = vector.shape_cast %154 : vector<4x1x1xf32> to vector<1x4x1x1xf32>
    %157 = vector.broadcast %156 : vector<1x4x1x1xf32> to vector<2x4x3x14xf32>
    %158 = vector.broadcast %155 : vector<2x1x3x14xf32> to vector<2x4x3x14xf32>
    %159 = arith.mulf %157, %158 : vector<2x4x3x14xf32>
    %c1_120 = arith.constant 1 : index
    %c0_121 = arith.constant 0 : index
    %c0_122 = arith.constant 0 : index
    %c0_123 = arith.constant 0 : index
    %160 = vector.load %arg5[%c1_120, %c0_121, %c0_122, %c0_123] : memref<9x4x1x1xf32, #tpu.memory_space<vmem>>, vector<1x4x1x1xf32>
    %161 = vector.shape_cast %160 : vector<1x4x1x1xf32> to vector<4x1x1xf32>
    %162 = vector.extract_strided_slice %1 {offsets = [0, 0, 0, 0], sizes = [2, 1, 3, 14], strides = [1, 1, 1, 1]} : vector<2x1x5x14xf32> to vector<2x1x3x14xf32>
    %163 = vector.shape_cast %161 : vector<4x1x1xf32> to vector<1x4x1x1xf32>
    %164 = vector.broadcast %163 : vector<1x4x1x1xf32> to vector<2x4x3x14xf32>
    %165 = vector.broadcast %162 : vector<2x1x3x14xf32> to vector<2x4x3x14xf32>
    %166 = arith.mulf %164, %165 : vector<2x4x3x14xf32>
    %167 = arith.addf %159, %166 : vector<2x4x3x14xf32>
    %c2_124 = arith.constant 2 : index
    %c0_125 = arith.constant 0 : index
    %c0_126 = arith.constant 0 : index
    %c0_127 = arith.constant 0 : index
    %168 = vector.load %arg5[%c2_124, %c0_125, %c0_126, %c0_127] : memref<9x4x1x1xf32, #tpu.memory_space<vmem>>, vector<1x4x1x1xf32>
    %169 = vector.shape_cast %168 : vector<1x4x1x1xf32> to vector<4x1x1xf32>
    %170 = vector.extract_strided_slice %2 {offsets = [0, 0, 0, 0], sizes = [2, 1, 3, 14], strides = [1, 1, 1, 1]} : vector<2x1x5x14xf32> to vector<2x1x3x14xf32>
    %171 = vector.shape_cast %169 : vector<4x1x1xf32> to vector<1x4x1x1xf32>
    %172 = vector.broadcast %171 : vector<1x4x1x1xf32> to vector<2x4x3x14xf32>
    %173 = vector.broadcast %170 : vector<2x1x3x14xf32> to vector<2x4x3x14xf32>
    %174 = arith.mulf %172, %173 : vector<2x4x3x14xf32>
    %175 = arith.addf %167, %174 : vector<2x4x3x14xf32>
    %c3_128 = arith.constant 3 : index
    %c0_129 = arith.constant 0 : index
    %c0_130 = arith.constant 0 : index
    %c0_131 = arith.constant 0 : index
    %176 = vector.load %arg5[%c3_128, %c0_129, %c0_130, %c0_131] : memref<9x4x1x1xf32, #tpu.memory_space<vmem>>, vector<1x4x1x1xf32>
    %177 = vector.shape_cast %176 : vector<1x4x1x1xf32> to vector<4x1x1xf32>
    %178 = vector.extract_strided_slice %0 {offsets = [0, 0, 1, 0], sizes = [2, 1, 3, 14], strides = [1, 1, 1, 1]} : vector<2x1x5x14xf32> to vector<2x1x3x14xf32>
    %179 = vector.shape_cast %177 : vector<4x1x1xf32> to vector<1x4x1x1xf32>
    %180 = vector.broadcast %179 : vector<1x4x1x1xf32> to vector<2x4x3x14xf32>
    %181 = vector.broadcast %178 : vector<2x1x3x14xf32> to vector<2x4x3x14xf32>
    %182 = arith.mulf %180, %181 : vector<2x4x3x14xf32>
    %183 = arith.addf %175, %182 : vector<2x4x3x14xf32>
    %c4_132 = arith.constant 4 : index
    %c0_133 = arith.constant 0 : index
    %c0_134 = arith.constant 0 : index
    %c0_135 = arith.constant 0 : index
    %184 = vector.load %arg5[%c4_132, %c0_133, %c0_134, %c0_135] : memref<9x4x1x1xf32, #tpu.memory_space<vmem>>, vector<1x4x1x1xf32>
    %185 = vector.shape_cast %184 : vector<1x4x1x1xf32> to vector<4x1x1xf32>
    %186 = vector.extract_strided_slice %1 {offsets = [0, 0, 1, 0], sizes = [2, 1, 3, 14], strides = [1, 1, 1, 1]} : vector<2x1x5x14xf32> to vector<2x1x3x14xf32>
    %187 = vector.shape_cast %185 : vector<4x1x1xf32> to vector<1x4x1x1xf32>
    %188 = vector.broadcast %187 : vector<1x4x1x1xf32> to vector<2x4x3x14xf32>
    %189 = vector.broadcast %186 : vector<2x1x3x14xf32> to vector<2x4x3x14xf32>
    %190 = arith.mulf %188, %189 : vector<2x4x3x14xf32>
    %191 = arith.addf %183, %190 : vector<2x4x3x14xf32>
    %c5 = arith.constant 5 : index
    %c0_136 = arith.constant 0 : index
    %c0_137 = arith.constant 0 : index
    %c0_138 = arith.constant 0 : index
    %192 = vector.load %arg5[%c5, %c0_136, %c0_137, %c0_138] : memref<9x4x1x1xf32, #tpu.memory_space<vmem>>, vector<1x4x1x1xf32>
    %193 = vector.shape_cast %192 : vector<1x4x1x1xf32> to vector<4x1x1xf32>
    %194 = vector.extract_strided_slice %2 {offsets = [0, 0, 1, 0], sizes = [2, 1, 3, 14], strides = [1, 1, 1, 1]} : vector<2x1x5x14xf32> to vector<2x1x3x14xf32>
    %195 = vector.shape_cast %193 : vector<4x1x1xf32> to vector<1x4x1x1xf32>
    %196 = vector.broadcast %195 : vector<1x4x1x1xf32> to vector<2x4x3x14xf32>
    %197 = vector.broadcast %194 : vector<2x1x3x14xf32> to vector<2x4x3x14xf32>
    %198 = arith.mulf %196, %197 : vector<2x4x3x14xf32>
    %199 = arith.addf %191, %198 : vector<2x4x3x14xf32>
    %c6 = arith.constant 6 : index
    %c0_139 = arith.constant 0 : index
    %c0_140 = arith.constant 0 : index
    %c0_141 = arith.constant 0 : index
    %200 = vector.load %arg5[%c6, %c0_139, %c0_140, %c0_141] : memref<9x4x1x1xf32, #tpu.memory_space<vmem>>, vector<1x4x1x1xf32>
    %201 = vector.shape_cast %200 : vector<1x4x1x1xf32> to vector<4x1x1xf32>
    %202 = vector.extract_strided_slice %0 {offsets = [0, 0, 2, 0], sizes = [2, 1, 3, 14], strides = [1, 1, 1, 1]} : vector<2x1x5x14xf32> to vector<2x1x3x14xf32>
    %203 = vector.shape_cast %201 : vector<4x1x1xf32> to vector<1x4x1x1xf32>
    %204 = vector.broadcast %203 : vector<1x4x1x1xf32> to vector<2x4x3x14xf32>
    %205 = vector.broadcast %202 : vector<2x1x3x14xf32> to vector<2x4x3x14xf32>
    %206 = arith.mulf %204, %205 : vector<2x4x3x14xf32>
    %207 = arith.addf %199, %206 : vector<2x4x3x14xf32>
    %c7 = arith.constant 7 : index
    %c0_142 = arith.constant 0 : index
    %c0_143 = arith.constant 0 : index
    %c0_144 = arith.constant 0 : index
    %208 = vector.load %arg5[%c7, %c0_142, %c0_143, %c0_144] : memref<9x4x1x1xf32, #tpu.memory_space<vmem>>, vector<1x4x1x1xf32>
    %209 = vector.shape_cast %208 : vector<1x4x1x1xf32> to vector<4x1x1xf32>
    %210 = vector.extract_strided_slice %1 {offsets = [0, 0, 2, 0], sizes = [2, 1, 3, 14], strides = [1, 1, 1, 1]} : vector<2x1x5x14xf32> to vector<2x1x3x14xf32>
    %211 = vector.shape_cast %209 : vector<4x1x1xf32> to vector<1x4x1x1xf32>
    %212 = vector.broadcast %211 : vector<1x4x1x1xf32> to vector<2x4x3x14xf32>
    %213 = vector.broadcast %210 : vector<2x1x3x14xf32> to vector<2x4x3x14xf32>
    %214 = arith.mulf %212, %213 : vector<2x4x3x14xf32>
    %215 = arith.addf %207, %214 : vector<2x4x3x14xf32>
    %c8 = arith.constant 8 : index
    %c0_145 = arith.constant 0 : index
    %c0_146 = arith.constant 0 : index
    %c0_147 = arith.constant 0 : index
    %216 = vector.load %arg5[%c8, %c0_145, %c0_146, %c0_147] : memref<9x4x1x1xf32, #tpu.memory_space<vmem>>, vector<1x4x1x1xf32>
    %217 = vector.shape_cast %216 : vector<1x4x1x1xf32> to vector<4x1x1xf32>
    %218 = vector.extract_strided_slice %2 {offsets = [0, 0, 2, 0], sizes = [2, 1, 3, 14], strides = [1, 1, 1, 1]} : vector<2x1x5x14xf32> to vector<2x1x3x14xf32>
    %219 = vector.shape_cast %217 : vector<4x1x1xf32> to vector<1x4x1x1xf32>
    %220 = vector.broadcast %219 : vector<1x4x1x1xf32> to vector<2x4x3x14xf32>
    %221 = vector.broadcast %218 : vector<2x1x3x14xf32> to vector<2x4x3x14xf32>
    %222 = arith.mulf %220, %221 : vector<2x4x3x14xf32>
    %223 = arith.addf %215, %222 : vector<2x4x3x14xf32>
    %c3_148 = arith.constant 3 : index
    %c0_149 = arith.constant 0 : index
    %c0_150 = arith.constant 0 : index
    %c0_151 = arith.constant 0 : index
    %224 = vector.load %arg7[%c3_148, %c0_149, %c0_150, %c0_151] : memref<9x4x1x1xf32, #tpu.memory_space<vmem>>, vector<1x4x1x1xf32>
    %225 = vector.shape_cast %224 : vector<1x4x1x1xf32> to vector<4x1x1xf32>
    %226 = vector.shape_cast %225 : vector<4x1x1xf32> to vector<1x4x1x1xf32>
    %227 = vector.broadcast %226 : vector<1x4x1x1xf32> to vector<2x4x3x14xf32>
    %228 = arith.addf %223, %227 : vector<2x4x3x14xf32>
    %229 = math.tanh %228 : vector<2x4x3x14xf32>
    %230 = arith.mulf %229, %229 : vector<2x4x3x14xf32>
    %cst_152 = arith.constant dense<0.000000e+00> : vector<2x4x3xf32>
    %231 = vector.multi_reduction <add>, %229, %cst_152 [3] : vector<2x4x3x14xf32> to vector<2x4x3xf32>
    %232 = vector.shape_cast %231 : vector<2x4x3xf32> to vector<2x4x3x1xf32>
    %cst_153 = arith.constant dense<0.000000e+00> : vector<2x4x3xf32>
    %233 = vector.multi_reduction <add>, %230, %cst_153 [3] : vector<2x4x3x14xf32> to vector<2x4x3xf32>
    %234 = vector.shape_cast %233 : vector<2x4x3xf32> to vector<2x4x3x1xf32>
    %cst_154 = arith.constant dense<0.000000e+00> : vector<2x4x1xf32>
    %235 = vector.multi_reduction <add>, %232, %cst_154 [2] : vector<2x4x3x1xf32> to vector<2x4x1xf32>
    %236 = vector.shape_cast %235 : vector<2x4x1xf32> to vector<2x4x1x1xf32>
    %cst_155 = arith.constant dense<0.000000e+00> : vector<2x4x1xf32>
    %237 = vector.multi_reduction <add>, %234, %cst_155 [2] : vector<2x4x3x1xf32> to vector<2x4x1xf32>
    %238 = vector.shape_cast %237 : vector<2x4x1xf32> to vector<2x4x1x1xf32>
    %cst_156 = arith.constant dense<0.000000e+00> : vector<4x1x1xf32>
    %239 = vector.multi_reduction <add>, %236, %cst_156 [0] : vector<2x4x1x1xf32> to vector<4x1x1xf32>
    %240 = vector.shape_cast %239 : vector<4x1x1xf32> to vector<1x4x1x1xf32>
    %cst_157 = arith.constant dense<0.000000e+00> : vector<4x1x1xf32>
    %241 = vector.multi_reduction <add>, %238, %cst_157 [0] : vector<2x4x1x1xf32> to vector<4x1x1xf32>
    %242 = vector.shape_cast %241 : vector<4x1x1xf32> to vector<1x4x1x1xf32>
    %cst_158 = arith.constant 0.0119047621 : f32
    %243 = vector.broadcast %cst_158 : f32 to vector<1x4x1x1xf32>
    %244 = arith.mulf %240, %243 : vector<1x4x1x1xf32>
    %cst_159 = arith.constant 0.0119047621 : f32
    %245 = vector.broadcast %cst_159 : f32 to vector<1x4x1x1xf32>
    %246 = arith.mulf %242, %245 : vector<1x4x1x1xf32>
    %247 = arith.mulf %244, %244 : vector<1x4x1x1xf32>
    %248 = arith.subf %246, %247 : vector<1x4x1x1xf32>
    %cst_160 = arith.constant 0.000000e+00 : f32
    %249 = vector.broadcast %cst_160 : f32 to vector<1x4x1x1xf32>
    %250 = arith.maximumf %248, %249 : vector<1x4x1x1xf32>
    %cst_161 = arith.constant 9.99999974E-6 : f32
    %251 = vector.broadcast %cst_161 : f32 to vector<1x4x1x1xf32>
    %252 = arith.addf %250, %251 : vector<1x4x1x1xf32>
    %253 = math.rsqrt %252 : vector<1x4x1x1xf32>
    %c4_162 = arith.constant 4 : index
    %c0_163 = arith.constant 0 : index
    %c0_164 = arith.constant 0 : index
    %c0_165 = arith.constant 0 : index
    %254 = vector.load %arg7[%c4_162, %c0_163, %c0_164, %c0_165] : memref<9x4x1x1xf32, #tpu.memory_space<vmem>>, vector<1x4x1x1xf32>
    %255 = vector.shape_cast %254 : vector<1x4x1x1xf32> to vector<4x1x1xf32>
    %256 = vector.shape_cast %255 : vector<4x1x1xf32> to vector<1x4x1x1xf32>
    %257 = arith.mulf %256, %253 : vector<1x4x1x1xf32>
    %c5_166 = arith.constant 5 : index
    %c0_167 = arith.constant 0 : index
    %c0_168 = arith.constant 0 : index
    %c0_169 = arith.constant 0 : index
    %258 = vector.load %arg7[%c5_166, %c0_167, %c0_168, %c0_169] : memref<9x4x1x1xf32, #tpu.memory_space<vmem>>, vector<1x4x1x1xf32>
    %259 = vector.shape_cast %258 : vector<1x4x1x1xf32> to vector<4x1x1xf32>
    %260 = arith.mulf %244, %257 : vector<1x4x1x1xf32>
    %261 = vector.shape_cast %259 : vector<4x1x1xf32> to vector<1x4x1x1xf32>
    %262 = arith.subf %261, %260 : vector<1x4x1x1xf32>
    %263 = vector.broadcast %257 : vector<1x4x1x1xf32> to vector<2x4x3x14xf32>
    %264 = arith.mulf %229, %263 : vector<2x4x3x14xf32>
    %265 = vector.broadcast %262 : vector<1x4x1x1xf32> to vector<2x4x3x14xf32>
    %266 = arith.addf %264, %265 : vector<2x4x3x14xf32>
    %c0_170 = arith.constant 0 : index
    %c0_171 = arith.constant 0 : index
    %c8_172 = arith.constant 8 : index
    %c0_173 = arith.constant 0 : index
    %267 = vector.load %arg10[%c0_170, %c0_171, %c8_172, %c0_173] : memref<2x4x12x14xf32, #tpu.memory_space<vmem>>, vector<2x4x3x14xf32>
    tpu.vector_store %arg10[%c0_170, %c0_171, %c8_172, %c0_173], %266 {strides = array<i32>} : memref<2x4x12x14xf32, #tpu.memory_space<vmem>>, vector<2x4x3x14xf32>,
    %c0_174 = arith.constant 0 : index
    %c0_175 = arith.constant 0 : index
    %c0_176 = arith.constant 0 : index
    %c0_177 = arith.constant 0 : index
    %268 = vector.load %arg6[%c0_174, %c0_175, %c0_176, %c0_177] : memref<5x4x5x1xf32, #tpu.memory_space<vmem>>, vector<1x4x5x1xf32>
    %269 = vector.shape_cast %268 : vector<1x4x5x1xf32> to vector<4x5x1xf32>
    %270 = vector.shape_cast %269 : vector<4x5x1xf32> to vector<1x4x5x1xf32>
    %271 = vector.broadcast %270 : vector<1x4x5x1xf32> to vector<2x4x5x12xf32>
    %272 = vector.broadcast %3 : vector<2x1x5x12xf32> to vector<2x4x5x12xf32>
    %273 = arith.mulf %271, %272 : vector<2x4x5x12xf32>
    %c1_178 = arith.constant 1 : index
    %c0_179 = arith.constant 0 : index
    %c0_180 = arith.constant 0 : index
    %c0_181 = arith.constant 0 : index
    %274 = vector.load %arg6[%c1_178, %c0_179, %c0_180, %c0_181] : memref<5x4x5x1xf32, #tpu.memory_space<vmem>>, vector<1x4x5x1xf32>
    %275 = vector.shape_cast %274 : vector<1x4x5x1xf32> to vector<4x5x1xf32>
    %276 = vector.shape_cast %275 : vector<4x5x1xf32> to vector<1x4x5x1xf32>
    %277 = vector.broadcast %276 : vector<1x4x5x1xf32> to vector<2x4x5x12xf32>
    %278 = vector.broadcast %4 : vector<2x1x5x12xf32> to vector<2x4x5x12xf32>
    %279 = arith.mulf %277, %278 : vector<2x4x5x12xf32>
    %280 = arith.addf %273, %279 : vector<2x4x5x12xf32>
    %c2_182 = arith.constant 2 : index
    %c0_183 = arith.constant 0 : index
    %c0_184 = arith.constant 0 : index
    %c0_185 = arith.constant 0 : index
    %281 = vector.load %arg6[%c2_182, %c0_183, %c0_184, %c0_185] : memref<5x4x5x1xf32, #tpu.memory_space<vmem>>, vector<1x4x5x1xf32>
    %282 = vector.shape_cast %281 : vector<1x4x5x1xf32> to vector<4x5x1xf32>
    %283 = vector.shape_cast %282 : vector<4x5x1xf32> to vector<1x4x5x1xf32>
    %284 = vector.broadcast %283 : vector<1x4x5x1xf32> to vector<2x4x5x12xf32>
    %285 = vector.broadcast %5 : vector<2x1x5x12xf32> to vector<2x4x5x12xf32>
    %286 = arith.mulf %284, %285 : vector<2x4x5x12xf32>
    %287 = arith.addf %280, %286 : vector<2x4x5x12xf32>
    %c3_186 = arith.constant 3 : index
    %c0_187 = arith.constant 0 : index
    %c0_188 = arith.constant 0 : index
    %c0_189 = arith.constant 0 : index
    %288 = vector.load %arg6[%c3_186, %c0_187, %c0_188, %c0_189] : memref<5x4x5x1xf32, #tpu.memory_space<vmem>>, vector<1x4x5x1xf32>
    %289 = vector.shape_cast %288 : vector<1x4x5x1xf32> to vector<4x5x1xf32>
    %290 = vector.shape_cast %289 : vector<4x5x1xf32> to vector<1x4x5x1xf32>
    %291 = vector.broadcast %290 : vector<1x4x5x1xf32> to vector<2x4x5x12xf32>
    %292 = vector.broadcast %6 : vector<2x1x5x12xf32> to vector<2x4x5x12xf32>
    %293 = arith.mulf %291, %292 : vector<2x4x5x12xf32>
    %294 = arith.addf %287, %293 : vector<2x4x5x12xf32>
    %c4_190 = arith.constant 4 : index
    %c0_191 = arith.constant 0 : index
    %c0_192 = arith.constant 0 : index
    %c0_193 = arith.constant 0 : index
    %295 = vector.load %arg6[%c4_190, %c0_191, %c0_192, %c0_193] : memref<5x4x5x1xf32, #tpu.memory_space<vmem>>, vector<1x4x5x1xf32>
    %296 = vector.shape_cast %295 : vector<1x4x5x1xf32> to vector<4x5x1xf32>
    %297 = vector.shape_cast %296 : vector<4x5x1xf32> to vector<1x4x5x1xf32>
    %298 = vector.broadcast %297 : vector<1x4x5x1xf32> to vector<2x4x5x12xf32>
    %299 = vector.broadcast %7 : vector<2x1x5x12xf32> to vector<2x4x5x12xf32>
    %300 = arith.mulf %298, %299 : vector<2x4x5x12xf32>
    %301 = arith.addf %294, %300 : vector<2x4x5x12xf32>
    %cst_194 = arith.constant dense<0.000000e+00> : vector<2x4x12xf32>
    %302 = vector.multi_reduction <add>, %301, %cst_194 [2] : vector<2x4x5x12xf32> to vector<2x4x12xf32>
    %303 = vector.shape_cast %302 : vector<2x4x12xf32> to vector<2x4x1x12xf32>
    %c6_195 = arith.constant 6 : index
    %c0_196 = arith.constant 0 : index
    %c0_197 = arith.constant 0 : index
    %c0_198 = arith.constant 0 : index
    %304 = vector.load %arg7[%c6_195, %c0_196, %c0_197, %c0_198] : memref<9x4x1x1xf32, #tpu.memory_space<vmem>>, vector<1x4x1x1xf32>
    %305 = vector.shape_cast %304 : vector<1x4x1x1xf32> to vector<4x1x1xf32>
    %306 = vector.shape_cast %305 : vector<4x1x1xf32> to vector<1x4x1x1xf32>
    %307 = vector.broadcast %306 : vector<1x4x1x1xf32> to vector<2x4x1x12xf32>
    %308 = arith.addf %303, %307 : vector<2x4x1x12xf32>
    %309 = math.tanh %308 : vector<2x4x1x12xf32>
    %310 = arith.mulf %309, %309 : vector<2x4x1x12xf32>
    %cst_199 = arith.constant dense<0.000000e+00> : vector<2x4x1xf32>
    %311 = vector.multi_reduction <add>, %309, %cst_199 [3] : vector<2x4x1x12xf32> to vector<2x4x1xf32>
    %312 = vector.shape_cast %311 : vector<2x4x1xf32> to vector<2x4x1x1xf32>
    %cst_200 = arith.constant dense<0.000000e+00> : vector<2x4x1xf32>
    %313 = vector.multi_reduction <add>, %310, %cst_200 [3] : vector<2x4x1x12xf32> to vector<2x4x1xf32>
    %314 = vector.shape_cast %313 : vector<2x4x1xf32> to vector<2x4x1x1xf32>
    %cst_201 = arith.constant dense<0.000000e+00> : vector<2x4x1xf32>
    %315 = vector.multi_reduction <add>, %312, %cst_201 [2] : vector<2x4x1x1xf32> to vector<2x4x1xf32>
    %316 = vector.shape_cast %315 : vector<2x4x1xf32> to vector<2x4x1x1xf32>
    %cst_202 = arith.constant dense<0.000000e+00> : vector<2x4x1xf32>
    %317 = vector.multi_reduction <add>, %314, %cst_202 [2] : vector<2x4x1x1xf32> to vector<2x4x1xf32>
    %318 = vector.shape_cast %317 : vector<2x4x1xf32> to vector<2x4x1x1xf32>
    %cst_203 = arith.constant dense<0.000000e+00> : vector<4x1x1xf32>
    %319 = vector.multi_reduction <add>, %316, %cst_203 [0] : vector<2x4x1x1xf32> to vector<4x1x1xf32>
    %320 = vector.shape_cast %319 : vector<4x1x1xf32> to vector<1x4x1x1xf32>
    %cst_204 = arith.constant dense<0.000000e+00> : vector<4x1x1xf32>
    %321 = vector.multi_reduction <add>, %318, %cst_204 [0] : vector<2x4x1x1xf32> to vector<4x1x1xf32>
    %322 = vector.shape_cast %321 : vector<4x1x1xf32> to vector<1x4x1x1xf32>
    %cst_205 = arith.constant 0.0416666679 : f32
    %323 = vector.broadcast %cst_205 : f32 to vector<1x4x1x1xf32>
    %324 = arith.mulf %320, %323 : vector<1x4x1x1xf32>
    %cst_206 = arith.constant 0.0416666679 : f32
    %325 = vector.broadcast %cst_206 : f32 to vector<1x4x1x1xf32>
    %326 = arith.mulf %322, %325 : vector<1x4x1x1xf32>
    %327 = arith.mulf %324, %324 : vector<1x4x1x1xf32>
    %328 = arith.subf %326, %327 : vector<1x4x1x1xf32>
    %cst_207 = arith.constant 0.000000e+00 : f32
    %329 = vector.broadcast %cst_207 : f32 to vector<1x4x1x1xf32>
    %330 = arith.maximumf %328, %329 : vector<1x4x1x1xf32>
    %cst_208 = arith.constant 9.99999974E-6 : f32
    %331 = vector.broadcast %cst_208 : f32 to vector<1x4x1x1xf32>
    %332 = arith.addf %330, %331 : vector<1x4x1x1xf32>
    %333 = math.rsqrt %332 : vector<1x4x1x1xf32>
    %c7_209 = arith.constant 7 : index
    %c0_210 = arith.constant 0 : index
    %c0_211 = arith.constant 0 : index
    %c0_212 = arith.constant 0 : index
    %334 = vector.load %arg7[%c7_209, %c0_210, %c0_211, %c0_212] : memref<9x4x1x1xf32, #tpu.memory_space<vmem>>, vector<1x4x1x1xf32>
    %335 = vector.shape_cast %334 : vector<1x4x1x1xf32> to vector<4x1x1xf32>
    %336 = vector.shape_cast %335 : vector<4x1x1xf32> to vector<1x4x1x1xf32>
    %337 = arith.mulf %336, %333 : vector<1x4x1x1xf32>
    %c8_213 = arith.constant 8 : index
    %c0_214 = arith.constant 0 : index
    %c0_215 = arith.constant 0 : index
    %c0_216 = arith.constant 0 : index
    %338 = vector.load %arg7[%c8_213, %c0_214, %c0_215, %c0_216] : memref<9x4x1x1xf32, #tpu.memory_space<vmem>>, vector<1x4x1x1xf32>
    %339 = vector.shape_cast %338 : vector<1x4x1x1xf32> to vector<4x1x1xf32>
    %340 = arith.mulf %324, %337 : vector<1x4x1x1xf32>
    %341 = vector.shape_cast %339 : vector<4x1x1xf32> to vector<1x4x1x1xf32>
    %342 = arith.subf %341, %340 : vector<1x4x1x1xf32>
    %343 = vector.broadcast %337 : vector<1x4x1x1xf32> to vector<2x4x1x12xf32>
    %344 = arith.mulf %309, %343 : vector<2x4x1x12xf32>
    %345 = vector.broadcast %342 : vector<1x4x1x1xf32> to vector<2x4x1x12xf32>
    %346 = arith.addf %344, %345 : vector<2x4x1x12xf32>
    %347 = vector.shape_cast %346 : vector<2x4x1x12xf32> to vector<8x1x12xf32>
    %c0_217 = arith.constant 0 : index
    %c0_218 = arith.constant 0 : index
    %c0_219 = arith.constant 0 : index
    %348 = vector.load %arg8[%c0_217, %c0_218, %c0_219] : memref<1x12x14xf32, #tpu.memory_space<vmem>>, vector<1x12x14xf32>
    %349 = vector.shape_cast %348 : vector<1x12x14xf32> to vector<1x12x14xf32>
    %350 = vector.broadcast %349 : vector<1x12x14xf32> to vector<8x12x14xf32>
    "tpu.trace_start"() <{level = 10 : i32, message = "gok,gkn->gon"}> : () -> ()
    %cst_220 = arith.constant dense<0.000000e+00> : vector<8x1x14xf32>
    %351 = tpu.matmul %347, %350, %cst_220 {dimension_numbers = #tpu.dot_dimension_numbers<[2], [1], [1], [2], [0, 0, 0, 1, 1, 2], [0], [0]>} : vector<8x1x12xf32>, vector<8x12x14xf32>, vector<8x1x14xf32> -> vector<8x1x14xf32>
    "tpu.trace_stop"() : () -> ()
    %352 = vector.shape_cast %351 : vector<8x1x14xf32> to vector<2x4x1x14xf32>
    %c0_221 = arith.constant 0 : index
    %c0_222 = arith.constant 0 : index
    %c0_223 = arith.constant 0 : index
    %c0_224 = arith.constant 0 : index
    %353 = vector.load %arg9[%c0_221, %c0_222, %c0_223, %c0_224] : memref<1x1x1x14xf32, #tpu.memory_space<vmem>>, vector<1x1x1x14xf32>
    %354 = vector.broadcast %353 : vector<1x1x1x14xf32> to vector<2x4x1x14xf32>
    %355 = arith.addf %352, %354 : vector<2x4x1x14xf32>
    %c0_225 = arith.constant 0 : index
    %c0_226 = arith.constant 0 : index
    %c11 = arith.constant 11 : index
    %c0_227 = arith.constant 0 : index
    %356 = vector.load %arg10[%c0_225, %c0_226, %c11, %c0_227] : memref<2x4x12x14xf32, #tpu.memory_space<vmem>>, vector<2x4x1x14xf32>
    tpu.vector_store %arg10[%c0_225, %c0_226, %c11, %c0_227], %355 {strides = array<i32>} : memref<2x4x12x14xf32, #tpu.memory_space<vmem>>, vector<2x4x1x14xf32>,
    return
  }
}

</mosaic_0001>

<bundles_post_ra>
// kernel: precnn_forward.1
= control target key start
LH: loop header
LB: loop body
LE: loop exit
PB: predicated region body
PF: predicated region fallthrough
CT: control target
= control target key end

     0   :  { %v4059_v0 = vmov 0   ;;  %s4060_s23 = smov 127   ;;  %s4061_s20 = smov 126   ;;  %vm389_vm0 = vcmask 113664   ;;  %vm2711_vm1 = vcmask 94208   ;;  %vm2833_vm2 = vcmask 97280   ;;  %s6159_s2 = inlined_call_operand.vmem [shape: f32[3,5,8,1], index: 2, kind: input, shape index: {}]   ;;  %s6160_s3 = inlined_call_operand.vmem [shape: f32[3,5,8,1], index: 3, kind: input, shape index: {}]   ;;  %s6161_s4 = inlined_call_operand.vmem [shape: f32[5,4,1,1], index: 4, kind: input, shape index: {}]   ;;  %s6162_s7 = inlined_call_operand.vmem [shape: f32[9,4,1,1], index: 7, kind: input, shape index: {}]   ;;  %s6163_s5 = inlined_call_operand.vmem [shape: f32[9,4,1,1], index: 5, kind: input, shape index: {}]   ;;  %s6164_s0 = inlined_call_operand.vmem [shape: f32[2,5,1,16], index: 0, kind: input, shape index: {}]   ;;  %s6165_s1 = inlined_call_operand.vmem [shape: f32[2,1,5,16], index: 1, kind: input, shape index: {}]   ;;  %s6166_s6 = inlined_call_operand.vmem [shape: f32[5,4,5,1], index: 6, kind: input, shape index: {}]   ;;  %s6167_s8 = inlined_call_operand.vmem [shape: f32[1,12,14], index: 8, kind: input, shape index: {}]   ;;  %s6168_s9 = inlined_call_operand.vmem [shape: f32[1,1,1,14], index: 9, kind: input, shape index: {}]   ;;  %s6169_s10 = inlined_call_operand.vmem [shape: f32[2,4,12,14], index: 10, kind: output, shape index: {}]  }
   0x1   :  { %3950 = vset.pattern.permute.xlu1 %v4059_v0  ;;  %3949 = vset.pattern.permute.xlu0 %v4059_v0  ;;  %v39_v1 = vld [vmem:[%s6159_s2 + $0x10] sm:$0xff]  ;;  %v37_v2 = vld [vmem:[%s6159_s2] sm:$0xff]  ;;  %v40_v3 = vld [vmem:[%s6159_s2 + $0x18] sm:$0xff]  ;;  %s4063_s21 = smov 124   ;;  %vm3049_vm3 = vcmask 1043456   ;;  %vm4065_vm4 = vmmov 0  }
   0x2   :  { %64 = vperm.xlu1 %3950, %v39_v1   ;;  %54 = vperm.xlu0 %3949, %v37_v2   ;;  %v38_v4 = vld [vmem:[%s6159_s2 + $0x8] sm:$0xff]  ;;  %v41_v6 = vld [vmem:[%s6159_s2 + $0x20] sm:$0xff]  ;;  %v3668_v7 = vld [vmem:[%s6159_s2 + $0x38] sm:$0xff]  ;;  %vm3643_vm5 = vcmask 106496   ;;  %vm2071_vm6 = vcmask 108544   ;;  %vm2120_vm7 = vcmask 1042432  }
   0x3   :  { %v3666_v5 = vld [vmem:[%s6159_s2 + $0x28] sm:$0xff]  ;;  %v3667_v8 = vld [vmem:[%s6159_s2 + $0x30] sm:$0xff]  ;;  %v3669_v10 = vld [vmem:[%s6159_s2 + $0x40] sm:$0xff] }
   0x4   :  { %v3670_v9 = vld [vmem:[%s6159_s2 + $0x48] sm:$0xff]  ;;  %v3672_v11 = vld [vmem:[%s6159_s2 + $0x58] sm:$0xff]  ;;  %v3671_v12 = vld [vmem:[%s6159_s2 + $0x50] sm:$0xff] }
   0x5   :  { %v3674_v13 = vld [vmem:[%s6159_s2 + $0x68] sm:$0xff]  ;;  %v3673_v14 = vld [vmem:[%s6159_s2 + $0x60] sm:$0xff]  ;;  %v3675_v16 = vld [vmem:[%s6159_s2 + $0x70] sm:$0xff] }
   0x6   :  { %69 = vperm.xlu1 %3950, %v40_v3   ;;  %59 = vperm.xlu0 %3949, %v38_v4   ;;  %v329_v15 = vld [vmem:[%s6160_s3] sm:$0xff]  ;;  %v331_v17 = vld [vmem:[%s6160_s3 + $0x10] sm:$0xff]  ;;  %v330_v18 = vld [vmem:[%s6160_s3 + $0x8] sm:$0xff] }
   0x7   :  { %v333_v19 = vld [vmem:[%s6160_s3 + $0x20] sm:$0xff]  ;;  %v332_v20 = vld [vmem:[%s6160_s3 + $0x18] sm:$0xff]  ;;  %v3703_v29 = vld [vmem:[%s6161_s4 + $0x9] ss:$0 sm:$0xff] }
   0x8   :  { %v3687_v21 = vld [vmem:[%s6161_s4 + $0x1] ss:$0 sm:$0xff]  ;;  %v3686_v22 = vld [vmem:[%s6161_s4] ss:$0 sm:$0xff]  ;;  %v3689_v23 = vld [vmem:[%s6161_s4 + $0x3] ss:$0 sm:$0xff] }
   0x9   :  { %v3688_v24 = vld [vmem:[%s6161_s4 + $0x2] ss:$0 sm:$0xff]  ;;  %v3695_v25 = vld [vmem:[%s6161_s4 + $0x5] ss:$0 sm:$0xff]  ;;  %v3694_v26 = vld [vmem:[%s6161_s4 + $0x4] ss:$0 sm:$0xff] }
   0xa   :  { %155 = vperm.xlu1 %3950, %v3666_v5   ;;  %74 = vperm.xlu0 %3949, %v41_v6   ;;  %v3697_v27 = vld [vmem:[%s6161_s4 + $0x7] ss:$0 sm:$0xff]  ;;  %v3696_v28 = vld [vmem:[%s6161_s4 + $0x6] ss:$0 sm:$0xff]  ;;  %v3702_v30 = vld [vmem:[%s6161_s4 + $0x8] ss:$0 sm:$0xff] }
   0xb   :  { %v3705_v31 = vld [vmem:[%s6161_s4 + $0xb] ss:$0 sm:$0xff]  ;;  %v3704_v32 = vld [vmem:[%s6161_s4 + $0xa] ss:$0 sm:$0xff]  ;;  %v3711_v33 = vld [vmem:[%s6161_s4 + $0xd] ss:$0 sm:$0xff] }
   0xc   :  { %v3710_v34 = vld [vmem:[%s6161_s4 + $0xc] ss:$0 sm:$0xff]  ;;  %v3713_v35 = vld [vmem:[%s6161_s4 + $0xf] ss:$0 sm:$0xff]  ;;  %v3712_v36 = vld [vmem:[%s6161_s4 + $0xe] ss:$0 sm:$0xff] }
   0xd   :  { %v3719_v37 = vld [vmem:[%s6161_s4 + $0x11] ss:$0 sm:$0xff]  ;;  %v3718_v38 = vld [vmem:[%s6161_s4 + $0x10] ss:$0 sm:$0xff]  ;;  %v3721_v39 = vld [vmem:[%s6161_s4 + $0x13] ss:$0 sm:$0xff] }
   0xe   :  { %165 = vperm.xlu1 %3950, %v3668_v7   ;;  %160 = vperm.xlu0 %3949, %v3667_v8   ;;  %v3720_v40 = vld [vmem:[%s6161_s4 + $0x12] ss:$0 sm:$0xff]  ;;  %v3723_v41 = vld [vmem:[%s6162_s7 + $0x1] ss:$0 sm:$0xff]  ;;  %v3722_v42 = vld [vmem:[%s6162_s7] ss:$0 sm:$0xff] }
   0xf   :  { %v3725_v43 = vld [vmem:[%s6162_s7 + $0x3] ss:$0 sm:$0xff]  ;;  %v3724_v44 = vld [vmem:[%s6162_s7 + $0x2] ss:$0 sm:$0xff]  ;;  %v3735_v45 = vld [vmem:[%s6163_s5 + $0x1] ss:$0 sm:$0xff] }
  0x10   :  { %v3734_v46 = vld [vmem:[%s6163_s5] ss:$0 sm:$0xff]  ;;  %v4279_v55 = vld [vmem:[%s6164_s0 + $0x2] ss:$0 sm:$0xff]  ;;  %v4284_v56 = vld [vmem:[%s6164_s0 + $0x1] ss:$0 sm:$0xff] }
  0x11   :  { %v4270_v51 = vld [vmem:[%s6164_s0] ss:$0 sm:$0xff]  ;;  %v4293_v61 = vld [vmem:[%s6164_s0 + $0x3] ss:$0 sm:$0xff]  ;;  %v4298_v62 = vld [vmem:[%s6164_s0 + $0x4] ss:$0 sm:$0xff] }
  0x12   :  { %175 = vperm.xlu1 %3950, %v3670_v9   ;;  %170 = vperm.xlu0 %3949, %v3669_v10   ;;  %v4305_v3 = vld [vmem:[%s6164_s0 + $0x5] ss:$0 sm:$0xff]  ;;  %v4312_v4 = vld [vmem:[%s6164_s0 + $0x6] ss:$0 sm:$0xff]  ;;  %v4321_v9 = vld [vmem:[%s6164_s0 + $0x7] ss:$0 sm:$0xff] }
  0x13   :  { %v4326_v10 = vld [vmem:[%s6164_s0 + $0x8] ss:$0 sm:$0xff] }
  0x16   :  { %251 = vperm.xlu1 %3950, %v3672_v11   ;;  %246 = vperm.xlu0 %3949, %v3671_v12  }
  0x1a   :  { %261 = vperm.xlu1 %3950, %v3674_v13   ;;  %256 = vperm.xlu0 %3949, %v3673_v14   ;;  %v4335_v14 = vld [vmem:[%s6164_s0 + $0x9] ss:$0 sm:$0xff] }
  0x1e   :  { %336 = vperm.xlu1 %3950, %v329_v15   ;;  %266 = vperm.xlu0 %3949, %v3675_v16  }
  0x22   :  { %346 = vperm.xlu1 %3950, %v331_v17   ;;  %341 = vperm.xlu0 %3949, %v330_v18  }
  0x26   :  { %356 = vperm.xlu1 %3950, %v333_v19   ;;  %351 = vperm.xlu0 %3949, %v332_v20  }
  0x2a   :  { %621 = vperm.xlu1 %3950, %v3687_v21   ;;  %617 = vperm.xlu0 %3949, %v3686_v22  }
  0x2e   :  { %629 = vperm.xlu1 %3950, %v3689_v23   ;;  %625 = vperm.xlu0 %3949, %v3688_v24  }
  0x32   :  { %670 = vperm.xlu1 %3950, %v3695_v25   ;;  %666 = vperm.xlu0 %3949, %v3694_v26  }
  0x36   :  { %678 = vperm.xlu1 %3950, %v3697_v27   ;;  %674 = vperm.xlu0 %3949, %v3696_v28  }
  0x3a   :  { %727 = vperm.xlu1 %3950, %v3703_v29   ;;  %723 = vperm.xlu0 %3949, %v3702_v30  }
  0x3e   :  { %735 = vperm.xlu1 %3950, %v3705_v31   ;;  %731 = vperm.xlu0 %3949, %v3704_v32   ;;  %v3736_v32 = vld [vmem:[%s6163_s5 + $0x2] ss:$0 sm:$0xff] }
  0x42   :  { %784 = vperm.xlu1 %3950, %v3711_v33   ;;  %780 = vperm.xlu0 %3949, %v3710_v34  }
  0x46   :  { %792 = vperm.xlu1 %3950, %v3713_v35   ;;  %788 = vperm.xlu0 %3949, %v3712_v36   ;;  %v3737_v35 = vld [vmem:[%s6163_s5 + $0x3] ss:$0 sm:$0xff]  ;;  %v3742_v36 = vld [vmem:[%s6163_s5 + $0x4] ss:$0 sm:$0xff] }
  0x4a   :  { %841 = vperm.xlu1 %3950, %v3719_v37   ;;  %837 = vperm.xlu0 %3949, %v3718_v38  }
  0x4e   :  { %849 = vperm.xlu1 %3950, %v3721_v39   ;;  %845 = vperm.xlu0 %3949, %v3720_v40   ;;  %v3743_v39 = vld [vmem:[%s6163_s5 + $0x5] ss:$0 sm:$0xff]  ;;  %v3744_v40 = vld [vmem:[%s6163_s5 + $0x6] ss:$0 sm:$0xff] }
  0x52   :  { %897 = vperm.xlu1 %3950, %v3723_v41   ;;  %893 = vperm.xlu0 %3949, %v3722_v42   ;;  %v3745_v42 = vld [vmem:[%s6163_s5 + $0x7] ss:$0 sm:$0xff] }
  0x56   :  { %905 = vperm.xlu1 %3950, %v3725_v43   ;;  %901 = vperm.xlu0 %3949, %v3724_v44  }
  0x5a   :  { %1259 = vperm.xlu1 %3950, %v3735_v45   ;;  %1255 = vperm.xlu0 %3949, %v3734_v46  }
  0x7d   :  { %v4259_v47 = vpop.permute.xlu1 %64  ;;  %v4261_v48 = vpop.permute.xlu0 %54 }
  0x81   :  { %v4263_v49 = vpop.permute.xlu1 %69  ;;  %v4265_v50 = vpop.permute.xlu0 %59 }
  0x85   :  { %v156_v52 = vpop.permute.xlu1 %155  ;;  %v4272_v53 = vpop.permute.xlu0 %74 }
  0x86   :  { %v178_v54 = vmul.f32 %v4270_v51, %v156_v52  ;;  %v183_v6 = vmul.f32 %v4305_v3, %v156_v52 }
  0x88   :  { %198 = vrot.lane.b32.xlu0 %v178_v54, %s4060_s23 }
  0x89   :  { %v166_v57 = vpop.permute.xlu1 %165  ;;  %v161_v58 = vpop.permute.xlu0 %160 }
  0x8a   :  { %v180_v59 = vmul.f32 %v4279_v55, %v166_v57  ;;  %v179_v60 = vmul.f32 %v4284_v56, %v161_v58  ;;  %v184_v7 = vmul.f32 %v4312_v4, %v161_v58  ;;  %v185_v11 = vmul.f32 %v4321_v9, %v166_v57 }
  0x8c   :  { %200 = vrot.lane.b32.xlu1 %v179_v60, %s4060_s23  ;;  %202 = vrot.lane.b32.xlu0 %v180_v59, %s4060_s23 }
  0x8d   :  { %v176_v63 = vpop.permute.xlu1 %175  ;;  %v171_v0 = vpop.permute.xlu0 %170 }
  0x8e   :  { %v182_v1 = vmul.f32 %v4298_v62, %v176_v63  ;;  %v181_v2 = vmul.f32 %v4293_v61, %v171_v0  ;;  %v186_v12 = vmul.f32 %v4326_v10, %v171_v0  ;;  %v187_v15 = vmul.f32 %v4335_v14, %v176_v63 }
  0x90   :  { %204 = vrot.lane.b32.xlu1 %v181_v2, %s4060_s23  ;;  %206 = vrot.lane.b32.xlu0 %v182_v1, %s4060_s23 }
  0x91   :  { %v247_v5 = vpop.permute.xlu0 %246  ;;  %v252_v8 = vpop.permute.xlu1 %251 }
  0x92   :  { %v270_v16 = vmul.f32 %v4284_v56, %v252_v8  ;;  %v269_v19 = vmul.f32 %v4270_v51, %v247_v5  ;;  %v274_v22 = vmul.f32 %v4305_v3, %v247_v5  ;;  %v275_v29 = vmul.f32 %v4312_v4, %v252_v8 }
  0x94   :  { %208 = vrot.lane.b32.xlu1 %v183_v6, %s4060_s23  ;;  %210 = vrot.lane.b32.xlu0 %v184_v7, %s4060_s23 }
  0x95   :  { %v257_v13 = vpop.permute.xlu0 %256  ;;  %v262_v17 = vpop.permute.xlu1 %261 }
  0x96   :  { %v272_v20 = vmul.f32 %v4293_v61, %v262_v17  ;;  %v271_v23 = vmul.f32 %v4279_v55, %v257_v13  ;;  %v276_v25 = vmul.f32 %v4321_v9, %v257_v13  ;;  %v277_v33 = vmul.f32 %v4326_v10, %v262_v17 }
  0x98   :  { %212 = vrot.lane.b32.xlu1 %v185_v11, %s4060_s23  ;;  %214 = vrot.lane.b32.xlu0 %v186_v12, %s4060_s23 }
  0x99   :  { %v267_v18 = vpop.permute.xlu0 %266  ;;  %v4343_v21 = vpop.permute.xlu1 %336 }
  0x9a   :  { %v273_v26 = vmul.f32 %v4298_v62, %v267_v18  ;;  %v278_v30 = vmul.f32 %v4335_v14, %v267_v18 }
  0x9c   :  { %216 = vrot.lane.b32.xlu1 %v187_v15, %s4060_s23  ;;  %291 = vrot.lane.b32.xlu0 %v270_v16, %s4061_s20 }
  0x9d   :  { %v4349_v24 = vpop.permute.xlu0 %341  ;;  %v4355_v27 = vpop.permute.xlu1 %346 }
  0xa0   :  { %289 = vrot.lane.b32.xlu1 %v269_v19, %s4061_s20  ;;  %295 = vrot.lane.b32.xlu0 %v272_v20, %s4061_s20 }
  0xa1   :  { %v4357_v28 = vpop.permute.xlu0 %351  ;;  %v4363_v31 = vpop.permute.xlu1 %356 }
  0xa4   :  { %293 = vrot.lane.b32.xlu1 %v271_v23, %s4061_s20  ;;  %299 = vrot.lane.b32.xlu0 %v274_v22, %s4061_s20 }
  0xa5   :  { %v4371_v34 = vpop.permute.xlu0 %617  ;;  %v4380_v37 = vpop.permute.xlu1 %621 }
  0xa6   :  { %6224 = vst [vmem:[#allocation2_spill] sm:$0xff] %v4371_v34  ;;  %6225 = vst [vmem:[#allocation3_spill] sm:$0xff] %v4380_v37 }
  0xa8   :  { %297 = vrot.lane.b32.xlu1 %v273_v26, %s4061_s20  ;;  %303 = vrot.lane.b32.xlu0 %v276_v25, %s4061_s20 }
  0xa9   :  { %v4382_v38 = vpop.permute.xlu0 %625  ;;  %v4390_v41 = vpop.permute.xlu1 %629 }
  0xaa   :  { %6226 = vst [vmem:[#allocation4_spill] sm:$0xff] %v4382_v38  ;;  %6227 = vst [vmem:[#allocation5_spill] sm:$0xff] %v4390_v41 }
  0xac   :  { %301 = vrot.lane.b32.xlu1 %v275_v29, %s4061_s20  ;;  %307 = vrot.lane.b32.xlu0 %v278_v30, %s4061_s20 }
  0xad   :  { %v4395_v43 = vpop.permute.xlu0 %666  ;;  %v4397_v44 = vpop.permute.xlu1 %670 }
  0xae   :  { %6228 = vst [vmem:[#allocation6_spill] sm:$0xff] %v4395_v43  ;;  %6229 = vst [vmem:[#allocation7_spill] sm:$0xff] %v4397_v44 }
  0xb0   :  { %305 = vrot.lane.b32.xlu1 %v277_v33, %s4061_s20  ;;  %1263 = vperm.xlu0 %3949, %v3736_v32  }
  0xb1   :  { %v4399_v45 = vpop.permute.xlu0 %674  ;;  %v4401_v46 = vpop.permute.xlu1 %678 }
  0xb2   :  { %6230 = vst [vmem:[#allocation8_spill] sm:$0xff] %v4399_v45  ;;  %6231 = vst [vmem:[#allocation9_spill] sm:$0xff] %v4401_v46 }
  0xb4   :  { %1267 = vperm.xlu1 %3950, %v3737_v35   ;;  %1304 = vperm.xlu0 %3949, %v3742_v36  }
  0xb5   :  { %v4403_v52 = vpop.permute.xlu0 %723  ;;  %v4405_v54 = vpop.permute.xlu1 %727 }
  0xb6   :  { %6232 = vst [vmem:[#allocation10_spill] sm:$0xff] %v4403_v52  ;;  %6233 = vst [vmem:[#allocation11_spill] sm:$0xff] %v4405_v54 }
  0xb8   :  { %1308 = vperm.xlu1 %3950, %v3743_v39   ;;  %1312 = vperm.xlu0 %3949, %v3744_v40  }
  0xb9   :  { %v4407_v57 = vpop.permute.xlu0 %731  ;;  %v4409_v58 = vpop.permute.xlu1 %735 }
  0xba   :  { %6234 = vst [vmem:[#allocation12_spill] sm:$0xff] %v4407_v57  ;;  %6235 = vst [vmem:[#allocation13_spill] sm:$0xff] %v4409_v58 }
  0xbc   :  { %1316 = vperm.xlu1 %3950, %v3745_v42  }
  0xbd   :  { %v4411_v59 = vpop.permute.xlu0 %780  ;;  %v4413_v60 = vpop.permute.xlu1 %784 }
  0xbe   :  { %6236 = vst [vmem:[#allocation14_spill] sm:$0xff] %v4411_v59  ;;  %6237 = vst [vmem:[#allocation15_spill] sm:$0xff] %v4413_v60 }
  0xc1   :  { %v4415_v63 = vpop.permute.xlu0 %788  ;;  %v4417_v0 = vpop.permute.xlu1 %792 }
  0xc2   :  { %6238 = vst [vmem:[#allocation16_spill] sm:$0xff] %v4415_v63  ;;  %6239 = vst [vmem:[#allocation17_spill] sm:$0xff] %v4417_v0 }
  0xc5   :  { %v4419_v1 = vpop.permute.xlu0 %837  ;;  %v4421_v2 = vpop.permute.xlu1 %841 }
  0xc6   :  { %6240 = vst [vmem:[#allocation18_spill] sm:$0xff] %v4419_v1  ;;  %6241 = vst [vmem:[#allocation19_spill] sm:$0xff] %v4421_v2 }
  0xc9   :  { %v4423_v5 = vpop.permute.xlu0 %845  ;;  %v4425_v6 = vpop.permute.xlu1 %849 }
  0xca   :  { %6242 = vst [vmem:[#allocation20_spill] sm:$0xff] %v4423_v5  ;;  %6243 = vst [vmem:[#allocation21_spill] sm:$0xff] %v4425_v6  ;;  %v4484_v6 = vld [vmem:[%s6165_s1] sm:$0x1f] }
  0xcd   :  { %v4427_v7 = vpop.permute.xlu0 %893  ;;  %v4429_v8 = vpop.permute.xlu1 %897 }
  0xce   :  { %6244 = vst [vmem:[#allocation22_spill] sm:$0xff] %v4427_v7  ;;  %6245 = vst [vmem:[#allocation23_spill] sm:$0xff] %v4429_v8 }
  0xd1   :  { %v4431_v11 = vpop.permute.xlu0 %901  ;;  %v4433_v12 = vpop.permute.xlu1 %905 }
  0xd2   :  { %6246 = vst [vmem:[#allocation24_spill] sm:$0xff] %v4431_v11  ;;  %6247 = vst [vmem:[#allocation25_spill] sm:$0xff] %v4433_v12 }
  0xd5   :  { %v4435_v13 = vpop.permute.xlu0 %1255  ;;  %v4437_v15 = vpop.permute.xlu1 %1259 }
  0xd6   :  { %6248 = vst [vmem:[#allocation26_spill] sm:$0xff] %v4435_v13  ;;  %6249 = vst [vmem:[#allocation27_spill] sm:$0xff] %v4437_v15 }
  0xfa   :  { %v4439_v16 = vpop.permute.xlu0 %198 }
  0xfe   :  { %v4441_v17 = vpop.permute.xlu1 %200  ;;  %v4443_v18 = vpop.permute.xlu0 %202 }
 0x102   :  { %v4445_v19 = vpop.permute.xlu1 %204  ;;  %v4447_v20 = vpop.permute.xlu0 %206 }
 0x106   :  { %v4449_v22 = vpop.permute.xlu1 %208  ;;  %v4451_v23 = vpop.permute.xlu0 %210 }
 0x10a   :  { %v4453_v25 = vpop.permute.xlu1 %212  ;;  %v4455_v26 = vpop.permute.xlu0 %214 }
 0x10e   :  { %v4457_v29 = vpop.permute.xlu1 %216  ;;  %v4459_v30 = vpop.permute.xlu0 %291 }
 0x112   :  { %v4461_v32 = vpop.permute.xlu1 %289  ;;  %v4463_v33 = vpop.permute.xlu0 %295 }
 0x116   :  { %v4465_v35 = vpop.permute.xlu1 %293  ;;  %v4467_v36 = vpop.permute.xlu0 %299 }
 0x11a   :  { %v4469_v39 = vpop.permute.xlu1 %297  ;;  %v4471_v40 = vpop.permute.xlu0 %303 }
 0x11e   :  { %v4473_v42 = vpop.permute.xlu1 %301  ;;  %v4475_v13 = vpop.permute.xlu0 %307 }
 0x122   :  { %v4477_v15 = vpop.permute.xlu1 %305 }
 0x12b   :  { %v4479_v12 = vpop.permute.xlu0 %1263 }
 0x12c   :  { %6250 = vst [vmem:[#allocation28_spill] sm:$0xff] %v4479_v12  ;;  %v4497_v12 = vld [vmem:[%s6165_s1 + $0x8] sm:$0x1f] }
 0x12f   :  { %v4486_v11 = vpop.permute.xlu1 %1267  ;;  %v1305_v0 = vpop.permute.xlu0 %1304 }
 0x130   :  { %6251 = vst [vmem:[#allocation29_spill] sm:$0xff] %v4486_v11  ;;  %v1319_v7 = vmul.f32 %v1305_v0, %v4484_v6  ;;  %v1323_v1 = vmul.f32 %v1305_v0, %v4497_v12 }
 0x132   :  { %1335 = vrot.lane.b32.xlu0 %v1319_v7, %s4060_s23 }
 0x133   :  { %v1309_v58 = vpop.permute.xlu1 %1308  ;;  %v1313_v5 = vpop.permute.xlu0 %1312 }
 0x134   :  { %v1320_v8 = vmul.f32 %v1309_v58, %v4484_v6  ;;  %v1321_v41 = vmul.f32 %v1313_v5, %v4484_v6  ;;  %v1324_v46 = vmul.f32 %v1309_v58, %v4497_v12  ;;  %v3752_v58 = vld [vmem:[%s6163_s5 + $0xa] ss:$0 sm:$0xff] }
 0x136   :  { %1337 = vrot.lane.b32.xlu1 %v1320_v8, %s4060_s23  ;;  %1339 = vrot.lane.b32.xlu0 %v1321_v41, %s4060_s23  ;;  %v1325_v8 = vmul.f32 %v1313_v5, %v4497_v12  ;;  %v3750_v41 = vld [vmem:[%s6163_s5 + $0x8] ss:$0 sm:$0xff] }
 0x137   :  { %v1317_v11 = vpop.permute.xlu1 %1316 }
 0x138   :  { %v1322_v7 = vmul.f32 %v1317_v11, %v4484_v6  ;;  %v1326_v0 = vmul.f32 %v1317_v11, %v4497_v12 }
 0x13a   :  { %1341 = vrot.lane.b32.xlu1 %v1322_v7, %s4060_s23  ;;  %1343 = vrot.lane.b32.xlu0 %v1323_v1, %s4060_s23  ;;  %v3751_v1 = vld [vmem:[%s6163_s5 + $0x9] ss:$0 sm:$0xff] }
 0x13e   :  { %1345 = vrot.lane.b32.xlu1 %v1324_v46, %s4060_s23  ;;  %1347 = vrot.lane.b32.xlu0 %v1325_v8, %s4060_s23  ;;  %v3753_v46 = vld [vmem:[%s6163_s5 + $0xb] ss:$0 sm:$0xff] }
 0x142   :  { %1349 = vrot.lane.b32.xlu1 %v1326_v0, %s4060_s23  ;;  %1393 = vperm.xlu0 %3949, %v3750_v41  }
 0x146   :  { %1397 = vperm.xlu1 %3950, %v3751_v1   ;;  %1401 = vperm.xlu0 %3949, %v3752_v58  }
 0x14a   :  { %1405 = vperm.xlu1 %3950, %v3753_v46  }
 0x1a4   :  { %v4521_v5 = vpop.permute.xlu0 %1335 }
 0x1a5   :  { %6252 = vst [vmem:[#allocation30_spill] sm:$0xff] %v4521_v5 }
 0x1a8   :  { %v4523_v11 = vpop.permute.xlu1 %1337  ;;  %v4525_v7 = vpop.permute.xlu0 %1339 }
 0x1a9   :  { %6253 = vst [vmem:[#allocation31_spill] sm:$0xff] %v4523_v11  ;;  %6254 = vst [vmem:[#allocation32_spill] sm:$0xff] %v4525_v7 }
 0x1ac   :  { %v4527_v8 = vpop.permute.xlu1 %1341  ;;  %v4529_v41 = vpop.permute.xlu0 %1343 }
 0x1ad   :  { %6255 = vst [vmem:[#allocation33_spill] sm:$0xff] %v4527_v8  ;;  %6256 = vst [vmem:[#allocation34_spill] sm:$0xff] %v4529_v41 }
 0x1b0   :  { %v4531_v0 = vpop.permute.xlu1 %1345  ;;  %v4533_v63 = vpop.permute.xlu0 %1347 }
 0x1b1   :  { %6257 = vst [vmem:[#allocation35_spill] sm:$0xff] %v4531_v0  ;;  %6258 = vst [vmem:[#allocation36_spill] sm:$0xff] %v4533_v63  ;;  %v3820_v0 = vld [vmem:[%s6166_s6 + $0x30] sm:$0x1f] }
 0x1b4   :  { %v4535_v1 = vpop.permute.xlu1 %1349 }
 0x1b5   :  { %6259 = vst [vmem:[#allocation37_spill] sm:$0xff] %v4535_v1  ;;  %v3819_v1 = vld [vmem:[%s6166_s6 + $0x28] sm:$0x1f] }
 0x1bd   :  { %v4537_v58 = vpop.permute.xlu0 %1393 }
 0x1be   :  { %6260 = vst [vmem:[#allocation38_spill] sm:$0xff] %v4537_v58  ;;  %v1408_v46 = vmul.f32 %v4537_v58, %v4484_v6 }
 0x1c0   :  { %1424 = vrot.lane.b32.xlu0 %v1408_v46, %s4061_s20  ;;  %v3818_v46 = vld [vmem:[%s6166_s6 + $0x20] sm:$0x1f] }
 0x1c1   :  { %v4542_v5 = vpop.permute.xlu1 %1397  ;;  %v4544_v7 = vpop.permute.xlu0 %1401 }
 0x1c2   :  { %6261 = vst [vmem:[#allocation39_spill] sm:$0xff] %v4542_v5  ;;  %6262 = vst [vmem:[#allocation40_spill] sm:$0xff] %v4544_v7  ;;  %v1409_v8 = vmul.f32 %v4542_v5, %v4484_v6  ;;  %v1410_v11 = vmul.f32 %v4544_v7, %v4484_v6 }
 0x1c4   :  { %1426 = vrot.lane.b32.xlu1 %v1409_v8, %s4061_s20  ;;  %1428 = vrot.lane.b32.xlu0 %v1410_v11, %s4061_s20  ;;  %v3822_v11 = vld [vmem:[%s6166_s6 + $0x40] sm:$0x1f]  ;;  %v3823_v8 = vld [vmem:[%s6166_s6 + $0x48] sm:$0x1f] }
 0x1c5   :  { %v4552_v63 = vpop.permute.xlu1 %1405 }
 0x1c6   :  { %6263 = vst [vmem:[#allocation41_spill] sm:$0xff] %v4552_v63  ;;  %v1411_v41 = vmul.f32 %v4552_v63, %v4484_v6 }
 0x1c8   :  { %1430 = vrot.lane.b32.xlu1 %v1411_v41, %s4061_s20  ;;  %2426 = vperm.xlu0 %3949, %v3818_v46   ;;  %v3821_v41 = vld [vmem:[%s6166_s6 + $0x38] sm:$0x1f]  ;;  %v3826_v46 = vld [vmem:[%s6166_s6 + $0x60] sm:$0x1f] }
 0x1cc   :  { %2431 = vperm.xlu1 %3950, %v3819_v1   ;;  %2499 = vperm.xlu0 %3949, %v3822_v11   ;;  %v3827_v1 = vld [vmem:[%s6166_s6 + $0x68] sm:$0x1f]  ;;  %v3824_v11 = vld [vmem:[%s6166_s6 + $0x50] sm:$0x1f] }
 0x1d0   :  { %2504 = vperm.xlu1 %3950, %v3823_v8   ;;  %2436 = vperm.xlu0 %3949, %v3820_v0   ;;  %v3825_v0 = vld [vmem:[%s6166_s6 + $0x58] sm:$0x1f]  ;;  %v137_v8 = vmul.f32 %v4270_v51, %v4261_v48  ;;  %v138_v51 = vmul.f32 %v4284_v56, %v4265_v50 }
 0x1d4   :  { %2441 = vperm.xlu1 %3950, %v3821_v41   ;;  %2572 = vperm.xlu0 %3949, %v3826_v46   ;;  %v228_v41 = vadd.f32 %v4439_v16, %v137_v8  ;;  %v139_v46 = vmul.f32 %v4279_v55, %v4259_v47  ;;  %v142_v55 = vmul.f32 %v4305_v3, %v4261_v48 }
 0x1d5   :  { %v143_v3 = vmul.f32 %v4312_v4, %v4265_v50 }
 0x1d6   :  { %v319_v7 = vadd.f32 %v4461_v32, %v228_v41  ;;  %v230_v58 = vadd.f32 %v4443_v18, %v139_v46 }
 0x1d8   :  { %2577 = vperm.xlu1 %3950, %v3827_v1   ;;  %2509 = vperm.xlu0 %3949, %v3824_v11   ;;  %v140_v1 = vmul.f32 %v4293_v61, %v4263_v49  ;;  %v359_v11 = vadd.f32 %v4343_v21, %v319_v7  ;;  %v321_v63 = vadd.f32 %v4465_v35, %v230_v58 }
 0x1d9   :  { %v141_v61 = vmul.f32 %v4298_v62, %v4272_v53  ;;  %v233_v7 = vadd.f32 %v4449_v22, %v142_v55  ;;  %v234_v22 = vadd.f32 %v4451_v23, %v143_v3 }
 0x1da   :  { %v231_v16 = vadd.f32 %v4445_v19, %v140_v1  ;;  %3951 = vtanh.f32 %v359_v11  ;;  %v361_v32 = vadd.f32 %v4355_v27, %v321_v63 }
 0x1db   :  { %v232_v56 = vadd.f32 %v4447_v20, %v141_v61  ;;  %v324_v48 = vadd.f32 %v4467_v36, %v233_v7  ;;  %v146_v20 = vmul.f32 %v4335_v14, %v4272_v53  ;;  %v325_v4 = vadd.f32 %v4473_v42, %v234_v22 }
 0x1dc   :  { %2514 = vperm.xlu1 %3950, %v3825_v0   ;;  %v229_v0 = vadd.f32 %v4441_v17, %v138_v51  ;;  %v322_v18 = vadd.f32 %v4463_v33, %v231_v16  ;;  %v144_v17 = vmul.f32 %v4321_v9, %v4259_v47  ;;  %3953 = vtanh.f32 %v361_v32 }
 0x1dd   :  { %v323_v62 = vadd.f32 %v4469_v39, %v232_v56  ;;  %v364_v47 = vadd.f32 %v4343_v21, %v324_v48  ;;  %v145_v33 = vmul.f32 %v4326_v10, %v4263_v49  ;;  %v365_v36 = vadd.f32 %v4349_v24, %v325_v4  ;;  %v3831_v4 = vld [vmem:[%s6166_s6 + $0x88] sm:$0x1f] }
 0x1de   :  { %v320_v35 = vadd.f32 %v4459_v30, %v229_v0  ;;  %v362_v19 = vadd.f32 %v4357_v28, %v322_v18  ;;  %v235_v30 = vadd.f32 %v4453_v25, %v144_v17  ;;  %v237_v25 = vadd.f32 %v4457_v29, %v146_v20 }
 0x1df   :  { %v363_v50 = vadd.f32 %v4363_v31, %v323_v62  ;;  %v236_v23 = vadd.f32 %v4455_v26, %v145_v33 }
 0x1e0   :  { %v360_v63 = vadd.f32 %v4349_v24, %v320_v35  ;;  %3955 = vtanh.f32 %v362_v19  ;;  %v326_v9 = vadd.f32 %v4471_v40, %v235_v30  ;;  %v328_v14 = vadd.f32 %v4475_v13, %v237_v25  ;;  %v3830_v25 = vld [vmem:[%s6166_s6 + $0x80] sm:$0x1f] }
 0x1e1   :  { %v327_v49 = vadd.f32 %v4477_v15, %v236_v23  ;;  %v3829_v23 = vld [vmem:[%s6166_s6 + $0x78] sm:$0x1f] }
 0x1e2   :  { %3957 = vtanh.f32 %v360_v63  ;;  %v366_v53 = vadd.f32 %v4355_v27, %v326_v9  ;;  %v368_v10 = vadd.f32 %v4363_v31, %v328_v14  ;;  %v3833_v14 = vld [vmem:[%s6166_s6 + $0x98] sm:$0x1f] }
 0x1e3   :  { %3959 = vtanh.f32 %v364_v47  ;;  %v367_v27 = vadd.f32 %v4357_v28, %v327_v49  ;;  %v3832_v49 = vld [vmem:[%s6166_s6 + $0x90] sm:$0x1f] }
 0x1e4   :  { %3961 = vtanh.f32 %v363_v50 }
 0x1e5   :  { %3963 = vtanh.f32 %v366_v53  ;;  %v3828_v53 = vld [vmem:[%s6166_s6 + $0x70] sm:$0x1f] }
 0x1e6   :  { %3965 = vtanh.f32 %v365_v36 }
 0x1e7   :  { %v4633_v21 = vpop.eup %3951  ;;  %3967 = vtanh.f32 %v368_v10  ;;  %v2388_v10 = vld [vmem:[%s6166_s6 + $0x8] sm:$0x1f] }
 0x1e8   :  { %6264 = vst [vmem:[#allocation42_spill] sm:$0xff] %v4633_v21  ;;  %v390_v29 = vsel %vm389_vm0, %v4633_v21, 0.0  ;;  %3969 = vtanh.f32 %v367_v27  ;;  %v379_v18 = vmul.f32 %v4633_v21, %v4633_v21  ;;  %v2387_v27 = vld [vmem:[%s6166_s6] sm:$0x1f] }
 0x1e9   :  { %v4640_v26 = vpop.eup %3953 }
 0x1ea   :  { %6265 = vst [vmem:[#allocation43_spill] sm:$0xff] %v4640_v26  ;;  %v396_v13 = vsel %vm389_vm0, %v4640_v26, 0.0  ;;  %v420_v35 = vsel %vm389_vm0, %v379_v18, 0.0  ;;  %v381_v7 = vmul.f32 %v4640_v26, %v4640_v26 }
 0x1ec   :  { %v426_v19 = vsel %vm389_vm0, %v381_v7, 0.0 }
 0x1ed   :  { %v4645_v24 = vpop.eup %3955 }
 0x1ee   :  { %6266 = vst [vmem:[#allocation44_spill] sm:$0xff] %v4645_v24  ;;  %v399_v31 = vsel %vm389_vm0, %v4645_v24, 0.0  ;;  %v382_v61 = vmul.f32 %v4645_v24, %v4645_v24 }
 0x1ef   :  { %v4647_v15 = vpop.eup %3957 }
 0x1f0   :  { %6267 = vst [vmem:[#allocation45_spill] sm:$0xff] %v4647_v15  ;;  %v4651_v39 = vpop.eup %3959  ;;  %v393_v28 = vsel %vm389_vm0, %v4647_v15, 0.0  ;;  %v380_v0 = vmul.f32 %v4647_v15, %v4647_v15  ;;  %v429_v56 = vsel %vm389_vm0, %v382_v61, 0.0 }
 0x1f1   :  { %6268 = vst [vmem:[#allocation46_spill] sm:$0xff] %v4651_v39  ;;  %v4655_v40 = vpop.eup %3961  ;;  %v405_v42 = vsel %vm389_vm0, %v4651_v39, 0.0  ;;  %v384_v17 = vmul.f32 %v4651_v39, %v4651_v39 }
 0x1f2   :  { %6269 = vst [vmem:[#allocation47_spill] sm:$0xff] %v4655_v40  ;;  %v4659_v58 = vpop.eup %3963  ;;  %v402_v8 = vsel %vm389_vm0, %v4655_v40, 0.0  ;;  %v423_v32 = vsel %vm389_vm0, %v380_v0, 0.0  ;;  %v383_v48 = vmul.f32 %v4655_v40, %v4655_v40 }
 0x1f3   :  { %6270 = vst [vmem:[#allocation48_spill] sm:$0xff] %v4659_v58  ;;  %v4663_v41 = vpop.eup %3965  ;;  %v411_v46 = vsel %vm389_vm0, %v4659_v58, 0.0  ;;  %v435_v3 = vsel %vm389_vm0, %v384_v17, 0.0  ;;  %v386_v63 = vmul.f32 %v4659_v58, %v4659_v58 }
 0x1f4   :  { %6271 = vst [vmem:[#allocation49_spill] sm:$0xff] %v4663_v41  ;;  %v4667_v1 = vpop.eup %3967  ;;  %v408_v11 = vsel %vm389_vm0, %v4663_v41, 0.0  ;;  %v432_v62 = vsel %vm389_vm0, %v383_v48, 0.0  ;;  %v385_v30 = vmul.f32 %v4663_v41, %v4663_v41 }
 0x1f5   :  { %6272 = vst [vmem:[#allocation50_spill] sm:$0xff] %v4667_v1  ;;  %v4671_v51 = vpop.eup %3969  ;;  %v417_v16 = vsel %vm389_vm0, %v4667_v1, 0.0  ;;  %v441_v22 = vsel %vm389_vm0, %v386_v63, 0.0  ;;  %v388_v20 = vmul.f32 %v4667_v1, %v4667_v1 }
 0x1f6   :  { %6273 = vst [vmem:[#allocation51_spill] sm:$0xff] %v4671_v51  ;;  %v414_v55 = vsel %vm389_vm0, %v4671_v51, 0.0  ;;  %v438_v47 = vsel %vm389_vm0, %v385_v30, 0.0  ;;  %v387_v9 = vmul.f32 %v4671_v51, %v4671_v51 }
 0x1f7   :  { %391 = vadd.xlane.f32.xlu0 %v390_v29  ;;  %v447_v33 = vsel %vm389_vm0, %v388_v20, 0.0 }
 0x1f8   :  { %v444_v50 = vsel %vm389_vm0, %v387_v9, 0.0 }
 0x1fb   :  { %397 = vadd.xlane.f32.xlu0 %v396_v13  ;;  %v2390_v13 = vld [vmem:[%s6166_s6 + $0x18] sm:$0x1f] }
 0x1ff   :  { %400 = vadd.xlane.f32.xlu0 %v399_v31 }
 0x200   :  { %394 = vadd.xlane.f32.xlu1 %v393_v28  ;;  %v2389_v28 = vld [vmem:[%s6166_s6 + $0x10] sm:$0x1f]  ;;  %s4062_s6 = smov 125  }
 0x203   :  { %406 = vadd.xlane.f32.xlu0 %v405_v42 }
 0x204   :  { %403 = vadd.xlane.f32.xlu1 %v402_v8 }
 0x207   :  { %412 = vadd.xlane.f32.xlu0 %v411_v46 }
 0x208   :  { %409 = vadd.xlane.f32.xlu1 %v408_v11 }
 0x20b   :  { %418 = vadd.xlane.f32.xlu0 %v417_v16 }
 0x20c   :  { %415 = vadd.xlane.f32.xlu1 %v414_v55 }
 0x20f   :  { %424 = vadd.xlane.f32.xlu0 %v423_v32 }
 0x210   :  { %421 = vadd.xlane.f32.xlu1 %v420_v35 }
 0x213   :  { %430 = vadd.xlane.f32.xlu0 %v429_v56 }
 0x214   :  { %427 = vadd.xlane.f32.xlu1 %v426_v19 }
 0x217   :  { %436 = vadd.xlane.f32.xlu0 %v435_v3 }
 0x218   :  { %433 = vadd.xlane.f32.xlu1 %v432_v62 }
 0x21b   :  { %442 = vadd.xlane.f32.xlu0 %v441_v22 }
 0x21c   :  { %439 = vadd.xlane.f32.xlu1 %v438_v47 }
 0x21f   :  { %448 = vadd.xlane.f32.xlu0 %v447_v33 }
 0x220   :  { %445 = vadd.xlane.f32.xlu1 %v444_v50 }
 0x231   :  { %2650 = vperm.xlu1 %3950, %v3831_v4  }
 0x232   :  { %v4722_v36 = vpop.permute.xlu0 %1424 }
 0x233   :  { %6274 = vst [vmem:[#allocation52_spill] sm:$0xff] %v4722_v36 }
 0x235   :  { %2645 = vperm.xlu0 %3949, %v3830_v25   ;;  %2587 = vperm.xlu1 %3950, %v3829_v23  }
 0x236   :  { %v4730_v29 = vpop.permute.xlu1 %1426  ;;  %v4738_v31 = vpop.permute.xlu0 %1428 }
 0x237   :  { %6275 = vst [vmem:[#allocation53_spill] sm:$0xff] %v4730_v29  ;;  %6276 = vst [vmem:[#allocation54_spill] sm:$0xff] %v4738_v31 }
 0x239   :  { %2582 = vperm.xlu0 %3949, %v3828_v53   ;;  %2660 = vperm.xlu1 %3950, %v3833_v14  }
 0x23a   :  { %v4743_v42 = vpop.permute.xlu1 %1430 }
 0x23b   :  { %6277 = vst [vmem:[#allocation55_spill] sm:$0xff] %v4743_v42 }
 0x23d   :  { %2655 = vperm.xlu0 %3949, %v3832_v49   ;;  %2398 = vperm.xlu1 %3950, %v2388_v10  }
 0x241   :  { %2393 = vperm.xlu0 %3949, %v2387_v27   ;;  %2408 = vperm.xlu1 %3950, %v2390_v13  }
 0x243   :  { %v2427_v8 = vpop.permute.xlu0 %2426 }
 0x244   :  { %v2444_v46 = vmul.f32 %v2427_v8, %v4484_v6  ;;  %v2448_v0 = vmul.f32 %v2427_v8, %v4497_v12 }
 0x245   :  { %2403 = vperm.xlu0 %3949, %v2389_v28  }
 0x247   :  { %v2432_v11 = vpop.permute.xlu1 %2431  ;;  %v2500_v18 = vpop.permute.xlu0 %2499 }
 0x248   :  { %v2445_v16 = vmul.f32 %v2432_v11, %v4484_v6  ;;  %v2449_v55 = vmul.f32 %v2432_v11, %v4497_v12  ;;  %v2517_v61 = vmul.f32 %v2500_v18, %v4484_v6  ;;  %v2521_v7 = vmul.f32 %v2500_v18, %v4497_v12 }
 0x249   :  { %2460 = vrot.lane.b32.xlu0 %v2444_v46, %s4060_s23 }
 0x24a   :  { %2462 = vrot.lane.b32.xlu1 %v2445_v16, %s4060_s23 }
 0x24b   :  { %v2505_v32 = vpop.permute.xlu1 %2504  ;;  %v2437_v17 = vpop.permute.xlu0 %2436 }
 0x24c   :  { %v2518_v35 = vmul.f32 %v2505_v32, %v4484_v6  ;;  %v2522_v56 = vmul.f32 %v2505_v32, %v4497_v12  ;;  %v2446_v48 = vmul.f32 %v2437_v17, %v4484_v6  ;;  %v2450_v63 = vmul.f32 %v2437_v17, %v4497_v12 }
 0x24d   :  { %2468 = vrot.lane.b32.xlu0 %v2448_v0, %s4060_s23 }
 0x24e   :  { %2470 = vrot.lane.b32.xlu1 %v2449_v55, %s4060_s23 }
 0x24f   :  { %v2442_v19 = vpop.permute.xlu1 %2441  ;;  %v2573_v30 = vpop.permute.xlu0 %2572 }
 0x250   :  { %v2447_v3 = vmul.f32 %v2442_v19, %v4484_v6  ;;  %v2451_v62 = vmul.f32 %v2442_v19, %v4497_v12  ;;  %v2590_v20 = vmul.f32 %v2573_v30, %v4484_v6  ;;  %v2594_v9 = vmul.f32 %v2573_v30, %v4497_v12 }
 0x251   :  { %2533 = vrot.lane.b32.xlu0 %v2517_v61, %s4061_s20 }
 0x252   :  { %2535 = vrot.lane.b32.xlu1 %v2518_v35, %s4061_s20 }
 0x253   :  { %v2578_v22 = vpop.permute.xlu1 %2577  ;;  %v2510_v50 = vpop.permute.xlu0 %2509 }
 0x254   :  { %v2591_v47 = vmul.f32 %v2578_v22, %v4484_v6  ;;  %v2595_v33 = vmul.f32 %v2578_v22, %v4497_v12  ;;  %v2519_v25 = vmul.f32 %v2510_v50, %v4484_v6  ;;  %v2523_v53 = vmul.f32 %v2510_v50, %v4497_v12 }
 0x255   :  { %2541 = vrot.lane.b32.xlu0 %v2521_v7, %s4061_s20 }
 0x256   :  { %2543 = vrot.lane.b32.xlu1 %v2522_v56, %s4061_s20 }
 0x257   :  { %v2515_v4 = vpop.permute.xlu1 %2514 }
 0x258   :  { %v2520_v23 = vmul.f32 %v2515_v4, %v4484_v6  ;;  %v2524_v14 = vmul.f32 %v2515_v4, %v4497_v12 }
 0x259   :  { %2464 = vrot.lane.b32.xlu0 %v2446_v48, %s4060_s23 }
 0x25a   :  { %2466 = vrot.lane.b32.xlu1 %v2447_v3, %s4060_s23 }
 0x25d   :  { %2472 = vrot.lane.b32.xlu0 %v2450_v63, %s4060_s23 }
 0x25e   :  { %2474 = vrot.lane.b32.xlu1 %v2451_v62, %s4060_s23 }
 0x261   :  { %2606 = vrot.lane.b32.xlu0 %v2590_v20, %s4062_s6 }
 0x262   :  { %2608 = vrot.lane.b32.xlu1 %v2591_v47, %s4062_s6 }
 0x265   :  { %2614 = vrot.lane.b32.xlu0 %v2594_v9, %s4062_s6 }
 0x266   :  { %2616 = vrot.lane.b32.xlu1 %v2595_v33, %s4062_s6 }
 0x269   :  { %2537 = vrot.lane.b32.xlu0 %v2519_v25, %s4061_s20 }
 0x26a   :  { %2539 = vrot.lane.b32.xlu1 %v2520_v23, %s4061_s20 }
 0x26d   :  { %2545 = vrot.lane.b32.xlu0 %v2523_v53, %s4061_s20 }
 0x26e   :  { %2547 = vrot.lane.b32.xlu1 %v2524_v14, %s4061_s20 }
 0x280   :  { %v4785_v49 = vpop.xlane.xlu0 %391 }
 0x284   :  { %v4787_v10 = vpop.xlane.xlu0 %397 }
 0x288   :  { %v4789_v27 = vpop.xlane.xlu0 %400 }
 0x289   :  { %v4791_v13 = vpop.xlane.xlu1 %394 }
 0x28c   :  { %v4793_v28 = vpop.xlane.xlu0 %406 }
 0x28d   :  { %v4795_v8 = vpop.xlane.xlu1 %403 }
 0x290   :  { %v4797_v46 = vpop.xlane.xlu0 %412 }
 0x291   :  { %v4799_v11 = vpop.xlane.xlu1 %409 }
 0x294   :  { %v4801_v16 = vpop.xlane.xlu0 %418 }
 0x295   :  { %v4803_v0 = vpop.xlane.xlu1 %415 }
 0x298   :  { %v4805_v55 = vpop.xlane.xlu0 %424 }
 0x299   :  { %v4807_v18 = vpop.xlane.xlu1 %421 }
 0x29c   :  { %v4809_v32 = vpop.xlane.xlu0 %430 }
 0x29d   :  { %v4811_v61 = vpop.xlane.xlu1 %427 }
 0x2a0   :  { %v4813_v35 = vpop.xlane.xlu0 %436 }
 0x2a1   :  { %v4815_v7 = vpop.xlane.xlu1 %433 }
 0x2a4   :  { %v4819_v17 = vpop.xlane.xlu0 %442 }
 0x2a5   :  { %v4817_v56 = vpop.xlane.xlu1 %439 }
 0x2a8   :  { %v4823_v48 = vpop.xlane.xlu0 %448 }
 0x2a9   :  { %v4821_v19 = vpop.xlane.xlu1 %445 }
 0x2ad   :  { %v2651_v3 = vpop.permute.xlu1 %2650 }
 0x2ae   :  { %v2664_v63 = vmul.f32 %v2651_v3, %v4484_v6  ;;  %v2668_v22 = vmul.f32 %v2651_v3, %v4497_v12 }
 0x2b0   :  { %v2646_v62 = vpop.permute.xlu0 %2645  ;;  %2681 = vrot.lane.b32.xlu1 %v2664_v63, %s4063_s21 }
 0x2b1   :  { %v2663_v30 = vmul.f32 %v2646_v62, %v4484_v6  ;;  %v2588_v20 = vpop.permute.xlu1 %2587  ;;  %v2667_v47 = vmul.f32 %v2646_v62, %v4497_v12 }
 0x2b2   :  { %v2593_v9 = vmul.f32 %v2588_v20, %v4484_v6  ;;  %v2597_v4 = vmul.f32 %v2588_v20, %v4497_v12 }
 0x2b3   :  { %2679 = vrot.lane.b32.xlu0 %v2663_v30, %s4063_s21  ;;  %v3835_v30 = vld [vmem:[%s6162_s7 + $0x19] sm:$0x1] }
 0x2b4   :  { %2689 = vrot.lane.b32.xlu1 %v2668_v22, %s4063_s21  ;;  %v2583_v33 = vpop.permute.xlu0 %2582  ;;  %v3834_v22 = vld [vmem:[%s6162_s7 + $0x18] sm:$0x1] }
 0x2b5   :  { %v2592_v50 = vmul.f32 %v2583_v33, %v4484_v6  ;;  %v2661_v25 = vpop.permute.xlu1 %2660  ;;  %v2596_v23 = vmul.f32 %v2583_v33, %v4497_v12 }
 0x2b6   :  { %v2666_v53 = vmul.f32 %v2661_v25, %v4484_v6  ;;  %v2670_v63 = vmul.f32 %v2661_v25, %v4497_v12 }
 0x2b7   :  { %2687 = vrot.lane.b32.xlu0 %v2667_v47, %s4063_s21 }
 0x2b8   :  { %2612 = vrot.lane.b32.xlu1 %v2593_v9, %s4062_s6  ;;  %v2656_v14 = vpop.permute.xlu0 %2655 }
 0x2b9   :  { %v2665_v3 = vmul.f32 %v2656_v14, %v4484_v6  ;;  %v2669_v62 = vmul.f32 %v2656_v14, %v4497_v12  ;;  %v2399_v20 = vpop.permute.xlu1 %2398 }
 0x2ba   :  { %v2412_v1 = vmul.f32 %v2399_v20, %v4484_v6  ;;  %v2416_v24 = vmul.f32 %v2399_v20, %v4497_v12 }
 0x2bb   :  { %2610 = vrot.lane.b32.xlu0 %v2592_v50, %s4062_s6 }
 0x2bc   :  { %2620 = vrot.lane.b32.xlu1 %v2597_v4, %s4062_s6  ;;  %v2394_v47 = vpop.permute.xlu0 %2393 }
 0x2bd   :  { %v4847_v9 = vpop.permute.xlu1 %2408  ;;  %v2411_v45 = vmul.f32 %v2394_v47, %v4484_v6  ;;  %v2415_v40 = vmul.f32 %v2394_v47, %v4497_v12 }
 0x2bf   :  { %2618 = vrot.lane.b32.xlu0 %v2596_v23, %s4062_s6 }
 0x2c0   :  { %2685 = vrot.lane.b32.xlu1 %v2666_v53, %s4063_s21  ;;  %v4849_v33 = vpop.permute.xlu0 %2403 }
 0x2c1   :  { %v2463_v50 = vpop.permute.xlu1 %2462 }
 0x2c2   :  { %v2485_v60 = vadd.f32 %v2463_v50, %v2412_v1 }
 0x2c3   :  { %2683 = vrot.lane.b32.xlu0 %v2665_v3, %s4063_s21 }
 0x2c4   :  { %2693 = vrot.lane.b32.xlu1 %v2670_v63, %s4063_s21  ;;  %v2461_v4 = vpop.permute.xlu0 %2460 }
 0x2c5   :  { %v2471_v25 = vpop.permute.xlu1 %2470  ;;  %v2484_v51 = vadd.f32 %v2461_v4, %v2411_v45 }
 0x2c6   :  { %v2489_v21 = vadd.f32 %v2471_v25, %v2416_v24 }
 0x2c7   :  { %2691 = vrot.lane.b32.xlu0 %v2669_v62, %s4063_s21 }
 0x2c8   :  { %2784 = vperm.xlu1 %3950, %v3835_v30   ;;  %v2469_v23 = vpop.permute.xlu0 %2468 }
 0x2c9   :  { %v2536_v53 = vpop.permute.xlu1 %2535  ;;  %v2488_v43 = vadd.f32 %v2469_v23, %v2415_v40 }
 0x2ca   :  { %v2558_v54 = vadd.f32 %v2536_v53, %v2485_v60 }
 0x2cb   :  { %2775 = vperm.xlu0 %3949, %v3834_v22  }
 0x2cc   :  { %v2534_v14 = vpop.permute.xlu0 %2533 }
 0x2cd   :  { %v2544_v3 = vpop.permute.xlu1 %2543  ;;  %v2557_v44 = vadd.f32 %v2534_v14, %v2484_v51 }
 0x2ce   :  { %v2562_v1 = vadd.f32 %v2544_v3, %v2489_v21 }
 0x2d0   :  { %v2542_v63 = vpop.permute.xlu0 %2541 }
 0x2d1   :  { %v4851_v62 = vpop.permute.xlu1 %2466  ;;  %v2561_v26 = vadd.f32 %v2542_v63, %v2488_v43 }
 0x2d4   :  { %v4853_v30 = vpop.permute.xlu0 %2464 }
 0x2d5   :  { %v4855_v31 = vpop.permute.xlu1 %2474 }
 0x2d8   :  { %v4857_v22 = vpop.permute.xlu0 %2472 }
 0x2d9   :  { %v2609_v42 = vpop.permute.xlu1 %2608 }
 0x2da   :  { %v2631_v58 = vadd.f32 %v2609_v42, %v2558_v54 }
 0x2dc   :  { %v2607_v36 = vpop.permute.xlu0 %2606 }
 0x2dd   :  { %v2617_v29 = vpop.permute.xlu1 %2616  ;;  %v2630_v15 = vadd.f32 %v2607_v36, %v2557_v44 }
 0x2de   :  { %v2635_v45 = vadd.f32 %v2617_v29, %v2562_v1 }
 0x2e0   :  { %v2615_v5 = vpop.permute.xlu0 %2614 }
 0x2e1   :  { %v4859_v2 = vpop.permute.xlu1 %2539 }
 0x2e4   :  { %v4861_v57 = vpop.permute.xlu0 %2537 }
 0x2e5   :  { %v4863_v59 = vpop.permute.xlu1 %2547 }
 0x2e8   :  { %v4866_v52 = vpop.permute.xlu0 %2545 }
 0x2e9   :  { %6278 = vst [vmem:[#allocation56_spill] sm:$0xff] %v4866_v52  ;;  %v2634_v52 = vadd.f32 %v2615_v5, %v2561_v26 }
 0x322   :  { %v2682_v38 = vpop.permute.xlu1 %2681 }
 0x323   :  { %v2704_v39 = vadd.f32 %v2682_v38, %v2631_v58 }
 0x325   :  { %v2680_v34 = vpop.permute.xlu0 %2679  ;;  %v2719_v60 = vsel %vm2711_vm1, %v2704_v39, 0.0 }
 0x326   :  { %v2690_v37 = vpop.permute.xlu1 %2689  ;;  %v2703_v6 = vadd.f32 %v2680_v34, %v2630_v15  ;;  %v2720_v54 = vrot.slane %v2719_v60, 4 }
 0x327   :  { %v2708_v12 = vadd.f32 %v2690_v37, %v2635_v45 }
 0x328   :  { %v2712_v40 = vsel %vm2711_vm1, %v2703_v6, 0.0  ;;  %v2721_v21 = vadd.f32 %v2720_v54, %v2719_v60 }
 0x329   :  { %v2688_v41 = vpop.permute.xlu0 %2687  ;;  %v2713_v24 = vrot.slane %v2712_v40, 4  ;;  %v2747_v34 = vsel %vm2711_vm1, %v2708_v12, 0.0 }
 0x32a   :  { %v2707_v50 = vadd.f32 %v2688_v41, %v2634_v52  ;;  %v4872_v47 = vpop.permute.xlu1 %2612  ;;  %v2748_v15 = vrot.slane %v2747_v34, 4  ;;  %v2722_v58 = vrot.slane %v2721_v21, 2  ;;  %v1138_v41 = vlaneseq }
 0x32b   :  { %v2714_v26 = vadd.f32 %v2713_v24, %v2712_v40 }
 0x32c   :  { %v2740_v43 = vsel %vm2711_vm1, %v2707_v50, 0.0  ;;  %v2749_v36 = vadd.f32 %v2748_v15, %v2747_v34  ;;  %v2723_v42 = vadd.f32 %v2722_v58, %v2721_v21  ;;  %v1139_v4 = vshrl.u32 %v1138_v41, 7 }
 0x32d   :  { %v4876_v38 = vpop.permute.xlu0 %2610  ;;  %v2741_v44 = vrot.slane %v2740_v43, 4  ;;  %v2715_v37 = vrot.slane %v2714_v26, 2  ;;  %v450_v58 = vadd.f32 %v4793_v28, %v4785_v49 }
 0x32e   :  { %v4878_v5 = vpop.permute.xlu1 %2620  ;;  %v2750_v23 = vrot.slane %v2749_v36, 2  ;;  %v4889_v3 = vsub.s32 0, %v1139_v4  ;;  %v2724_v63 = vrot.slane %v2723_v42, 1  ;;  %v457_v4 = vadd.f32 %v4819_v17, %v4811_v61 }
 0x32f   :  { %v2742_v39 = vadd.f32 %v2741_v44, %v2740_v43  ;;  %v2716_v25 = vadd.f32 %v2715_v37, %v2714_v26  ;;  %v455_v37 = vadd.f32 %v4813_v35, %v4807_v18  ;;  %v453_v18 = vadd.f32 %v4803_v0, %v4789_v27 }
 0x330   :  { %v2751_v6 = vadd.f32 %v2750_v23, %v2749_v36  ;;  %v2725_v54 = vadd.f32 %v2724_v63, %v2723_v42  ;;  %v4899_v36 = vmul.f32 0.035714287, %v450_v58  ;;  %v467_v23 = vmul.f32 0.035714287, %v457_v4 }
 0x331   :  { %v4881_v52 = vpop.permute.xlu0 %2618  ;;  %v2743_v29 = vrot.slane %v2742_v39, 2  ;;  %v2717_v60 = vrot.slane %v2716_v25, 1  ;;  %v465_v42 = vmul.f32 0.035714287, %v455_v37  ;;  %v454_v27 = vadd.f32 %v4801_v16, %v4795_v8 }
 0x332   :  { %v4883_v51 = vpop.permute.xlu1 %2685  ;;  %v2752_v24 = vrot.slane %v2751_v6, 1  ;;  %v4927_v0 = vmul.f32 0.035714287, %v453_v18 }
 0x333   :  { %v2744_v53 = vadd.f32 %v2743_v29, %v2742_v39  ;;  %v2718_v44 = vadd.f32 %v2717_v60, %v2716_v25  ;;  %v452_v29 = vadd.f32 %v4797_v46, %v4787_v10  ;;  %v470_v25 = vmul.f32 %v4899_v36, %v4899_v36 }
 0x334   :  { %v2753_v39 = vadd.f32 %v2752_v24, %v2751_v6  ;;  %v458_v46 = vadd.f32 %v4821_v19, %v4809_v32  ;;  %v456_v60 = vadd.f32 %v4817_v56, %v4805_v55 }
 0x335   :  { %v4885_v20 = vpop.permute.xlu0 %2683  ;;  %v2745_v45 = vrot.slane %v2744_v53, 1  ;;  %v4907_v49 = vmul.f32 0.035714287, %v452_v29  ;;  %v475_v35 = vsub.f32 %v465_v42, %v470_v25 }
 0x336   :  { %v4887_v14 = vpop.permute.xlu1 %2693 }
 0x337   :  { %v2746_v21 = vadd.f32 %v2745_v45, %v2744_v53  ;;  %v472_v17 = vmul.f32 %v4907_v49, %v4907_v49  ;;  %v451_v53 = vadd.f32 %v4799_v11, %v4791_v13  ;;  %v480_v19 = vmax.f32 %v475_v35, 0.0 }
 0x338   :  { %v459_v13 = vadd.f32 %v4823_v48, %v4815_v7  ;;  %v468_v11 = vmul.f32 0.035714287, %v458_v46  ;;  %v466_v48 = vmul.f32 0.035714287, %v456_v60  ;;  %v3676_v46 = vld [vmem:[%s6160_s3 + $0x28] sm:$0xff] }
 0x339   :  { %v4891_v1 = vpop.permute.xlu0 %2691  ;;  %v4940_v45 = vmul.f32 0.035714287, %v451_v53  ;;  %v485_v7 = vadd.f32 1e-05, %v480_v19  ;;  %v3679_v19 = vld [vmem:[%s6160_s3 + $0x40] sm:$0xff] }
 0x343   :  { %v2785_v50 = vpop.permute.xlu1 %2784 }
 0x344   :  { %v2790_v40 = vrot.slane %v2785_v50, %v4889_v3  ;;  %v477_v50 = vsub.f32 %v467_v23, %v472_v17  ;;  %v3837_v23 = vld [vmem:[%s6162_s7 + $0x1b] sm:$0x1] }
 0x346   :  { %v2810_v12 = vadd.f32 %v2790_v40, %v2725_v54  ;;  %v2776_v43 = vpop.permute.xlu0 %2775  ;;  %v2814_v41 = vadd.f32 %v2790_v40, %v2753_v39  ;;  %v4942_v54 = vmul.f32 0.035714287, %v454_v27  ;;  %v473_v40 = vmul.f32 %v4927_v0, %v4927_v0  ;;  %v3678_v27 = vld [vmem:[%s6160_s3 + $0x38] sm:$0xff] }
 0x347   :  { %v2781_v34 = vrot.slane %v2776_v43, %v4889_v3  ;;  %v469_v43 = vmul.f32 0.035714287, %v459_v13 }
 0x348   :  { %3971 = vtanh.f32 %v2810_v12  ;;  %v482_v12 = vmax.f32 %v477_v50, 0.0  ;;  %v478_v24 = vsub.f32 %v468_v11, %v473_v40  ;;  %v3836_v50 = vld [vmem:[%s6162_s7 + $0x1a] sm:$0x1]  ;;  %v3677_v11 = vld [vmem:[%s6160_s3 + $0x30] sm:$0xff] }
 0x349   :  { %v2809_v26 = vadd.f32 %v2781_v34, %v2718_v44  ;;  %v2813_v15 = vadd.f32 %v2781_v34, %v2746_v21  ;;  %v471_v21 = vmul.f32 %v4940_v45, %v4940_v45  ;;  %v474_v34 = vmul.f32 %v4942_v54, %v4942_v54  ;;  %v3681_v40 = vld [vmem:[%s6160_s3 + $0x50] sm:$0xff] }
 0x34a   :  { %v487_v58 = vadd.f32 1e-05, %v482_v12  ;;  %v483_v37 = vmax.f32 %v478_v24, 0.0 }
 0x34b   :  { %3973 = vtanh.f32 %v2809_v26  ;;  %v476_v39 = vsub.f32 %v466_v48, %v471_v21  ;;  %v3682_v21 = vld [vmem:[%s6160_s3 + $0x58] sm:$0xff] }
 0x34c   :  { %3975 = vtanh.f32 %v2813_v15  ;;  %v488_v25 = vadd.f32 1e-05, %v483_v37  ;;  %v5007_v37 = vld [vmem:[%s6165_s1] sm:$0x1f] }
 0x34d   :  { %3977 = vtanh.f32 %v2814_v41  ;;  %v479_v41 = vsub.f32 %v469_v43, %v474_v34  ;;  %v481_v42 = vmax.f32 %v476_v39, 0.0 }
 0x34e   :  { %3979 = vrsqrt.f32 %v485_v7 }
 0x34f   :  { %3981 = vrsqrt.f32 %v487_v58  ;;  %v484_v4 = vmax.f32 %v479_v41, 0.0  ;;  %v486_v18 = vadd.f32 1e-05, %v481_v42  ;;  %v5015_v42 = vld [vmem:[%s6165_s1 + $0x8] sm:$0x1f] }
 0x350   :  { %3983 = vrsqrt.f32 %v488_v25 }
 0x351   :  { %v489_v35 = vadd.f32 1e-05, %v484_v4  ;;  %3985 = vrsqrt.f32 %v486_v18  ;;  %v2418_v4 = vmul.f32 %v5015_v42, %v4847_v9 }
 0x353   :  { %3987 = vrsqrt.f32 %v489_v35  ;;  %v2491_v18 = vadd.f32 %v4855_v31, %v2418_v4 }
 0x355   :  { %v4909_v28 = vpop.eup %3971 }
 0x356   :  { %v2837_v10 = vsel %vm2833_vm2, %v4909_v28, 0.0  ;;  %v2826_v15 = vmul.f32 %v4909_v28, %v4909_v28 }
 0x357   :  { %2838 = vadd.xlane.f32.xlu1 %v2837_v10 }
 0x358   :  { %v4917_v61 = vpop.eup %3973  ;;  %v2861_v29 = vsel %vm2833_vm2, %v2826_v15, 0.0 }
 0x359   :  { %v4923_v63 = vpop.eup %3975  ;;  %v2834_v6 = vsel %vm2833_vm2, %v4917_v61, 0.0  ;;  %v2825_v32 = vmul.f32 %v4917_v61, %v4917_v61 }
 0x35a   :  { %2835 = vadd.xlane.f32.xlu0 %v2834_v6  ;;  %v2829_v16 = vmul.f32 %v4923_v63, %v4923_v63  ;;  %v2846_v55 = vsel %vm2833_vm2, %v4923_v63, 0.0  ;;  %v4948_v56 = vpop.eup %3977 }
 0x35b   :  { %v2858_v8 = vsel %vm2833_vm2, %v2825_v32, 0.0  ;;  %v2849_v26 = vsel %vm2833_vm2, %v4948_v56, 0.0  ;;  %v3980_v10 = vpop.eup %3979 }
 0x35c   :  { %2859 = vadd.xlane.f32.xlu1 %v2858_v8  ;;  %v2870_v44 = vsel %vm2833_vm2, %v2829_v16, 0.0  ;;  %v501_v17 = vmul.f32 %v3980_v10, %v3676_v46  ;;  %v3982_v53 = vpop.eup %3981 }
 0x35d   :  { %v503_v6 = vmul.f32 %v3982_v53, %v3678_v27  ;;  %v3984_v32 = vpop.eup %3983 }
 0x35e   :  { %2847 = vadd.xlane.f32.xlu0 %v2846_v55  ;;  %v3986_v60 = vpop.eup %3985  ;;  %v504_v13 = vmul.f32 %v3984_v32, %v3679_v19  ;;  %v512_v8 = vmul.f32 %v501_v17, %v4899_v36  ;;  %v3680_v55 = vld [vmem:[%s6160_s3 + $0x48] sm:$0xff]  ;;  %v3683_v36 = vld [vmem:[%s6160_s3 + $0x60] sm:$0xff] }
 0x35f   :  { %v502_v7 = vmul.f32 %v3986_v60, %v3677_v11  ;;  %v514_v43 = vmul.f32 %v503_v6, %v4907_v49  ;;  %v3685_v49 = vld [vmem:[%s6160_s3 + $0x70] sm:$0xff] }
 0x360   :  { %2871 = vadd.xlane.f32.xlu1 %v2870_v44  ;;  %v3988_v16 = vpop.eup %3987  ;;  %v517_v48 = vsub.f32 %v3681_v40, %v512_v8  ;;  %v515_v15 = vmul.f32 %v504_v13, %v4927_v0  ;;  %v2414_v0 = vmul.f32 %v5007_v37, %v4847_v9 }
 0x361   :  { %v505_v12 = vmul.f32 %v3988_v16, %v3680_v55  ;;  %v513_v24 = vmul.f32 %v502_v7, %v4940_v45  ;;  %v519_v44 = vsub.f32 %v3683_v36, %v514_v43  ;;  %v3684_v45 = vld [vmem:[%s6160_s3 + $0x68] sm:$0xff] }
 0x362   :  { %2850 = vadd.xlane.f32.xlu0 %v2849_v26  ;;  %v520_v58 = vsub.f32 %v3684_v45, %v515_v15 }
 0x363   :  { %v516_v34 = vmul.f32 %v505_v12, %v4942_v54  ;;  %v518_v26 = vsub.f32 %v3682_v21, %v513_v24  ;;  %v2830_v54 = vmul.f32 %v4948_v56, %v4948_v56 }
 0x365   :  { %v521_v39 = vsub.f32 %v3685_v49, %v516_v34  ;;  %v2873_v41 = vsel %vm2833_vm2, %v2830_v54, 0.0 }
 0x366   :  { %2862 = vadd.xlane.f32.xlu0 %v2861_v29  ;;  %v2487_v29 = vadd.f32 %v4851_v62, %v2414_v0 }
 0x368   :  { %v2560_v25 = vadd.f32 %v4859_v2, %v2487_v29 }
 0x36a   :  { %v2633_v35 = vadd.f32 %v4872_v47, %v2560_v25  ;;  %v2417_v47 = vmul.f32 %v5015_v42, %v4849_v33 }
 0x36c   :  { %v2706_v10 = vadd.f32 %v4883_v51, %v2633_v35  ;;  %v2490_v51 = vadd.f32 %v4857_v22, %v2417_v47 }
 0x36e   :  { %v2733_v53 = vsel %vm2711_vm1, %v2706_v10, 0.0 }
 0x36f   :  { %v2734_v2 = vrot.slane %v2733_v53, 4 }
 0x371   :  { %2802 = vperm.xlu1 %3950, %v3837_v23   ;;  %v2564_v23 = vadd.f32 %v4863_v59, %v2491_v18  ;;  %v2735_v27 = vadd.f32 %v2734_v2, %v2733_v53 }
 0x373   :  { %v2637_v62 = vadd.f32 %v4878_v5, %v2564_v23 }
 0x375   :  { %524 = vperm.xlu1 %3950, %v501_v17   ;;  %v2710_v46 = vadd.f32 %v4887_v14, %v2637_v62  ;;  %v2413_v17 = vmul.f32 %v5007_v37, %v4849_v33 }
 0x377   :  { %v2486_v9 = vadd.f32 %v4853_v30, %v2413_v17  ;;  %v2761_v31 = vsel %vm2711_vm1, %v2710_v46, 0.0 }
 0x378   :  { %v2762_v14 = vrot.slane %v2761_v31, 4 }
 0x379   :  { %534 = vperm.xlu1 %3950, %v503_v6   ;;  %v2559_v59 = vadd.f32 %v4861_v57, %v2486_v9  ;;  %v6279_v6 = vld [vmem:[#allocation56_spill] sm:$0xff] }
 0x37a   :  { %v2563_v32 = vadd.f32 %v6279_v6, %v2490_v51  ;;  %v2763_v60 = vadd.f32 %v2762_v14, %v2761_v31 }
 0x37b   :  { %v2632_v5 = vadd.f32 %v4876_v38, %v2559_v59 }
 0x37c   :  { %2793 = vperm.xlu0 %3949, %v3836_v50   ;;  %v2636_v30 = vadd.f32 %v4881_v52, %v2563_v32  ;;  %v2764_v22 = vrot.slane %v2763_v60, 2 }
 0x37d   :  { %539 = vperm.xlu1 %3950, %v504_v13   ;;  %v2705_v19 = vadd.f32 %v4885_v20, %v2632_v5  ;;  %v2736_v13 = vrot.slane %v2735_v27, 2 }
 0x37e   :  { %v2709_v57 = vadd.f32 %v4891_v1, %v2636_v30  ;;  %v2765_v20 = vadd.f32 %v2764_v22, %v2763_v60 }
 0x37f   :  { %v2726_v33 = vsel %vm2711_vm1, %v2705_v19, 0.0  ;;  %v2737_v38 = vadd.f32 %v2736_v13, %v2735_v27 }
 0x380   :  { %529 = vperm.xlu0 %3949, %v502_v7   ;;  %v2727_v16 = vrot.slane %v2726_v33, 4  ;;  %v2754_v40 = vsel %vm2711_vm1, %v2709_v57, 0.0  ;;  %v2766_v36 = vrot.slane %v2765_v20, 1 }
 0x381   :  { %559 = vperm.xlu1 %3950, %v517_v48   ;;  %v2738_v52 = vrot.slane %v2737_v38, 1 }
 0x382   :  { %v2728_v48 = vadd.f32 %v2727_v16, %v2726_v33  ;;  %v3767_v33 = vld [vmem:[%s6163_s5 + $0x11] ss:$0 sm:$0xff] }
 0x383   :  { %v2739_v21 = vadd.f32 %v2738_v52, %v2737_v38 }
 0x384   :  { %544 = vperm.xlu0 %3949, %v505_v12   ;;  %v2755_v12 = vrot.slane %v2754_v40, 4 }
 0x385   :  { %569 = vperm.xlu1 %3950, %v519_v44   ;;  %v2729_v44 = vrot.slane %v2728_v48, 2 }
 0x386   :  { %v2756_v1 = vadd.f32 %v2755_v12, %v2754_v40 }
 0x387   :  { %v2730_v15 = vadd.f32 %v2729_v44, %v2728_v48 }
 0x388   :  { %564 = vperm.xlu0 %3949, %v518_v26   ;;  %v2767_v26 = vadd.f32 %v2766_v36, %v2765_v20  ;;  %v3766_v20 = vld [vmem:[%s6163_s5 + $0x10] ss:$0 sm:$0xff]  ;;  %v3768_v36 = vld [vmem:[%s6163_s5 + $0x12] ss:$0 sm:$0xff] }
 0x389   :  { %579 = vperm.xlu1 %3950, %v521_v39   ;;  %v2757_v39 = vrot.slane %v2756_v1, 2 }
 0x38b   :  { %v2758_v54 = vadd.f32 %v2757_v39, %v2756_v1  ;;  %v3800_v39 = vld [vmem:[%s6163_s5 + $0x22] ss:$0 sm:$0xff] }
 0x38c   :  { %574 = vperm.xlu0 %3949, %v520_v58  }
 0x38d   :  { %v2759_v25 = vrot.slane %v2758_v54, 1 }
 0x38f   :  { %v2760_v35 = vadd.f32 %v2759_v25, %v2758_v54  ;;  %v3758_v54 = vld [vmem:[%s6163_s5 + $0xc] ss:$0 sm:$0xff]  ;;  %v3760_v25 = vld [vmem:[%s6163_s5 + $0xe] ss:$0 sm:$0xff] }
 0x3ab   :  { %2874 = vadd.xlane.f32.xlu0 %v2873_v41  ;;  %v2731_v41 = vrot.slane %v2730_v15, 1 }
 0x3ad   :  { %v2732_v4 = vadd.f32 %v2731_v41, %v2730_v15 }
 0x3e0   :  { %v5038_v50 = vpop.xlane.xlu1 %2838 }
 0x3e3   :  { %v2836_v11 = vpop.xlane.xlu0 %2835 }
 0x3e5   :  { %v5043_v8 = vpop.xlane.xlu1 %2859 }
 0x3e7   :  { %v2848_v55 = vpop.xlane.xlu0 %2847 }
 0x3e8   :  { %v2898_v32 = vadd.f32 %v2848_v55, %v2836_v11  ;;  %v3774_v11 = vld [vmem:[%s6163_s5 + $0x14] ss:$0 sm:$0xff] }
 0x3e9   :  { %v2872_v7 = vpop.xlane.xlu1 %2871 }
 0x3ea   :  { %v2906_v60 = vmul.f32 0.041666668, %v2898_v32  ;;  %v2902_v13 = vadd.f32 %v2872_v7, %v5043_v8  ;;  %v3776_v8 = vld [vmem:[%s6163_s5 + $0x16] ss:$0 sm:$0xff]  ;;  %v3790_v7 = vld [vmem:[%s6163_s5 + $0x1c] ss:$0 sm:$0xff] }
 0x3eb   :  { %v5046_v43 = vpop.xlane.xlu0 %2850  ;;  %v5181_v32 = vld [vmem:[%s6167_s8] sm:$0xff] }
 0x3ec   :  { %v2914_v57 = vmul.f32 %v2906_v60, %v2906_v60  ;;  %v2910_v22 = vmul.f32 0.041666668, %v2902_v13  ;;  %v2899_v12 = vadd.f32 %v5046_v43, %v5038_v50  ;;  %v3769_v50 = vld [vmem:[%s6163_s5 + $0x13] ss:$0 sm:$0xff] }
 0x3ed   :  { %v2803_v24 = vpop.permute.xlu1 %2802 }
 0x3ee   :  { %v2808_v34 = vrot.slane %v2803_v24, %v4889_v3  ;;  %v2918_v16 = vsub.f32 %v2910_v22, %v2914_v57  ;;  %v3792_v24 = vld [vmem:[%s6163_s5 + $0x1e] ss:$0 sm:$0xff]  ;;  %v5112_v44 = vmul.f32 0.041666668, %v2899_v12  ;;  %v3783_v22 = vld [vmem:[%s6163_s5 + $0x19] ss:$0 sm:$0xff] }
 0x3ef   :  { %v5049_v58 = vpop.xlane.xlu0 %2862 }
 0x3f0   :  { %v2812_v49 = vadd.f32 %v2808_v34, %v2739_v21  ;;  %v2816_v45 = vadd.f32 %v2808_v34, %v2767_v26  ;;  %v2922_v55 = vmax.f32 %v2918_v16, 0.0  ;;  %v3798_v34 = vld [vmem:[%s6163_s5 + $0x20] ss:$0 sm:$0xff]  ;;  %v3775_v26 = vld [vmem:[%s6163_s5 + $0x15] ss:$0 sm:$0xff] }
 0x3f1   :  { %v525_v16 = vpop.permute.xlu1 %524 }
 0x3f2   :  { %3989 = vtanh.f32 %v2812_v49  ;;  %v2926_v48 = vadd.f32 1e-05, %v2922_v55  ;;  %v2915_v49 = vmul.f32 %v5112_v44, %v5112_v44 }
 0x3f3   :  { %3991 = vtanh.f32 %v2816_v45  ;;  %v3777_v45 = vld [vmem:[%s6163_s5 + $0x17] ss:$0 sm:$0xff] }
 0x3f7   :  { %v2794_v0 = vpop.permute.xlu0 %2793 }
 0x3f8   :  { %v2799_v29 = vrot.slane %v2794_v0, %v4889_v3  ;;  %v3791_v0 = vld [vmem:[%s6163_s5 + $0x1d] ss:$0 sm:$0xff] }
 0x3fa   :  { %v2811_v18 = vadd.f32 %v2799_v29, %v2732_v4  ;;  %v2815_v10 = vadd.f32 %v2799_v29, %v2760_v35  ;;  %v3838_v29 = vld [vmem:[%s6162_s7 + $0x1c] sm:$0x1]  ;;  %v3793_v35 = vld [vmem:[%s6163_s5 + $0x1f] ss:$0 sm:$0xff] }
 0x3fb   :  { %v5079_v19 = vpop.permute.xlu0 %529 }
 0x3fc   :  { %3993 = vtanh.f32 %v2811_v18 }
 0x3fd   :  { %3995 = vtanh.f32 %v2815_v10 }
 0x3fe   :  { %3997 = vrsqrt.f32 %v2926_v48 }
 0x3ff   :  { %v5052_v23 = vpop.eup %3989  ;;  %v5086_v38 = vpop.permute.xlu0 %544 }
 0x400   :  { %6280 = vst [vmem:[#allocation56_spill] sm:$0xff] %v5052_v23  ;;  %v2843_v62 = vsel %vm2833_vm2, %v5052_v23, 0.0  ;;  %v5056_v46 = vpop.eup %3991  ;;  %v2828_v53 = vmul.f32 %v5052_v23, %v5052_v23  ;;  %v6312_v23 = vld [vmem:[#allocation23_spill] sm:$0xff] }
 0x401   :  { %6281 = vst [vmem:[#allocation57_spill] sm:$0xff] %v5056_v46  ;;  %2844 = vadd.xlane.f32.xlu0 %v2843_v62  ;;  %v2855_v17 = vsel %vm2833_vm2, %v5056_v46, 0.0  ;;  %v2832_v2 = vmul.f32 %v5056_v46, %v5056_v46  ;;  %v3799_v62 = vld [vmem:[%s6163_s5 + $0x21] ss:$0 sm:$0xff] }
 0x402   :  { %v2867_v9 = vsel %vm2833_vm2, %v2828_v53, 0.0 }
 0x403   :  { %v2879_v47 = vsel %vm2833_vm2, %v2832_v2, 0.0  ;;  %v5091_v40 = vpop.permute.xlu0 %564  ;;  %v3782_v2 = vld [vmem:[%s6163_s5 + $0x18] ss:$0 sm:$0xff] }
 0x405   :  { %2856 = vadd.xlane.f32.xlu0 %v2855_v17  ;;  %v3842_v17 = vld [vmem:[%s6162_s7 + $0x20] sm:$0x1] }
 0x407   :  { %v5104_v52 = vpop.permute.xlu0 %574 }
 0x409   :  { %2868 = vadd.xlane.f32.xlu0 %v2867_v9  ;;  %v5065_v31 = vpop.eup %3993  ;;  %v3801_v9 = vld [vmem:[%s6163_s5 + $0x23] ss:$0 sm:$0xff] }
 0x40a   :  { %6282 = vst [vmem:[#allocation58_spill] sm:$0xff] %v5065_v31  ;;  %v2840_v59 = vsel %vm2833_vm2, %v5065_v31, 0.0  ;;  %v5070_v51 = vpop.eup %3995  ;;  %v2827_v14 = vmul.f32 %v5065_v31, %v5065_v31 }
 0x40b   :  { %6283 = vst [vmem:[#allocation59_spill] sm:$0xff] %v5070_v51  ;;  %2841 = vadd.xlane.f32.xlu1 %v2840_v59  ;;  %v2852_v5 = vsel %vm2833_vm2, %v5070_v51, 0.0  ;;  %v2831_v6 = vmul.f32 %v5070_v51, %v5070_v51  ;;  %v3998_v41 = vpop.eup %3997  ;;  %v5163_v59 = vld [vmem:[%s6167_s8 + $0x8] sm:$0xf] }
 0x40c   :  { %v2864_v27 = vsel %vm2833_vm2, %v2827_v14, 0.0  ;;  %v2939_v18 = vmul.f32 %v3998_v41, %v3838_v29 }
 0x40d   :  { %2880 = vadd.xlane.f32.xlu0 %v2879_v47  ;;  %v2876_v30 = vsel %vm2833_vm2, %v2831_v6, 0.0  ;;  %v6212_v47 = vmov 0.0   ;;  %v3839_v6 = vld [vmem:[%s6162_s7 + $0x1d] sm:$0x1] }
 0x40e   :  { %v2948_v10 = vmul.f32 %v2939_v18, %v2906_v60  ;;  %3886 = vmatprep.subr.mxu0 %v6212_v47  ;;  %3893 = vmatprep.subr.mxu1 %v6212_v47 }
 0x40f   :  { %2853 = vadd.xlane.f32.xlu1 %v2852_v5  ;;  %v3759_v5 = vld [vmem:[%s6163_s5 + $0xd] ss:$0 sm:$0xff]  ;;  %3887 = vmatpush3.msk.msra.mxu0 %vm3049_vm3, %v5163_v59 }
 0x410   :  { %v2952_v53 = vsub.f32 %v3842_v17, %v2948_v10  ;;  %3888 = vmatprep.subr.mxu0 %v6212_v47  ;;  %3894 = vmatpush3.msk.msra.mxu1 %vm3049_vm3, %v5163_v59 }
 0x411   :  { %3889 = vmatpush3.msra.mxu0 %v5181_v32  ;;  %3890 = vmatprep.mubr.msk.f32.mxu0 %vm4065_vm4, %v6212_v47 }
 0x412   :  { %3895 = vmatprep.subr.mxu1 %v6212_v47  ;;  %3897 = vmatprep.mubr.msk.f32.mxu1 %vm4065_vm4, %v6212_v47 }
 0x413   :  { %2865 = vadd.xlane.f32.xlu1 %v2864_v27  ;;  %v3784_v27 = vld [vmem:[%s6163_s5 + $0x1a] ss:$0 sm:$0xff]  ;;  %3896 = vmatpush3.msra.mxu1 %v5181_v32 }
 0x414   :  { %3907 = vmatprep.subr.mxu1 %v6212_v47  ;;  %3900 = vmatprep.subr.mxu0 %v6212_v47 }
 0x417   :  { %2877 = vadd.xlane.f32.xlu1 %v2876_v30  ;;  %v3761_v30 = vld [vmem:[%s6163_s5 + $0xf] ss:$0 sm:$0xff] }
 0x423   :  { %1567 = vperm.xlu0 %3949, %v3767_v33   ;;  %v3843_v33 = vld [vmem:[%s6162_s7 + $0x21] sm:$0x1] }
 0x427   :  { %1660 = vperm.xlu0 %3949, %v3774_v11   ;;  %v3785_v11 = vld [vmem:[%s6163_s5 + $0x1b] ss:$0 sm:$0xff] }
 0x428   :  { %1563 = vperm.xlu1 %3950, %v3766_v20  }
 0x42b   :  { %1668 = vperm.xlu0 %3949, %v3776_v8   ;;  %v535_v8 = vpop.permute.xlu1 %534 }
 0x42c   :  { %1571 = vperm.xlu1 %3950, %v3768_v36  }
 0x42f   :  { %1838 = vperm.xlu0 %3949, %v3790_v7   ;;  %v540_v55 = vpop.permute.xlu1 %539 }
 0x430   :  { %1575 = vperm.xlu1 %3950, %v3769_v50  }
 0x433   :  { %1846 = vperm.xlu0 %3949, %v3792_v24   ;;  %v560_v20 = vpop.permute.xlu1 %559 }
 0x434   :  { %v2875_v1 = vpop.xlane.xlu0 %2874  ;;  %1664 = vperm.xlu1 %3950, %v3775_v26  }
 0x435   :  { %v2903_v43 = vadd.f32 %v2875_v1, %v5049_v58 }
 0x437   :  { %v2911_v21 = vmul.f32 0.041666668, %v2903_v43  ;;  %1935 = vperm.xlu0 %3949, %v3798_v34   ;;  %v570_v48 = vpop.permute.xlu1 %569 }
 0x438   :  { %1672 = vperm.xlu1 %3950, %v3777_v45  }
 0x439   :  { %v2919_v15 = vsub.f32 %v2911_v21, %v2915_v49 }
 0x43b   :  { %v2923_v58 = vmax.f32 %v2919_v15, 0.0  ;;  %1943 = vperm.xlu0 %3949, %v3800_v39  }
 0x43c   :  { %1842 = vperm.xlu1 %3950, %v3791_v0  }
 0x43d   :  { %v2927_v4 = vadd.f32 1e-05, %v2923_v58 }
 0x43f   :  { %1482 = vperm.xlu0 %3949, %v3758_v54   ;;  %3999 = vrsqrt.f32 %v2927_v4 }
 0x440   :  { %1850 = vperm.xlu1 %3950, %v3793_v35  }
 0x443   :  { %1490 = vperm.xlu0 %3949, %v3760_v25   ;;  %v6284_v25 = vld [vmem:[#allocation45_spill] sm:$0xff] }
 0x444   :  { %1939 = vperm.xlu1 %3950, %v3799_v62   ;;  %v6285_v62 = vld [vmem:[#allocation42_spill] sm:$0xff] }
 0x445   :  { %v547_v17 = vmul.f32 %v6285_v62, %v525_v16  ;;  %v6294_v62 = vld [vmem:[#allocation51_spill] sm:$0xff] }
 0x447   :  { %2958 = vperm.xlu0 %3949, %v2939_v18   ;;  %v548_v18 = vmul.f32 %v6284_v25, %v5079_v19 }
 0x448   :  { %1947 = vperm.xlu1 %3950, %v3801_v9  }
 0x44b   :  { %3002 = vperm.xlu0 %3949, %v2952_v53   ;;  %v5221_v53 = vadd.f32 %v5091_v40, %v548_v18 }
 0x44c   :  { %v4000_v14 = vpop.eup %3999  ;;  %1486 = vperm.xlu1 %3950, %v3759_v5  }
 0x44d   :  { %v2940_v60 = vmul.f32 %v4000_v14, %v3839_v6  ;;  %v6286_v14 = vld [vmem:[#allocation49_spill] sm:$0xff]  ;;  %v5229_v6 = vadd.f32 %v560_v20, %v547_v17  ;;  %v555_v17 = vmul.f32 %v6294_v62, %v540_v55 }
 0x44f   :  { %1757 = vperm.xlu0 %3949, %v3782_v2   ;;  %v2949_v13 = vmul.f32 %v2940_v60, %v5112_v44  ;;  %v5207_v44 = vpop.permute.xlu1 %579 }
 0x450   :  { %1494 = vperm.xlu1 %3950, %v3761_v30  }
 0x451   :  { %v2953_v57 = vsub.f32 %v3843_v33, %v2949_v13  ;;  %v6287_v13 = vld [vmem:[#allocation46_spill] sm:$0xff] }
 0x452   :  { %v552_v33 = vmul.f32 %v6287_v13, %v525_v16  ;;  %v6291_v16 = vld [vmem:[#allocation3_spill] sm:$0xff] }
 0x453   :  { %1765 = vperm.xlu0 %3949, %v3784_v27   ;;  %v553_v27 = vmul.f32 %v6286_v14, %v5079_v19  ;;  %v3841_v19 = vld [vmem:[%s6162_s7 + $0x1f] sm:$0x1]  ;;  %v6296_v14 = vld [vmem:[#allocation11_spill] sm:$0xff] }
 0x454   :  { %2967 = vperm.xlu1 %3950, %v2940_v60   ;;  %v6297_v13 = vld [vmem:[#allocation47_spill] sm:$0xff] }
 0x458   :  { %3011 = vperm.xlu1 %3950, %v2953_v57   ;;  %v6288_v57 = vld [vmem:[#allocation43_spill] sm:$0xff] }
 0x45c   :  { %1761 = vperm.xlu1 %3950, %v3783_v22   ;;  %v549_v22 = vmul.f32 %v6288_v57, %v535_v8 }
 0x460   :  { %1769 = vperm.xlu1 %3950, %v3785_v11   ;;  %v5236_v11 = vadd.f32 %v5091_v40, %v553_v27  ;;  %v5250_v40 = vadd.f32 %v570_v48, %v549_v22 }
 0x462   :  { %v739_v27 = vmul.f32 %v6296_v14, %v5250_v40 }
 0x48a   :  { %v2845_v7 = vpop.xlane.xlu0 %2844 }
 0x48e   :  { %v2857_v12 = vpop.xlane.xlu0 %2856 }
 0x48f   :  { %v2901_v36 = vadd.f32 %v2857_v12, %v2845_v7  ;;  %v6289_v7 = vld [vmem:[#allocation7_spill] sm:$0xff] }
 0x490   :  { %v682_v12 = vmul.f32 %v6289_v7, %v5221_v53 }
 0x491   :  { %v2909_v1 = vmul.f32 0.041666668, %v2901_v36 }
 0x492   :  { %v2869_v24 = vpop.xlane.xlu0 %2868 }
 0x493   :  { %v2917_v34 = vmul.f32 %v2909_v1, %v2909_v1 }
 0x494   :  { %v2842_v43 = vpop.xlane.xlu1 %2841 }
 0x496   :  { %v2881_v50 = vpop.xlane.xlu0 %2880 }
 0x497   :  { %v2905_v21 = vadd.f32 %v2881_v50, %v2869_v24  ;;  %v6290_v24 = vld [vmem:[#allocation44_spill] sm:$0xff] }
 0x498   :  { %v2854_v15 = vpop.xlane.xlu1 %2853  ;;  %v550_v50 = vmul.f32 %v6290_v24, %v540_v55 }
 0x499   :  { %v2913_v49 = vmul.f32 0.041666668, %v2905_v21  ;;  %v2900_v54 = vadd.f32 %v2854_v15, %v2842_v43 }
 0x49a   :  { %v5258_v18 = vadd.f32 %v5104_v52, %v550_v50 }
 0x49b   :  { %v2921_v26 = vsub.f32 %v2913_v49, %v2917_v34  ;;  %v5213_v29 = vmul.f32 0.041666668, %v2900_v54  ;;  %v5246_v34 = vadd.f32 %v560_v20, %v552_v33  ;;  %v633_v49 = vmul.f32 %v6291_v16, %v5229_v6 }
 0x49c   :  { %v2866_v41 = vpop.xlane.xlu1 %2865  ;;  %v551_v33 = vmul.f32 %v6297_v13, %v5086_v38 }
 0x49d   :  { %v2925_v39 = vmax.f32 %v2921_v26, 0.0  ;;  %v2916_v9 = vmul.f32 %v5213_v29, %v5213_v29  ;;  %v690_v25 = vadd.f32 %v682_v12, %v633_v49 }
 0x49e   :  { %v5209_v45 = vpop.permute.xlu0 %1567 }
 0x49f   :  { %v2929_v58 = vadd.f32 1e-05, %v2925_v39  ;;  %v6292_v39 = vld [vmem:[#allocation48_spill] sm:$0xff]  ;;  %v747_v12 = vadd.f32 %v739_v27, %v690_v25 }
 0x4a0   :  { %v2878_v4 = vpop.xlane.xlu1 %2877 }
 0x4a1   :  { %4001 = vrsqrt.f32 %v2929_v58  ;;  %v2904_v35 = vadd.f32 %v2878_v4, %v2866_v41  ;;  %v554_v58 = vmul.f32 %v6292_v39, %v535_v8  ;;  %v6293_v41 = vld [vmem:[#allocation6_spill] sm:$0xff] }
 0x4a2   :  { %v5211_v0 = vpop.permute.xlu0 %1660  ;;  %v685_v4 = vmul.f32 %v6293_v41, %v5236_v11  ;;  %v681_v57 = vmul.f32 %v6293_v41, %v5221_v53 }
 0x4a3   :  { %v2912_v2 = vmul.f32 0.041666668, %v2904_v35  ;;  %v5267_v8 = vadd.f32 %v570_v48, %v554_v58  ;;  %v6299_v48 = vld [vmem:[#allocation15_spill] sm:$0xff]  ;;  %v5293_v58 = vadd.f32 %v5207_v44, %v551_v33 }
 0x4a4   :  { %v5225_v5 = vpop.permute.xlu1 %1563 }
 0x4a5   :  { %v2920_v30 = vsub.f32 %v2912_v2, %v2916_v9  ;;  %v6295_v9 = vld [vmem:[#allocation2_spill] sm:$0xff] }
 0x4a6   :  { %v5217_v10 = vpop.permute.xlu0 %1668  ;;  %v636_v2 = vmul.f32 %v6295_v9, %v5246_v34  ;;  %v632_v24 = vmul.f32 %v6295_v9, %v5229_v6  ;;  %v6304_v9 = vld [vmem:[#allocation14_spill] sm:$0xff] }
 0x4a7   :  { %v2924_v36 = vmax.f32 %v2920_v30, 0.0 }
 0x4a8   :  { %v5244_v43 = vpop.permute.xlu1 %1571  ;;  %v693_v55 = vadd.f32 %v685_v4, %v636_v2  ;;  %v689_v25 = vadd.f32 %v681_v57, %v632_v24  ;;  %v6306_v57 = vld [vmem:[#allocation19_spill] sm:$0xff]  ;;  %v795_v24 = vmul.f32 %v6304_v9, %v5258_v18 }
 0x4a9   :  { %v2928_v26 = vadd.f32 1e-05, %v2924_v36  ;;  %v5280_v36 = vadd.f32 %v5104_v52, %v555_v17  ;;  %v6303_v52 = vld [vmem:[#allocation50_spill] sm:$0xff] }
 0x4aa   :  { %v5231_v60 = vpop.permute.xlu0 %1838  ;;  %v556_v41 = vmul.f32 %v6303_v52, %v5086_v38  ;;  %v6305_v38 = vld [vmem:[#allocation12_spill] sm:$0xff] }
 0x4ab   :  { %4003 = vrsqrt.f32 %v2928_v26  ;;  %v6301_v26 = vld [vmem:[#allocation10_spill] sm:$0xff]  ;;  %v799_v2 = vmul.f32 %v6304_v9, %v5280_v36  ;;  %v744_v52 = vmul.f32 %v6305_v38, %v5267_v8  ;;  %v740_v31 = vmul.f32 %v6305_v38, %v5250_v40 }
 0x4ac   :  { %v5260_v20 = vpop.permute.xlu1 %1575  ;;  %v742_v39 = vmul.f32 %v6301_v26, %v5267_v8  ;;  %v738_v33 = vmul.f32 %v6301_v26, %v5250_v40  ;;  %v6308_v26 = vld [vmem:[#allocation16_spill] sm:$0xff]  ;;  %v6310_v9 = vld [vmem:[#allocation18_spill] sm:$0xff] }
 0x4ae   :  { %v4002_v21 = vpop.eup %4001  ;;  %v5252_v15 = vpop.permute.xlu0 %1846  ;;  %v750_v17 = vadd.f32 %v742_v39, %v693_v55  ;;  %v801_v39 = vmul.f32 %v6308_v26, %v5280_v36 }
 0x4af   :  { %v2942_v54 = vmul.f32 %v4002_v21, %v3841_v19  ;;  %v796_v19 = vmul.f32 %v6299_v48, %v5258_v18  ;;  %v6300_v21 = vld [vmem:[#allocation4_spill] sm:$0xff] }
 0x4b0   :  { %v5286_v50 = vpop.permute.xlu1 %1664  ;;  %v638_v49 = vmul.f32 %v6300_v21, %v5246_v34  ;;  %v634_v13 = vmul.f32 %v6300_v21, %v5229_v6  ;;  %v3840_v21 = vld [vmem:[%s6162_s7 + $0x1e] sm:$0x1] }
 0x4b1   :  { %2985 = vperm.xlu1 %3950, %v2942_v54   ;;  %v5262_v35 = vmul.f32 %v2942_v54, %v2909_v1  ;;  %v6298_v1 = vld [vmem:[#allocation8_spill] sm:$0xff]  ;;  %v804_v27 = vadd.f32 %v796_v19, %v747_v12  ;;  %v746_v19 = vadd.f32 %v738_v33, %v689_v25 }
 0x4b2   :  { %v5271_v30 = vpop.permute.xlu0 %1935  ;;  %v687_v22 = vmul.f32 %v6298_v1, %v5236_v11  ;;  %v683_v4 = vmul.f32 %v6298_v1, %v5221_v53  ;;  %v5312_v1 = vadd.f32 %v5207_v44, %v556_v41  ;;  %v807_v44 = vadd.f32 %v799_v2, %v750_v17 }
 0x4b3   :  { %v797_v2 = vmul.f32 %v6308_v26, %v5258_v18  ;;  %v6314_v26 = vld [vmem:[#allocation13_spill] sm:$0xff] }
 0x4b4   :  { %v695_v62 = vadd.f32 %v687_v22, %v638_v49  ;;  %v5307_v47 = vpop.permute.xlu1 %1672  ;;  %v853_v22 = vmul.f32 %v6306_v57, %v5293_v58  ;;  %v691_v12 = vadd.f32 %v683_v4, %v634_v13  ;;  %v6309_v4 = vld [vmem:[#allocation9_spill] sm:$0xff]  ;;  %v856_v13 = vmul.f32 %v6310_v9, %v5312_v1 }
 0x4b5   :  { %v684_v25 = vmul.f32 %v6309_v4, %v5221_v53 }
 0x4b6   :  { %v5295_v54 = vpop.permute.xlu0 %1943  ;;  %v752_v49 = vadd.f32 %v744_v52, %v695_v62  ;;  %v861_v41 = vadd.f32 %v853_v22, %v804_v27  ;;  %v6311_v62 = vld [vmem:[#allocation5_spill] sm:$0xff]  ;;  %v748_v17 = vadd.f32 %v740_v31, %v691_v12  ;;  %v803_v27 = vadd.f32 %v795_v24, %v746_v19  ;;  %v6313_v12 = vld [vmem:[#allocation20_spill] sm:$0xff] }
 0x4b7   :  { %6302 = vst [vmem:[#allocation45_spill] sm:$0xff] %v5295_v54  ;;  %v635_v52 = vmul.f32 %v6311_v62, %v5229_v6  ;;  %v864_v22 = vadd.f32 %v856_v13, %v807_v44  ;;  %v686_v31 = vmul.f32 %v6289_v7, %v5236_v11  ;;  %v858_v19 = vmul.f32 %v6313_v12, %v5312_v1  ;;  %v6315_v13 = vld [vmem:[#allocation22_spill] sm:$0xff] }
 0x4b8   :  { %v4004_v51 = vpop.eup %4003  ;;  %v809_v38 = vadd.f32 %v801_v39, %v752_v49  ;;  %v909_v54 = vadd.f32 %v6312_v23, %v861_v41  ;;  %v637_v49 = vmul.f32 %v6291_v16, %v5246_v34  ;;  %v805_v41 = vadd.f32 %v797_v2, %v748_v17 }
 0x4b9   :  { %v2941_v33 = vmul.f32 %v4004_v51, %v3840_v21  ;;  %v852_v51 = vmul.f32 %v6310_v9, %v5293_v58  ;;  %v692_v6 = vadd.f32 %v684_v25, %v635_v52  ;;  %v639_v7 = vmul.f32 %v6311_v62, %v5246_v34 }
 0x4ba   :  { %v5316_v55 = vpop.permute.xlu0 %1482  ;;  %v866_v9 = vadd.f32 %v858_v19, %v809_v38  ;;  %4005 = vtanh.f32 %v909_v54  ;;  %v688_v25 = vmul.f32 %v6309_v4, %v5236_v11  ;;  %v694_v16 = vadd.f32 %v686_v31, %v637_v49 }
 0x4bb   :  { %6307 = vst [vmem:[#allocation42_spill] sm:$0xff] %v5316_v55  ;;  %v5327_v55 = vpop.permute.xlu1 %1842  ;;  %2976 = vperm.xlu0 %3949, %v2941_v33   ;;  %v5341_v53 = vmul.f32 %v2941_v33, %v5213_v29  ;;  %v741_v29 = vmul.f32 %v6314_v26, %v5250_v40  ;;  %v860_v39 = vadd.f32 %v852_v51, %v803_v27  ;;  %v6316_v51 = vld [vmem:[#allocation17_spill] sm:$0xff] }
 0x4bc   :  { %v912_v33 = vadd.f32 %v6315_v13, %v864_v22  ;;  %v854_v40 = vmul.f32 %v6313_v12, %v5293_v58  ;;  %v798_v17 = vmul.f32 %v6316_v51, %v5258_v18  ;;  %v743_v11 = vmul.f32 %v6296_v14, %v5267_v8  ;;  %v6317_v22 = vld [vmem:[#allocation24_spill] sm:$0xff]  ;;  %v6318_v14 = vld [vmem:[#allocation21_spill] sm:$0xff] }
 0x4bd   :  { %v749_v27 = vadd.f32 %v741_v29, %v692_v6  ;;  %v908_v38 = vadd.f32 %v6315_v13, %v860_v39  ;;  %v914_v31 = vadd.f32 %v6317_v22, %v866_v9  ;;  %v696_v6 = vadd.f32 %v688_v25, %v639_v7  ;;  %v6320_v25 = vld [vmem:[#allocation25_spill] sm:$0xff] }
 0x4be   :  { %v5333_v46 = vpop.permute.xlu0 %1490  ;;  %v862_v4 = vadd.f32 %v854_v40, %v805_v41  ;;  %4007 = vtanh.f32 %v912_v33  ;;  %v745_v49 = vmul.f32 %v6314_v26, %v5267_v8  ;;  %v855_v29 = vmul.f32 %v6318_v14, %v5293_v58 }
 0x4bf   :  { %v5345_v21 = vpop.permute.xlu1 %1850  ;;  %4009 = vtanh.f32 %v908_v38  ;;  %v802_v41 = vmul.f32 %v6316_v51, %v5280_v36  ;;  %v857_v58 = vmul.f32 %v6306_v57, %v5312_v1  ;;  %v859_v40 = vmul.f32 %v6318_v14, %v5312_v1 }
 0x4c0   :  { %v910_v39 = vadd.f32 %v6317_v22, %v862_v4  ;;  %4011 = vtanh.f32 %v914_v31 }
 0x4c2   :  { %v2959_v24 = vpop.permute.xlu0 %2958  ;;  %4013 = vtanh.f32 %v910_v39 }
 0x4c3   :  { %v2964_v44 = vrot.slane %v2959_v24, %v4889_v3  ;;  %v5361_v52 = vpop.permute.xlu1 %1939  ;;  %v751_v24 = vadd.f32 %v743_v11, %v694_v16 }
 0x4c5   :  { %v2992_v54 = vmul.f32 %v4917_v61, %v2964_v44  ;;  %v2996_v34 = vmul.f32 %v4923_v63, %v2964_v44  ;;  %v800_v61 = vmul.f32 %v6299_v48, %v5280_v36  ;;  %v806_v63 = vadd.f32 %v798_v17, %v749_v27 }
 0x4c6   :  { %v3003_v2 = vpop.permute.xlu0 %3002  ;;  %v6319_v44 = vmov 0.0   ;;  %v753_v48 = vadd.f32 %v745_v49, %v696_v6 }
 0x4c7   :  { %v3008_v62 = vrot.slane %v3003_v2, %v4889_v3  ;;  %v5374_v12 = vpop.permute.xlu1 %1947  ;;  %v808_v26 = vadd.f32 %v800_v61, %v751_v24  ;;  %v863_v9 = vadd.f32 %v855_v29, %v806_v63  ;;  %v5399_v13 = vpop.eup %4005 }
 0x4c8   :  { %v810_v33 = vadd.f32 %v802_v41, %v753_v48  ;;  %v935_v27 = vsel %vm389_vm0, %v5399_v13, 0.0 }
 0x4c9   :  { %v3036_v18 = vadd.f32 %v3008_v62, %v2992_v54  ;;  %v5376_v19 = vadd.f32 %v3008_v62, %v2996_v34  ;;  %v865_v36 = vadd.f32 %v857_v58, %v808_v26  ;;  %v911_v16 = vadd.f32 %v6320_v25, %v863_v9 }
 0x4ca   :  { %v867_v17 = vadd.f32 %v859_v40, %v810_v33 }
 0x4cb   :  { %3891 = vmatmul.mubr.msk.f32.vlgmr.msra.gmra.mxu0 %vm2833_vm2, %v3036_v18  ;;  %v5392_v8 = vpop.permute.xlu1 %1486  ;;  %v5408_v51 = vpop.eup %4007  ;;  %v913_v57 = vadd.f32 %v6312_v23, %v865_v36  ;;  %4015 = vtanh.f32 %v911_v16  ;;  %v925_v36 = vmul.f32 %v5399_v13, %v5399_v13 }
 0x4cc   :  { %3901 = vmatpush3.msk.msra.mxu0 %vm3049_vm3, %v5163_v59  ;;  %3904 = vmatprep.mubr.msk.f32.mxu0 %vm4065_vm4, %v6319_v44  ;;  %v5412_v54 = vpop.eup %4009  ;;  %v944_v34 = vsel %vm389_vm0, %v5408_v51, 0.0  ;;  %v915_v1 = vadd.f32 %v6320_v25, %v867_v17  ;;  %v928_v29 = vmul.f32 %v5408_v51, %v5408_v51 }
 0x4cd   :  { %3902 = vmatprep.subr.mxu0 %v6319_v44  ;;  %v5416_v62 = vpop.eup %4011  ;;  %4017 = vtanh.f32 %v913_v57  ;;  %v924_v24 = vmul.f32 %v5412_v54, %v5412_v54  ;;  %v959_v25 = vsel %vm389_vm0, %v925_v36, 0.0  ;;  %v6325_v57 = vld [vmem:[#allocation39_spill] sm:$0xff] }
 0x4ce   :  { %3903 = vmatpush3.msra.mxu0 %v5181_v32  ;;  %6321 = vst [vmem:[#allocation49_spill] sm:$0xff] %v5416_v62  ;;  %v950_v18 = vsel %vm389_vm0, %v5416_v62, 0.0  ;;  %4019 = vtanh.f32 %v915_v1  ;;  %v930_v41 = vmul.f32 %v5416_v62, %v5416_v62  ;;  %v6326_v1 = vld [vmem:[#allocation41_spill] sm:$0xff]  ;;  %v6348_v62 = vld [vmem:[#allocation32_spill] sm:$0xff] }
 0x4cf   :  { %3914 = vmatprep.subr.mxu0 %v6319_v44  ;;  %v5401_v7 = vpop.permute.xlu1 %1494  ;;  %v5428_v61 = vpop.eup %4013 }
 0x4d0   :  { %6322 = vst [vmem:[#allocation46_spill] sm:$0xff] %v5428_v61  ;;  %v926_v63 = vmul.f32 %v5428_v61, %v5428_v61  ;;  %v938_v49 = vsel %vm389_vm0, %v5428_v61, 0.0  ;;  %v974_v58 = vsel %vm389_vm0, %v930_v41, 0.0  ;;  %v3844_v41 = vld [vmem:[%s6162_s7 + $0x22] sm:$0x1] }
 0x4d3   :  { %v2968_v2 = vpop.permute.xlu1 %2967 }
 0x4d4   :  { %v2973_v38 = vrot.slane %v2968_v2, %v4889_v3 }
 0x4d5   :  { %936 = vadd.xlane.f32.xlu1 %v935_v27 }
 0x4d6   :  { %v2993_v4 = vmul.f32 %v4909_v28, %v2973_v38  ;;  %v2997_v22 = vmul.f32 %v4948_v56, %v2973_v38  ;;  %v932_v28 = vsel %vm389_vm0, %v5412_v54, 0.0  ;;  %v956_v56 = vsel %vm389_vm0, %v924_v24, 0.0 }
 0x4d7   :  { %v3012_v11 = vpop.permute.xlu1 %3011  ;;  %v1413_v38 = vmul.f32 %v5015_v42, %v6325_v57  ;;  %v1583_v24 = vmul.f32 %v5015_v42, %v5209_v45  ;;  %v1584_v57 = vmul.f32 %v5015_v42, %v5244_v43 }
 0x4d8   :  { %v3017_v23 = vrot.slane %v3012_v11, %v4889_v3  ;;  %v5445_v14 = vpop.eup %4015  ;;  %v1415_v11 = vmul.f32 %v5015_v42, %v6326_v1  ;;  %v1854_v1 = vmul.f32 %v5007_v37, %v5327_v55 }
 0x4d9   :  { %945 = vadd.xlane.f32.xlu1 %v944_v34  ;;  %6323 = vst [vmem:[#allocation43_spill] sm:$0xff] %v5445_v14  ;;  %v941_v39 = vsel %vm389_vm0, %v5445_v14, 0.0  ;;  %v927_v16 = vmul.f32 %v5445_v14, %v5445_v14 }
 0x4da   :  { %v3037_v31 = vadd.f32 %v3017_v23, %v2993_v4  ;;  %v5422_v6 = vadd.f32 %v3017_v23, %v2997_v22  ;;  %933 = vadd.xlane.f32.xlu0 %v932_v28  ;;  %v5452_v48 = vpop.eup %4017  ;;  %v3845_v4 = vld [vmem:[%s6162_s7 + $0x23] sm:$0x1]  ;;  %v1579_v22 = vmul.f32 %v5007_v37, %v5209_v45  ;;  %v6328_v45 = vld [vmem:[#allocation40_spill] sm:$0xff] }
 0x4db   :  { %v947_v26 = vsel %vm389_vm0, %v5452_v48, 0.0  ;;  %v5459_v9 = vpop.eup %4019  ;;  %v965_v40 = vsel %vm389_vm0, %v927_v16, 0.0  ;;  %v929_v27 = vmul.f32 %v5452_v48, %v5452_v48  ;;  %v2955_v23 = vsub.f32 %v3845_v4, %v5262_v35  ;;  %v6327_v35 = vld [vmem:[#allocation38_spill] sm:$0xff] }
 0x4dc   :  { %3898 = vmatmul.mubr.msk.f32.vlgmr.msra.gmra.mxu1 %vm2833_vm2, %v3037_v31  ;;  %6324 = vst [vmem:[#allocation7_spill] sm:$0xff] %v5459_v9  ;;  %v953_v33 = vsel %vm389_vm0, %v5459_v9, 0.0  ;;  %v931_v2 = vmul.f32 %v5459_v9, %v5459_v9  ;;  %v1595_v31 = vrot.slane %v1579_v22, 1  ;;  %v1580_v16 = vmul.f32 %v5007_v37, %v5244_v43 }
 0x4dd   :  { %951 = vadd.xlane.f32.xlu1 %v950_v18  ;;  %3908 = vmatpush3.msk.msra.mxu1 %vm3049_vm3, %v5163_v59  ;;  %v962_v59 = vsel %vm389_vm0, %v926_v63, 0.0  ;;  %v971_v17 = vsel %vm389_vm0, %v929_v27, 0.0  ;;  %v1581_v18 = vmul.f32 %v5007_v37, %v5260_v20  ;;  %v1585_v63 = vmul.f32 %v5015_v42, %v5260_v20 }
 0x4de   :  { %3909 = vmatprep.subr.mxu1 %v6319_v44  ;;  %3911 = vmatprep.mubr.msk.f32.mxu1 %vm4065_vm4, %v6319_v44  ;;  %v977_v34 = vsel %vm389_vm0, %v931_v2, 0.0  ;;  %v1678_v20 = vmul.f32 %v5007_v37, %v5307_v47  ;;  %v1682_v27 = vmul.f32 %v5015_v42, %v5307_v47  ;;  %v3807_v47 = vld [vmem:[%s6162_s7 + $0xd] ss:$0 sm:$0xff]  ;;  %v1870_v4 = vrot.slane %v1854_v1, 2 }
 0x4df   :  { %3910 = vmatpush3.msra.mxu1 %v5181_v32  ;;  %939 = vadd.xlane.f32.xlu0 %v938_v49  ;;  %v968_v32 = vsel %vm389_vm0, %v928_v29, 0.0  ;;  %v1597_v28 = vrot.slane %v1581_v18, 1  ;;  %v1412_v49 = vmul.f32 %v5015_v42, %v6327_v35  ;;  %v1676_v29 = vmul.f32 %v5007_v37, %v5286_v50 }
 0x4e0   :  { %3921 = vmatprep.subr.mxu1 %v6319_v44  ;;  %v1694_v36 = vrot.slane %v1678_v20, 1  ;;  %v1856_v22 = vmul.f32 %v5007_v37, %v5345_v21  ;;  %v1858_v18 = vmul.f32 %v5015_v42, %v5327_v55  ;;  %v5563_v55 = vld [vmem:[%s6165_s1] sm:$0x1f] }
 0x4e1   :  { %957 = vadd.xlane.f32.xlu1 %v956_v56  ;;  %v1599_v56 = vrot.slane %v1583_v24, 1 }
 0x4e2   :  { %v1872_v24 = vrot.slane %v1856_v22, 2 }
 0x4e3   :  { %942 = vadd.xlane.f32.xlu0 %v941_v39  ;;  %v1414_v39 = vmul.f32 %v5015_v42, %v6328_v45  ;;  %v5583_v45 = vld [vmem:[%s6165_s1 + $0x8] sm:$0x1f] }
 0x4e5   :  { %963 = vadd.xlane.f32.xlu1 %v962_v59  ;;  %v1601_v59 = vrot.slane %v1585_v63, 1  ;;  %v1860_v63 = vmul.f32 %v5015_v42, %v5345_v21  ;;  %v1953_v21 = vmul.f32 %v5563_v55, %v5374_v12 }
 0x4e7   :  { %948 = vadd.xlane.f32.xlu0 %v947_v26  ;;  %v1578_v26 = vmul.f32 %v5007_v37, %v5225_v5  ;;  %v1876_v35 = vrot.slane %v1860_v63, 2 }
 0x4e9   :  { %969 = vadd.xlane.f32.xlu1 %v968_v32  ;;  %v1692_v32 = vrot.slane %v1676_v29, 1  ;;  %v1853_v29 = vmul.f32 %v5563_v55, %v5231_v60 }
 0x4eb   :  { %954 = vadd.xlane.f32.xlu0 %v953_v33  ;;  %v1680_v33 = vmul.f32 %v5015_v42, %v5286_v50  ;;  %v1596_v50 = vrot.slane %v1580_v16, 1  ;;  %v1869_v20 = vrot.slane %v1853_v29, 2  ;;  %v1859_v16 = vmul.f32 %v5583_v45, %v5252_v15 }
 0x4ed   :  { %975 = vadd.xlane.f32.xlu1 %v974_v58  ;;  %v2954_v58 = vsub.f32 %v3844_v41, %v5341_v53  ;;  %v1582_v53 = vmul.f32 %v5015_v42, %v5225_v5  ;;  %v1675_v5 = vmul.f32 %v5007_v37, %v5211_v0  ;;  %v1855_v41 = vmul.f32 %v5563_v55, %v5252_v15 }
 0x4ef   :  { %960 = vadd.xlane.f32.xlu0 %v959_v25  ;;  %v1594_v25 = vrot.slane %v1578_v26, 1  ;;  %v1598_v2 = vrot.slane %v1582_v53, 1  ;;  %v1691_v43 = vrot.slane %v1675_v5, 1 }
 0x4f3   :  { %966 = vadd.xlane.f32.xlu0 %v965_v40  ;;  %v1696_v40 = vrot.slane %v1680_v33, 1  ;;  %v1857_v33 = vmul.f32 %v5583_v45, %v5231_v60 }
 0x4f7   :  { %972 = vadd.xlane.f32.xlu0 %v971_v17  ;;  %v1698_v17 = vrot.slane %v1682_v27, 1  ;;  %v1950_v27 = vmul.f32 %v5563_v55, %v5271_v30 }
 0x4f9   :  { %v1966_v53 = vrot.slane %v1950_v27, 2 }
 0x4fb   :  { %978 = vadd.xlane.f32.xlu0 %v977_v34  ;;  %v3809_v34 = vld [vmem:[%s6162_s7 + $0xf] ss:$0 sm:$0xff] }
 0x4fe   :  { %1434 = vrot.lane.b32.xlu1 %v1413_v38, %s4061_s20  ;;  %v1600_v38 = vrot.slane %v1584_v57, 1  ;;  %v1954_v57 = vmul.f32 %v5583_v45, %v5271_v30 }
 0x502   :  { %1438 = vrot.lane.b32.xlu1 %v1415_v11, %s4061_s20  ;;  %v1677_v11 = vmul.f32 %v5007_v37, %v5217_v10  ;;  %v1681_v37 = vmul.f32 %v5015_v42, %v5217_v10 }
 0x506   :  { %3029 = vperm.xlu1 %3950, %v2955_v23   ;;  %v1679_v23 = vmul.f32 %v5015_v42, %v5211_v0  ;;  %v1697_v0 = vrot.slane %v1681_v37, 1  ;;  %v3806_v42 = vld [vmem:[%s6162_s7 + $0xc] ss:$0 sm:$0xff] }
 0x50a   :  { %1604 = vrot.lane.b32.xlu1 %v1595_v31, %s4060_s23  ;;  %v1693_v31 = vrot.slane %v1677_v11, 1 }
 0x50e   :  { %1608 = vrot.lane.b32.xlu1 %v1597_v28, %s4060_s23  ;;  %v1695_v28 = vrot.slane %v1679_v23, 1 }
 0x511   :  { %1432 = vrot.lane.b32.xlu0 %v1412_v49, %s4061_s20  ;;  %v1951_v49 = vmul.f32 %v5563_v55, %v5361_v52 }
 0x512   :  { %1612 = vrot.lane.b32.xlu1 %v1599_v56, %s4060_s23  ;;  %v1874_v56 = vrot.slane %v1858_v18, 2 }
 0x513   :  { %v1967_v10 = vrot.slane %v1951_v49, 2 }
 0x515   :  { %1436 = vrot.lane.b32.xlu0 %v1414_v39, %s4061_s20  ;;  %v1955_v39 = vmul.f32 %v5583_v45, %v5361_v52  ;;  %v1871_v52 = vrot.slane %v1855_v41, 2 }
 0x516   :  { %1616 = vrot.lane.b32.xlu1 %v1601_v59, %s4060_s23  ;;  %v3808_v59 = vld [vmem:[%s6162_s7 + $0xe] ss:$0 sm:$0xff] }
 0x517   :  { %v1971_v26 = vrot.slane %v1955_v39, 2 }
 0x519   :  { %3020 = vperm.xlu0 %3949, %v2954_v58   ;;  %v1957_v58 = vmul.f32 %v5583_v45, %v5374_v12  ;;  %v1875_v12 = vrot.slane %v1859_v16, 2 }
 0x51a   :  { %1701 = vrot.lane.b32.xlu1 %v1692_v32, %s4061_s20  ;;  %v1969_v32 = vrot.slane %v1953_v21, 2 }
 0x51d   :  { %1602 = vrot.lane.b32.xlu0 %v1594_v25, %s4060_s23  ;;  %v1873_v25 = vrot.slane %v1857_v33, 2 }
 0x51e   :  { %1705 = vrot.lane.b32.xlu1 %v1694_v36, %s4061_s20  ;;  %v1973_v36 = vrot.slane %v1957_v58, 2 }
 0x521   :  { %1606 = vrot.lane.b32.xlu0 %v1596_v50, %s4060_s23  ;;  %v6329_v50 = vld [vmem:[#allocation45_spill] sm:$0xff] }
 0x522   :  { %1709 = vrot.lane.b32.xlu1 %v1696_v40, %s4061_s20  ;;  %v5600_v40 = vpop.permute.xlu1 %1761 }
 0x525   :  { %1610 = vrot.lane.b32.xlu0 %v1598_v2, %s4060_s23  ;;  %v5611_v2 = vpop.permute.xlu0 %1757 }
 0x526   :  { %1713 = vrot.lane.b32.xlu1 %v1698_v17, %s4061_s20  ;;  %v5606_v60 = vpop.permute.xlu1 %1769  ;;  %v1952_v17 = vmul.f32 %v5563_v55, %v6329_v50  ;;  %v1772_v14 = vmul.f32 %v5563_v55, %v5611_v2 }
 0x529   :  { %1614 = vrot.lane.b32.xlu0 %v1600_v38, %s4060_s23  ;;  %v1970_v38 = vrot.slane %v1954_v57, 2  ;;  %v5620_v1 = vpop.permute.xlu0 %1765 }
 0x52a   :  { %2036 = vperm.xlu1 %3950, %v3807_v47   ;;  %v1968_v47 = vrot.slane %v1952_v17, 2 }
 0x52c   :  { %v5613_v15 = vpop.permute.xlu1 %2985 }
 0x52d   :  { %1699 = vrot.lane.b32.xlu0 %v1691_v43, %s4061_s20 }
 0x52e   :  { %2044 = vperm.xlu1 %3950, %v3809_v34   ;;  %v1956_v34 = vmul.f32 %v5583_v45, %v6329_v50 }
 0x530   :  { %v1972_v11 = vrot.slane %v1956_v34, 2 }
 0x531   :  { %1703 = vrot.lane.b32.xlu0 %v1693_v31, %s4061_s20 }
 0x532   :  { %1879 = vrot.lane.b32.xlu1 %v1870_v4, %s4060_s23 }
 0x535   :  { %1707 = vrot.lane.b32.xlu0 %v1695_v28, %s4061_s20 }
 0x536   :  { %1883 = vrot.lane.b32.xlu1 %v1872_v24, %s4060_s23  ;;  %v5623_v22 = vpop.permute.xlu0 %2976 }
 0x539   :  { %1711 = vrot.lane.b32.xlu0 %v1697_v0, %s4061_s20 }
 0x53a   :  { %1887 = vrot.lane.b32.xlu1 %v1874_v56, %s4060_s23 }
 0x53d   :  { %2032 = vperm.xlu0 %3949, %v3806_v42  }
 0x53e   :  { %1891 = vrot.lane.b32.xlu1 %v1876_v35, %s4060_s23 }
 0x541   :  { %2040 = vperm.xlu0 %3949, %v3808_v59  }
 0x542   :  { %1976 = vrot.lane.b32.xlu1 %v1967_v10, %s4061_s20 }
 0x545   :  { %1877 = vrot.lane.b32.xlu0 %v1869_v20, %s4060_s23 }
 0x546   :  { %1980 = vrot.lane.b32.xlu1 %v1969_v32, %s4061_s20 }
 0x549   :  { %1881 = vrot.lane.b32.xlu0 %v1871_v52, %s4060_s23 }
 0x54a   :  { %1984 = vrot.lane.b32.xlu1 %v1971_v26, %s4061_s20 }
 0x54d   :  { %1885 = vrot.lane.b32.xlu0 %v1873_v25, %s4060_s23 }
 0x54e   :  { %1988 = vrot.lane.b32.xlu1 %v1973_v36, %s4061_s20 }
 0x551   :  { %1889 = vrot.lane.b32.xlu0 %v1875_v12, %s4060_s23 }
 0x555   :  { %1974 = vrot.lane.b32.xlu0 %v1966_v53, %s4061_s20 }
 0x559   :  { %1978 = vrot.lane.b32.xlu0 %v1968_v47, %s4061_s20 }
 0x55d   :  { %1982 = vrot.lane.b32.xlu0 %v1970_v38, %s4061_s20 }
 0x55e   :  { %v937_v5 = vpop.xlane.xlu1 %936 }
 0x55f   :  { %v986_v0 = vrot.slane %v937_v5, 4 }
 0x561   :  { %1986 = vrot.lane.b32.xlu0 %v1972_v11, %s4061_s20  ;;  %v987_v41 = vadd.f32 %v986_v0, %v937_v5 }
 0x562   :  { %v946_v43 = vpop.xlane.xlu1 %945 }
 0x563   :  { %v1004_v4 = vrot.slane %v946_v43, 4  ;;  %v934_v24 = vpop.xlane.xlu0 %933  ;;  %v988_v57 = vrot.slane %v987_v41, 2 }
 0x564   :  { %v980_v37 = vrot.slane %v934_v24, 4 }
 0x565   :  { %v1005_v30 = vadd.f32 %v1004_v4, %v946_v43 }
 0x566   :  { %v952_v23 = vpop.xlane.xlu1 %951  ;;  %v981_v35 = vadd.f32 %v980_v37, %v934_v24  ;;  %v989_v37 = vadd.f32 %v988_v57, %v987_v41 }
 0x567   :  { %v1006_v31 = vrot.slane %v1005_v30, 2  ;;  %v1016_v18 = vrot.slane %v952_v23, 4 }
 0x568   :  { %v940_v21 = vpop.xlane.xlu0 %939  ;;  %v982_v59 = vrot.slane %v981_v35, 2 }
 0x569   :  { %v1007_v28 = vadd.f32 %v1006_v31, %v1005_v30  ;;  %v1017_v56 = vadd.f32 %v1016_v18, %v952_v23  ;;  %v992_v39 = vrot.slane %v940_v21, 4 }
 0x56a   :  { %v958_v63 = vpop.xlane.xlu1 %957  ;;  %v983_v26 = vadd.f32 %v982_v59, %v981_v35 }
 0x56b   :  { %v1018_v49 = vrot.slane %v1017_v56, 2  ;;  %v1028_v42 = vrot.slane %v958_v63, 4  ;;  %v1008_v10 = vrot.slane %v1007_v28, 1  ;;  %v993_v58 = vadd.f32 %v992_v39, %v940_v21 }
 0x56c   :  { %v943_v25 = vpop.xlane.xlu0 %942  ;;  %v984_v16 = vrot.slane %v983_v26, 1 }
 0x56d   :  { %v1019_v29 = vadd.f32 %v1018_v49, %v1017_v56  ;;  %v1029_v32 = vadd.f32 %v1028_v42, %v958_v63  ;;  %v1009_v52 = vadd.f32 %v1008_v10, %v1007_v28  ;;  %v994_v12 = vrot.slane %v993_v58, 2 }
 0x56e   :  { %v964_v20 = vpop.xlane.xlu1 %963  ;;  %v998_v53 = vrot.slane %v943_v25, 4  ;;  %v985_v47 = vadd.f32 %v984_v16, %v983_v26 }
 0x56f   :  { %v1040_v33 = vrot.slane %v964_v20, 4  ;;  %v1020_v36 = vrot.slane %v1019_v29, 1  ;;  %v1030_v27 = vrot.slane %v1029_v32, 2  ;;  %v995_v38 = vadd.f32 %v994_v12, %v993_v58 }
 0x570   :  { %v999_v11 = vadd.f32 %v998_v53, %v943_v25  ;;  %v949_v4 = vpop.xlane.xlu0 %948  ;;  %v1076_v5 = vadd.f32 %v1009_v52, %v985_v47 }
 0x571   :  { %v1041_v50 = vadd.f32 %v1040_v33, %v964_v20  ;;  %v1021_v43 = vadd.f32 %v1020_v36, %v1019_v29  ;;  %v996_v30 = vrot.slane %v995_v38, 1  ;;  %v1031_v23 = vadd.f32 %v1030_v27, %v1029_v32 }
 0x572   :  { %v970_v17 = vpop.xlane.xlu1 %969  ;;  %v1010_v31 = vrot.slane %v949_v4, 4  ;;  %v1000_v0 = vrot.slane %v999_v11, 2  ;;  %v990_v32 = vrot.slane %v989_v37, 1  ;;  %v5628_v33 = vmul.f32 0.004464286, %v1076_v5 }
 0x573   :  { %v1052_v34 = vrot.slane %v970_v17, 4  ;;  %v1042_v18 = vrot.slane %v1041_v50, 2  ;;  %v997_v56 = vadd.f32 %v996_v30, %v995_v38  ;;  %v1032_v21 = vrot.slane %v1031_v23, 1 }
 0x574   :  { %v1011_v63 = vadd.f32 %v1010_v31, %v949_v4  ;;  %v955_v49 = vpop.xlane.xlu0 %954  ;;  %v1001_v41 = vadd.f32 %v1000_v0, %v999_v11  ;;  %v5632_v27 = vrot.slane %v5613_v15, %v4889_v3  ;;  %v991_v4 = vadd.f32 %v990_v32, %v989_v37 }
 0x575   :  { %v1053_v24 = vadd.f32 %v1052_v34, %v970_v17  ;;  %v1078_v10 = vadd.f32 %v1021_v43, %v997_v56  ;;  %v1043_v29 = vadd.f32 %v1042_v18, %v1041_v50  ;;  %v1022_v20 = vrot.slane %v955_v49, 4 }
 0x576   :  { %v976_v28 = vpop.xlane.xlu1 %975  ;;  %v1012_v59 = vrot.slane %v1011_v63, 2  ;;  %v1033_v53 = vadd.f32 %v1032_v21, %v1031_v23  ;;  %v1092_v11 = vmul.f32 %v5628_v33, %v5628_v33  ;;  %v1002_v31 = vrot.slane %v1001_v41, 1 }
 0x577   :  { %v1054_v35 = vrot.slane %v1053_v24, 2  ;;  %v1064_v42 = vrot.slane %v976_v28, 4  ;;  %v1023_v25 = vadd.f32 %v1022_v20, %v955_v49  ;;  %v1044_v57 = vrot.slane %v1043_v29, 1  ;;  %v6331_v20 = vld [vmem:[#allocation56_spill] sm:$0xff] }
 0x578   :  { %v1013_v52 = vadd.f32 %v1012_v59, %v1011_v63  ;;  %v961_v12 = vpop.xlane.xlu0 %960  ;;  %v5638_v23 = vmul.f32 0.004464286, %v1078_v10  ;;  %v6330_v59 = vld [vmem:[#allocation27_spill] sm:$0xff]  ;;  %v1003_v10 = vadd.f32 %v1002_v31, %v1001_v41  ;;  %v6332_v41 = vld [vmem:[#allocation29_spill] sm:$0xff] }
 0x579   :  { %v1055_v39 = vadd.f32 %v1054_v35, %v1053_v24  ;;  %v1065_v26 = vadd.f32 %v1064_v42, %v976_v28  ;;  %v1034_v17 = vrot.slane %v961_v12, 4  ;;  %v1024_v38 = vrot.slane %v1023_v25, 2 }
 0x57a   :  { %v5626_v58 = vpop.permute.xlu1 %1434  ;;  %v1014_v50 = vrot.slane %v1013_v52, 1  ;;  %v1045_v35 = vadd.f32 %v1044_v57, %v1043_v29  ;;  %v1502_v29 = vmul.f32 %v5583_v45, %v5392_v8 }
 0x57b   :  { %v1056_v36 = vrot.slane %v1055_v39, 1  ;;  %v1066_v16 = vrot.slane %v1065_v26, 2  ;;  %v1035_v30 = vadd.f32 %v1034_v17, %v961_v12  ;;  %v1025_v24 = vadd.f32 %v1024_v38, %v1023_v25 }
 0x57c   :  { %v1015_v5 = vadd.f32 %v1014_v50, %v1013_v52  ;;  %v967_v28 = vpop.xlane.xlu0 %966 }
 0x57d   :  { %v1057_v47 = vadd.f32 %v1056_v36, %v1055_v39  ;;  %v1067_v34 = vadd.f32 %v1066_v16, %v1065_v26  ;;  %v1036_v63 = vrot.slane %v1035_v30, 2  ;;  %v1046_v0 = vrot.slane %v967_v28, 4 }
 0x57e   :  { %v5634_v43 = vpop.permute.xlu1 %1438  ;;  %v5640_v56 = vadd.f32 %v1015_v5, %v991_v4  ;;  %v1026_v42 = vrot.slane %v1025_v24, 1  ;;  %v1275_v39 = vmul.f32 %v5583_v45, %v6330_v59  ;;  %v2995_v26 = vmul.f32 %v6331_v20, %v5632_v27  ;;  %v6333_v5 = vld [vmem:[#allocation35_spill] sm:$0xff] }
 0x57f   :  { %v1080_v18 = vadd.f32 %v1057_v47, %v1033_v53  ;;  %v1068_v15 = vrot.slane %v1067_v34, 1  ;;  %v1047_v32 = vadd.f32 %v1046_v0, %v967_v28  ;;  %v1094_v53 = vmul.f32 %v5638_v23, %v5638_v23  ;;  %v6334_v0 = vld [vmem:[#allocation37_spill] sm:$0xff] }
 0x580   :  { %v1027_v25 = vadd.f32 %v1026_v42, %v1025_v24  ;;  %v973_v12 = vpop.xlane.xlu0 %972  ;;  %v1037_v50 = vadd.f32 %v1036_v63, %v1035_v30  ;;  %v1364_v31 = vadd.f32 %v6333_v5, %v1275_v39  ;;  %v5678_v39 = vld [vmem:[%s6168_s9] sm:$0x1]  ;;  %v1518_v20 = vrot.slane %v1502_v29, 1 }
 0x581   :  { %v1088_v49 = vmul.f32 0.004464286, %v1080_v18  ;;  %v1069_v37 = vadd.f32 %v1068_v15, %v1067_v34  ;;  %v1058_v17 = vrot.slane %v973_v12, 4  ;;  %v1048_v18 = vrot.slane %v1047_v32, 2 }
 0x582   :  { %v3030_v21 = vpop.permute.xlu1 %3029  ;;  %v5653_v47 = vadd.f32 %v1027_v25, %v1003_v10  ;;  %v1504_v15 = vmul.f32 %v5583_v45, %v5401_v7 }
 0x583   :  { %v5647_v52 = vrot.slane %v3030_v21, %v4889_v3  ;;  %v1096_v36 = vsub.f32 %v1088_v49, %v1092_v11  ;;  %v1082_v16 = vadd.f32 %v1069_v37, %v1045_v35  ;;  %v1277_v11 = vmul.f32 %v5583_v45, %v6332_v41  ;;  %v5669_v21 = vld [vmem:[%s6167_s8 + $0x8] sm:$0xf] }
 0x584   :  { %v1059_v24 = vadd.f32 %v1058_v17, %v973_v12  ;;  %v979_v63 = vpop.xlane.xlu0 %978  ;;  %v1453_v49 = vadd.f32 %v5626_v58, %v1364_v31  ;;  %v5686_v12 = vld [vmem:[%s6167_s8] sm:$0xff]  ;;  %v1520_v29 = vrot.slane %v1504_v15, 1  ;;  %v6335_v17 = vld [vmem:[#allocation57_spill] sm:$0xff] }
 0x585   :  { %v1100_v57 = vmax.f32 %v1096_v36, 0.0  ;;  %v1090_v38 = vmul.f32 0.004464286, %v1082_v16  ;;  %v3039_v34 = vadd.f32 %v5647_v52, %v2995_v26  ;;  %v1366_v35 = vadd.f32 %v6334_v0, %v1277_v11 }
 0x586   :  { %v5656_v4 = vpop.permute.xlu1 %1604  ;;  %v1060_v42 = vrot.slane %v1059_v24, 2  ;;  %v1070_v37 = vrot.slane %v979_v63, 4  ;;  %v1038_v26 = vrot.slane %v1037_v50, 1  ;;  %v1049_v36 = vadd.f32 %v1048_v18, %v1047_v32 }
 0x587   :  { %v1104_v30 = vadd.f32 1e-05, %v1100_v57  ;;  %v1098_v28 = vsub.f32 %v1090_v38, %v1094_v53  ;;  %3912 = vmatmul.mubr.msk.f32.vlgmr.msra.gmra.mxu1 %vm2833_vm2, %v3039_v34  ;;  %v2999_v57 = vmul.f32 %v6335_v17, %v5632_v27  ;;  %v1455_v32 = vadd.f32 %v5634_v43, %v1366_v35 }
 0x588   :  { %3922 = vmatpush3.msk.msra.mxu1 %vm3049_vm3, %v5669_v21  ;;  %3925 = vmatprep.mubr.msk.f32.mxu1 %vm4065_vm4, %v6319_v44  ;;  %v1061_v25 = vadd.f32 %v1060_v42, %v1059_v24  ;;  %v1071_v16 = vadd.f32 %v1070_v37, %v979_v63  ;;  %v1534_v27 = vadd.f32 %v1518_v20, %v1453_v49  ;;  %v5701_v18 = vmul.f32 0.004464286, %v5640_v56  ;;  %v5704_v15 = vpop.permute.xlu0 %1432 }
 0x589   :  { %4021 = vrsqrt.f32 %v1104_v30  ;;  %v1102_v58 = vmax.f32 %v1098_v28, 0.0  ;;  %3923 = vmatprep.subr.mxu1 %v6319_v44  ;;  %v1039_v24 = vadd.f32 %v1038_v26, %v1037_v50  ;;  %v1050_v30 = vrot.slane %v1049_v36, 1 }
 0x58a   :  { %v5681_v10 = vpop.permute.xlu1 %1608  ;;  %3924 = vmatpush3.msra.mxu1 %v5686_v12  ;;  %v1062_v11 = vrot.slane %v1061_v25, 1  ;;  %v1072_v5 = vrot.slane %v1071_v16, 2  ;;  %v1536_v0 = vadd.f32 %v1520_v29, %v1455_v32  ;;  %v1093_v35 = vmul.f32 %v5701_v18, %v5701_v18  ;;  %v3726_v29 = vld [vmem:[%s6162_s7 + $0x4] sm:$0x1] }
 0x58b   :  { %v3119_v53 = vpop.f32.mrf.mxu0  ;;  %v1106_v38 = vadd.f32 1e-05, %v1102_v58  ;;  %3926 = vmatmul.mubr.msk.f32.vlgmr.msra.gmra.mxu1 %vm2833_vm2, %v5422_v6  ;;  %3935 = vmatprep.subr.mxu1 %v6319_v44  ;;  %v3043_v6 = vadd.f32 %v5647_v52, %v2999_v57  ;;  %v5716_v49 = vmul.f32 0.004464286, %v5653_v47  ;;  %v1051_v37 = vadd.f32 %v1050_v30, %v1049_v36 }
 0x58c   :  { %v3635_v34 = vadd.f32 %v5678_v39, %v3119_v53  ;;  %3936 = vmatpush3.msk.msra.mxu1 %vm3049_vm3, %v5669_v21  ;;  %3939 = vmatprep.mubr.msk.f32.mxu1 %vm4065_vm4, %v6319_v44  ;;  %v1063_v28 = vadd.f32 %v1062_v11, %v1061_v25  ;;  %v1073_v63 = vadd.f32 %v1072_v5, %v1071_v16  ;;  %v5720_v25 = vpop.permute.xlu0 %1436  ;;  %v6336_v5 = vld [vmem:[#allocation58_spill] sm:$0xff] }
 0x58d   :  { %v3892_v31 = vpop.f32.mrf.mxu0  ;;  %4023 = vrsqrt.f32 %v1106_v38  ;;  %3937 = vmatprep.subr.mxu1 %v6319_v44  ;;  %v2982_v16 = vrot.slane %v5623_v22, %v4889_v3  ;;  %v1095_v36 = vmul.f32 %v5716_v49, %v5716_v49 }
 0x58e   :  { %3644 = vst.msk [vmem:[%s6169_s10 + $0xb] sm:$0x1] %vm3643_vm5, %v3635_v34  ;;  %v1613_v43 = vpop.permute.xlu1 %1612  ;;  %3938 = vmatpush3.msra.mxu1 %v5686_v12  ;;  %v1081_v50 = vadd.f32 %v1063_v28, %v1039_v24  ;;  %v1074_v52 = vrot.slane %v1073_v63, 1 }
 0x58f   :  { %v1631_v56 = vadd.f32 %v1613_v43, %v1534_v27  ;;  %3940 = vmatmul.mubr.msk.f32.vlgmr.msra.gmra.mxu1 %vm2833_vm2, %v3043_v6  ;;  %v2994_v31 = vmul.f32 %v6336_v5, %v2982_v16  ;;  %v3728_v6 = vld [vmem:[%s6162_s7 + $0x6] sm:$0x1]  ;;  %v1777_v43 = vmul.f32 %v5583_v45, %v5600_v40 }
 0x590   :  { %v1089_v20 = vmul.f32 0.004464286, %v1081_v50  ;;  %v1075_v58 = vadd.f32 %v1074_v52, %v1073_v63 }
 0x592   :  { %v1617_v42 = vpop.permute.xlu1 %1616  ;;  %v1097_v53 = vsub.f32 %v1089_v20, %v1093_v35  ;;  %v1083_v17 = vadd.f32 %v1075_v58, %v1051_v37  ;;  %v1793_v37 = vrot.slane %v1777_v43, 2  ;;  %v6340_v43 = vld [vmem:[#allocation42_spill] sm:$0xff] }
 0x593   :  { %v5718_v26 = vadd.f32 %v1617_v42, %v1536_v0 }
 0x594   :  { %v1101_v38 = vmax.f32 %v1097_v53, 0.0  ;;  %v1091_v34 = vmul.f32 0.004464286, %v1083_v17  ;;  %v3021_v32 = vpop.permute.xlu0 %3020 }
 0x595   :  { %v3026_v24 = vrot.slane %v3021_v32, %v4889_v3  ;;  %v3727_v32 = vld [vmem:[%s6162_s7 + $0x5] sm:$0x1] }
 0x596   :  { %v5727_v57 = vpop.permute.xlu1 %1701  ;;  %v4022_v47 = vpop.eup %4021  ;;  %v1105_v22 = vadd.f32 1e-05, %v1101_v38  ;;  %v1099_v27 = vsub.f32 %v1091_v34, %v1095_v36  ;;  %v6337_v36 = vld [vmem:[#allocation59_spill] sm:$0xff] }
 0x597   :  { %v5731_v11 = vmul.f32 %v4022_v47, %v3726_v29  ;;  %v3038_v52 = vadd.f32 %v3026_v24, %v2994_v31  ;;  %v2998_v38 = vmul.f32 %v6337_v36, %v2982_v16  ;;  %v6338_v31 = vld [vmem:[#allocation26_spill] sm:$0xff] }
 0x598   :  { %4025 = vrsqrt.f32 %v1105_v22  ;;  %v1103_v50 = vmax.f32 %v1099_v27, 0.0  ;;  %v5746_v0 = vpop.permute.xlu0 %1602  ;;  %v1274_v22 = vmul.f32 %v5583_v45, %v6338_v31 }
 0x599   :  { %v5744_v28 = vmul.f32 %v5731_v11, %v5628_v33  ;;  %3905 = vmatmul.mubr.msk.f32.vlgmr.msra.gmra.mxu0 %vm2833_vm2, %v3038_v52  ;;  %v3042_v16 = vadd.f32 %v3026_v24, %v2998_v38  ;;  %v6339_v24 = vld [vmem:[#allocation34_spill] sm:$0xff] }
 0x59a   :  { %v5740_v30 = vpop.permute.xlu1 %1705  ;;  %v4024_v63 = vpop.eup %4023  ;;  %v1107_v42 = vadd.f32 1e-05, %v1103_v50  ;;  %3915 = vmatpush3.msk.msra.mxu0 %vm3049_vm3, %v5669_v21  ;;  %3918 = vmatprep.mubr.msk.f32.mxu0 %vm4065_vm4, %v6319_v44  ;;  %v1498_v50 = vmul.f32 %v5563_v55, %v5392_v8 }
 0x59b   :  { %v5748_v35 = vmul.f32 %v4024_v63, %v3728_v6  ;;  %3916 = vmatprep.subr.mxu0 %v6319_v44  ;;  %v1363_v6 = vadd.f32 %v6339_v24, %v1274_v22  ;;  %v1501_v63 = vmul.f32 %v5583_v45, %v6340_v43 }
 0x59c   :  { %v3192_v20 = vpop.f32.mrf.mxu1  ;;  %4027 = vrsqrt.f32 %v1107_v42  ;;  %3917 = vmatpush3.msra.mxu0 %v5686_v12  ;;  %v5762_v47 = vpop.permute.xlu0 %1606 }
 0x59d   :  { %v3636_v58 = vadd.f32 %v5678_v39, %v3192_v20  ;;  %v5759_v17 = vmul.f32 %v5748_v35, %v5638_v23  ;;  %3919 = vmatmul.mubr.msk.f32.vlgmr.msra.gmra.mxu0 %vm2833_vm2, %v5376_v19  ;;  %3928 = vmatprep.subr.mxu0 %v6319_v44  ;;  %v1271_v20 = vmul.f32 %v5563_v55, %v6330_v59  ;;  %v1517_v38 = vrot.slane %v1501_v63, 1 }
 0x59e   :  { %v1710_v33 = vpop.permute.xlu1 %1709  ;;  %v3899_v29 = vpop.f32.mrf.mxu1  ;;  %3929 = vmatpush3.msk.msra.mxu0 %vm3049_vm3, %v5669_v21  ;;  %3932 = vmatprep.mubr.msk.f32.mxu0 %vm4065_vm4, %v6319_v44  ;;  %v1776_v59 = vmul.f32 %v5583_v45, %v5611_v2  ;;  %v1773_v63 = vmul.f32 %v5563_v55, %v5600_v40  ;;  %v1503_v2 = vmul.f32 %v5583_v45, %v5333_v46 }
 0x59f   :  { %v1728_v53 = vadd.f32 %v1710_v33, %v1631_v56  ;;  %3645 = vst.msk [vmem:[%s6169_s10 + $0x1b] sm:$0x1] %vm3643_vm5, %v3636_v58  ;;  %3930 = vmatprep.subr.mxu0 %v6319_v44  ;;  %v1452_v33 = vadd.f32 %v5704_v15, %v1363_v6  ;;  %v6341_v29 = vld [vmem:[#allocation31_spill] sm:$0xff] }
 0x5a0   :  { %3931 = vmatpush3.msra.mxu0 %v5686_v12  ;;  %v1611_v34 = vpop.permute.xlu0 %1610  ;;  %v3729_v12 = vld [vmem:[%s6162_s7 + $0x7] sm:$0x1]  ;;  %v1360_v36 = vadd.f32 %v6341_v29, %v1271_v20 }
 0x5a1   :  { %v5772_v56 = vadd.f32 %v1793_v37, %v1728_v53  ;;  %3933 = vmatmul.mubr.msk.f32.vlgmr.msra.gmra.mxu0 %vm2833_vm2, %v3042_v16  ;;  %v1514_v16 = vrot.slane %v1498_v50, 1  ;;  %v1533_v22 = vadd.f32 %v1517_v38, %v1452_v33  ;;  %v1789_v33 = vrot.slane %v1773_v63, 2 }
 0x5a2   :  { %v5778_v23 = vpop.permute.xlu1 %1713 }
 0x5a3   :  { %v1630_v24 = vadd.f32 %v1611_v34, %v1533_v22 }
 0x5a4   :  { %v5788_v5 = vpop.permute.xlu0 %1614 }
 0x5a5   :  { %v4026_v21 = vpop.eup %4025 }
 0x5a6   :  { %v5783_v19 = vpop.permute.xlu1 %2036  ;;  %v5792_v27 = vmul.f32 %v4026_v21, %v3727_v32 }
 0x5a8   :  { %v5806_v52 = vmul.f32 %v5792_v27, %v5701_v18  ;;  %v1700_v37 = vpop.permute.xlu0 %1699  ;;  %v6342_v18 = vld [vmem:[#allocation53_spill] sm:$0xff] }
 0x5a9   :  { %v4028_v42 = vpop.eup %4027  ;;  %v1449_v21 = vadd.f32 %v6342_v18, %v1360_v36 }
 0x5aa   :  { %v5794_v44 = vpop.permute.xlu1 %2044  ;;  %v5811_v58 = vmul.f32 %v4028_v42, %v3729_v12  ;;  %v1792_v42 = vrot.slane %v1776_v59, 2 }
 0x5ab   :  { %v1530_v12 = vadd.f32 %v1514_v16, %v1449_v21 }
 0x5ac   :  { %v5814_v32 = vpop.permute.xlu0 %1703  ;;  %v5818_v8 = vmul.f32 %v5811_v58, %v5716_v49 }
 0x5ad   :  { %v1627_v50 = vadd.f32 %v5656_v4, %v1530_v12  ;;  %v1497_v4 = vmul.f32 %v5563_v55, %v6340_v43  ;;  %v1500_v12 = vmul.f32 %v5563_v55, %v5401_v7  ;;  %v6344_v43 = vld [vmem:[#allocation33_spill] sm:$0xff] }
 0x5ae   :  { %v1880_v53 = vpop.permute.xlu1 %1879 }
 0x5af   :  { %v1724_v29 = vadd.f32 %v5727_v57, %v1627_v50  ;;  %v1513_v50 = vrot.slane %v1497_v4, 1  ;;  %v6349_v4 = vld [vmem:[#allocation54_spill] sm:$0xff] }
 0x5b0   :  { %v1708_v6 = vpop.permute.xlu0 %1707 }
 0x5b1   :  { %v1727_v20 = vadd.f32 %v1708_v6, %v1630_v24  ;;  %v1805_v34 = vadd.f32 %v1789_v33, %v1724_v29  ;;  %v1270_v24 = vmul.f32 %v5563_v55, %v6338_v31  ;;  %v1273_v6 = vmul.f32 %v5563_v55, %v6332_v41  ;;  %v6347_v31 = vld [vmem:[#allocation55_spill] sm:$0xff] }
 0x5b2   :  { %v5823_v15 = vpop.permute.xlu1 %1883  ;;  %v1516_v33 = vrot.slane %v1500_v12, 1 }
 0x5b3   :  { %v5831_v36 = vadd.f32 %v1792_v42, %v1727_v20  ;;  %v1902_v21 = vadd.f32 %v1880_v53, %v1805_v34  ;;  %v6343_v42 = vld [vmem:[#allocation30_spill] sm:$0xff]  ;;  %v1499_v20 = vmul.f32 %v5563_v55, %v5333_v46  ;;  %v1362_v29 = vadd.f32 %v6344_v43, %v1273_v6  ;;  %v6345_v34 = vld [vmem:[#allocation28_spill] sm:$0xff] }
 0x5b4   :  { %v5833_v18 = vpop.permute.xlu0 %1711  ;;  %v1359_v63 = vadd.f32 %v6343_v42, %v1270_v24  ;;  %v1272_v7 = vmul.f32 %v5563_v55, %v6345_v34  ;;  %v1276_v6 = vmul.f32 %v5583_v45, %v6345_v34 }
 0x5b5   :  { %v1515_v61 = vrot.slane %v1499_v20, 1 }
 0x5b6   :  { %v5828_v49 = vpop.permute.xlu1 %1887  ;;  %v1361_v41 = vadd.f32 %v6348_v62, %v1272_v7 }
 0x5b8   :  { %v5837_v16 = vpop.permute.xlu0 %2032  ;;  %v1450_v42 = vadd.f32 %v6349_v4, %v1361_v41 }
 0x5ba   :  { %v5835_v38 = vpop.permute.xlu1 %1891  ;;  %v1531_v62 = vadd.f32 %v1515_v61, %v1450_v42 }
 0x5bc   :  { %v5839_v22 = vpop.permute.xlu0 %2040  ;;  %v1628_v34 = vadd.f32 %v5762_v47, %v1531_v62  ;;  %v1779_v47 = vmul.f32 %v5583_v45, %v5606_v60 }
 0x5be   :  { %v1977_v59 = vpop.permute.xlu1 %1976 }
 0x5bf   :  { %v1999_v40 = vadd.f32 %v1977_v59, %v1902_v21  ;;  %v6346_v21 = vld [vmem:[#allocation52_spill] sm:$0xff] }
 0x5c0   :  { %v1878_v53 = vpop.permute.xlu0 %1877  ;;  %v1448_v59 = vadd.f32 %v6346_v21, %v1359_v63  ;;  %v1775_v63 = vmul.f32 %v5563_v55, %v5606_v60  ;;  %v1795_v60 = vrot.slane %v1779_v47, 2 }
 0x5c1   :  { %v2048_v57 = vadd.f32 %v5783_v19, %v1999_v40  ;;  %v1451_v40 = vadd.f32 %v6347_v31, %v1362_v29  ;;  %v1725_v31 = vadd.f32 %v5814_v32, %v1628_v34  ;;  %v1778_v32 = vmul.f32 %v5583_v45, %v5620_v1 }
 0x5c2   :  { %v1529_v9 = vadd.f32 %v1513_v50, %v1448_v59  ;;  %v6350_v50 = vld [vmem:[#allocation36_spill] sm:$0xff]  ;;  %v1981_v59 = vpop.permute.xlu1 %1980 }
 0x5c3   :  { %4029 = vtanh.f32 %v2048_v57  ;;  %v1532_v24 = vadd.f32 %v1516_v33, %v1451_v40  ;;  %v1365_v33 = vadd.f32 %v6350_v50, %v1276_v6  ;;  %v1794_v45 = vrot.slane %v1778_v32, 2 }
 0x5c4   :  { %v1882_v57 = vpop.permute.xlu0 %1881  ;;  %v1626_v12 = vadd.f32 %v5746_v0, %v1529_v9  ;;  %v1788_v9 = vrot.slane %v1772_v14, 2  ;;  %v1774_v0 = vmul.f32 %v5563_v55, %v5620_v1  ;;  %v1519_v14 = vrot.slane %v1503_v2, 1 }
 0x5c5   :  { %v1629_v43 = vadd.f32 %v5681_v10, %v1532_v24  ;;  %v1791_v10 = vrot.slane %v1775_v63, 2 }
 0x5c6   :  { %v1723_v20 = vadd.f32 %v1700_v37, %v1626_v12  ;;  %v1454_v37 = vadd.f32 %v5720_v25, %v1365_v33  ;;  %v1790_v41 = vrot.slane %v1774_v0, 2  ;;  %v1985_v63 = vpop.permute.xlu1 %1984  ;;  %v1906_v33 = vadd.f32 %v5828_v49, %v5772_v56 }
 0x5c7   :  { %v1726_v7 = vadd.f32 %v5740_v30, %v1629_v43  ;;  %v1730_v43 = vadd.f32 %v5778_v23, %v5718_v26 }
 0x5c8   :  { %v1886_v29 = vpop.permute.xlu0 %1885  ;;  %v1804_v30 = vadd.f32 %v1788_v9, %v1723_v20  ;;  %v1535_v42 = vadd.f32 %v1519_v14, %v1454_v37  ;;  %v1806_v12 = vadd.f32 %v1790_v41, %v1725_v31  ;;  %v2003_v9 = vadd.f32 %v1985_v63, %v1906_v33 }
 0x5c9   :  { %v1807_v46 = vadd.f32 %v1791_v10, %v1726_v7  ;;  %v1811_v2 = vadd.f32 %v1795_v60, %v1730_v43  ;;  %v1905_v26 = vadd.f32 %v1886_v29, %v5831_v36 }
 0x5ca   :  { %v1901_v55 = vadd.f32 %v1878_v53, %v1804_v30  ;;  %v1632_v62 = vadd.f32 %v5788_v5, %v1535_v42  ;;  %v1903_v53 = vadd.f32 %v1882_v57, %v1806_v12  ;;  %v1989_v5 = vpop.permute.xlu1 %1988  ;;  %v2052_v56 = vadd.f32 %v5783_v19, %v2003_v9  ;;  %v3730_v9 = vld [vmem:[%s6162_s7 + $0x8] sm:$0x1] }
 0x5cb   :  { %v1904_v24 = vadd.f32 %v5823_v15, %v1807_v46  ;;  %v1908_v0 = vadd.f32 %v5835_v38, %v1811_v2  ;;  %v3731_v2 = vld [vmem:[%s6162_s7 + $0x9] sm:$0x1] }
 0x5cc   :  { %v1890_v61 = vpop.permute.xlu0 %1889  ;;  %v1729_v15 = vadd.f32 %v5833_v18, %v1632_v62 }
 0x5cd   :  { %v2001_v6 = vadd.f32 %v1981_v59, %v1904_v24  ;;  %v2005_v49 = vadd.f32 %v1989_v5, %v1908_v0  ;;  %v1130_v5 = vsub.f32 %v3730_v9, %v5744_v28 }
 0x5ce   :  { %v1810_v34 = vadd.f32 %v1794_v45, %v1729_v15  ;;  %v1141_v45 = vrot.slane %v5731_v11, %v4889_v3  ;;  %v1145_v11 = vrot.slane %v5792_v27, %v4889_v3 }
 0x5cf   :  { %v2050_v1 = vadd.f32 %v5794_v44, %v2001_v6  ;;  %v2054_v36 = vadd.f32 %v5794_v44, %v2005_v49 }
 0x5d0   :  { %v5875_v21 = vpop.eup %4029  ;;  %v1975_v4 = vpop.permute.xlu0 %1974  ;;  %v1907_v10 = vadd.f32 %v1890_v61, %v1810_v34 }
 0x5d1   :  { %v2075_v40 = vsel %vm2071_vm6, %v5875_v21, 0.0  ;;  %v1998_v25 = vadd.f32 %v1975_v4, %v1901_v55  ;;  %v2064_v12 = vmul.f32 %v5875_v21, %v5875_v21 }
 0x5d2   :  { %2076 = vadd.xlane.f32.xlu1 %v2075_v40 }
 0x5d3   :  { %v2047_v20 = vadd.f32 %v5837_v16, %v1998_v25  ;;  %v2099_v32 = vsel %vm2071_vm6, %v2064_v12, 0.0 }
 0x5d4   :  { %v1979_v50 = vpop.permute.xlu0 %1978 }
 0x5d5   :  { %4031 = vtanh.f32 %v2047_v20  ;;  %v2000_v7 = vadd.f32 %v1979_v50, %v1903_v53 }
 0x5d7   :  { %v2049_v23 = vadd.f32 %v5839_v22, %v2000_v7 }
 0x5d8   :  { %v1983_v57 = vpop.permute.xlu0 %1982 }
 0x5d9   :  { %4033 = vtanh.f32 %v2049_v23  ;;  %v2002_v18 = vadd.f32 %v1983_v57, %v1905_v26  ;;  %v1153_v26 = vrot.slane %v5811_v58, %v4889_v3  ;;  %v1131_v23 = vsub.f32 %v3731_v2, %v5806_v52  ;;  %v3732_v57 = vld [vmem:[%s6162_s7 + $0xa] sm:$0x1] }
 0x5da   :  { %4035 = vtanh.f32 %v2050_v1  ;;  %v1149_v1 = vrot.slane %v5748_v35, %v4889_v3  ;;  %v3733_v35 = vld [vmem:[%s6162_s7 + $0xb] sm:$0x1]  ;;  %v1185_v52 = vrot.slane %v1130_v5, %v4889_v3  ;;  %v1132_v27 = vsub.f32 %v3732_v57, %v5759_v17 }
 0x5db   :  { %v2051_v59 = vadd.f32 %v5837_v16, %v2002_v18  ;;  %v1189_v0 = vrot.slane %v1131_v23, %v4889_v3  ;;  %v1133_v58 = vsub.f32 %v3733_v35, %v5818_v8 }
 0x5dc   :  { %v1987_v37 = vpop.permute.xlu0 %1986  ;;  %v1193_v34 = vrot.slane %v1132_v27, %v4889_v3 }
 0x5dd   :  { %4037 = vtanh.f32 %v2051_v59  ;;  %v2004_v31 = vadd.f32 %v1987_v37, %v1907_v10  ;;  %v1197_v28 = vrot.slane %v1133_v58, %v4889_v3 }
 0x5de   :  { %4039 = vtanh.f32 %v2052_v56 }
 0x5df   :  { %v2053_v29 = vadd.f32 %v5839_v22, %v2004_v31 }
 0x5e1   :  { %4041 = vtanh.f32 %v2053_v29 }
 0x5e2   :  { %v5901_v38 = vpop.eup %4031  ;;  %4043 = vtanh.f32 %v2054_v36 }
 0x5e3   :  { %v2072_v30 = vsel %vm2071_vm6, %v5901_v38, 0.0  ;;  %v2063_v47 = vmul.f32 %v5901_v38, %v5901_v38 }
 0x5e4   :  { %2073 = vadd.xlane.f32.xlu0 %v2072_v30 }
 0x5e5   :  { %v2096_v42 = vsel %vm2071_vm6, %v2063_v47, 0.0 }
 0x5e6   :  { %v5905_v19 = vpop.eup %4033 }
 0x5e7   :  { %v5907_v61 = vpop.eup %4035  ;;  %v2078_v16 = vsel %vm2071_vm6, %v5905_v19, 0.0  ;;  %v2065_v25 = vmul.f32 %v5905_v19, %v5905_v19 }
 0x5e8   :  { %2079 = vadd.xlane.f32.xlu0 %v2078_v16  ;;  %v2081_v44 = vsel %vm2071_vm6, %v5907_v61, 0.0  ;;  %v2066_v63 = vmul.f32 %v5907_v61, %v5907_v61 }
 0x5e9   :  { %v2102_v6 = vsel %vm2071_vm6, %v2065_v25, 0.0 }
 0x5ea   :  { %v5911_v40 = vpop.eup %4037  ;;  %v2105_v62 = vsel %vm2071_vm6, %v2066_v63, 0.0 }
 0x5eb   :  { %v2084_v22 = vsel %vm2071_vm6, %v5911_v40, 0.0  ;;  %v5917_v46 = vpop.eup %4039  ;;  %v2067_v43 = vmul.f32 %v5911_v40, %v5911_v40 }
 0x5ec   :  { %2082 = vadd.xlane.f32.xlu0 %v2081_v44  ;;  %2085 = vadd.xlane.f32.xlu1 %v2084_v22  ;;  %v2087_v41 = vsel %vm2071_vm6, %v5917_v46, 0.0  ;;  %v2068_v20 = vmul.f32 %v5917_v46, %v5917_v46 }
 0x5ed   :  { %v2108_v53 = vsel %vm2071_vm6, %v2067_v43, 0.0 }
 0x5ee   :  { %v5919_v14 = vpop.eup %4041  ;;  %v2111_v50 = vsel %vm2071_vm6, %v2068_v20, 0.0 }
 0x5ef   :  { %v2090_v55 = vsel %vm2071_vm6, %v5919_v14, 0.0  ;;  %v5927_v24 = vpop.eup %4043  ;;  %v2069_v60 = vmul.f32 %v5919_v14, %v5919_v14 }
 0x5f0   :  { %2088 = vadd.xlane.f32.xlu0 %v2087_v41  ;;  %2091 = vadd.xlane.f32.xlu1 %v2090_v55  ;;  %v2093_v4 = vsel %vm2071_vm6, %v5927_v24, 0.0  ;;  %v2070_v33 = vmul.f32 %v5927_v24, %v5927_v24 }
 0x5f1   :  { %v2114_v15 = vsel %vm2071_vm6, %v2069_v60, 0.0 }
 0x5f2   :  { %v2117_v7 = vsel %vm2071_vm6, %v2070_v33, 0.0 }
 0x5f4   :  { %2094 = vadd.xlane.f32.xlu0 %v2093_v4  ;;  %2097 = vadd.xlane.f32.xlu1 %v2096_v42 }
 0x5f8   :  { %2100 = vadd.xlane.f32.xlu0 %v2099_v32  ;;  %2103 = vadd.xlane.f32.xlu1 %v2102_v6 }
 0x5fc   :  { %2106 = vadd.xlane.f32.xlu0 %v2105_v62  ;;  %2109 = vadd.xlane.f32.xlu1 %v2108_v53 }
 0x600   :  { %2112 = vadd.xlane.f32.xlu0 %v2111_v50  ;;  %2115 = vadd.xlane.f32.xlu1 %v2114_v15 }
 0x604   :  { %2118 = vadd.xlane.f32.xlu0 %v2117_v7 }
 0x611   :  { %1155 = vperm.xlu1 %3950, %v1141_v45  }
 0x615   :  { %1163 = vperm.xlu1 %3950, %v1149_v1  }
 0x619   :  { %1167 = vperm.xlu1 %3950, %v1153_v26  }
 0x61a   :  { %1159 = vperm.xlu0 %3949, %v1145_v11  }
 0x61d   :  { %1203 = vperm.xlu1 %3950, %v1189_v0  }
 0x61e   :  { %1199 = vperm.xlu0 %3949, %v1185_v52  }
 0x621   :  { %1211 = vperm.xlu1 %3950, %v1197_v28  }
 0x622   :  { %1207 = vperm.xlu0 %3949, %v1193_v34  }
 0x647   :  { %v3338_v18 = vpop.f32.mrf.mxu1 }
 0x648   :  { %v3638_v56 = vadd.f32 %v5678_v39, %v3338_v18 }
 0x649   :  { %v3913_v49 = vpop.f32.mrf.mxu1 }
 0x64a   :  { %3647 = vst.msk [vmem:[%s6169_s10 + $0x3b] sm:$0x1] %vm3643_vm5, %v3638_v56 }
 0x64b   :  { %v3484_v8 = vpop.f32.mrf.mxu1 }
 0x64c   :  { %v3640_v17 = vadd.f32 %v5678_v39, %v3484_v8 }
 0x64d   :  { %v3927_v10 = vpop.f32.mrf.mxu1 }
 0x64e   :  { %3649 = vst.msk [vmem:[%s6169_s10 + $0x5b] sm:$0x1] %vm3643_vm5, %v3640_v17 }
 0x64f   :  { %v3630_v59 = vpop.f32.mrf.mxu1 }
 0x650   :  { %v3642_v37 = vadd.f32 %v5678_v39, %v3630_v59 }
 0x651   :  { %v3941_v31 = vpop.f32.mrf.mxu1 }
 0x652   :  { %3651 = vst.msk [vmem:[%s6169_s10 + $0x7b] sm:$0x1] %vm3643_vm5, %v3642_v37 }
 0x659   :  { %v3265_v36 = vpop.f32.mrf.mxu0 }
 0x65a   :  { %v3637_v29 = vadd.f32 %v5678_v39, %v3265_v36 }
 0x65b   :  { %v3906_v30 = vpop.f32.mrf.mxu0  ;;  %v2077_v42 = vpop.xlane.xlu1 %2076 }
 0x65c   :  { %3646 = vst.msk [vmem:[%s6169_s10 + $0x2b] sm:$0x1] %vm3643_vm5, %v3637_v29  ;;  %v2128_v25 = vsel %vm2120_vm7, %v2077_v42, 0.0 }
 0x65d   :  { %v3411_v16 = vpop.f32.mrf.mxu0  ;;  %v2129_v43 = vrot.slane %v2128_v25, 4 }
 0x65e   :  { %v3639_v44 = vadd.f32 %v5678_v39, %v3411_v16 }
 0x65f   :  { %v3920_v22 = vpop.f32.mrf.mxu0  ;;  %v2130_v7 = vadd.f32 %v2129_v43, %v2128_v25 }
 0x660   :  { %3648 = vst.msk [vmem:[%s6169_s10 + $0x4b] sm:$0x1] %vm3643_vm5, %v3639_v44 }
 0x661   :  { %v3557_v41 = vpop.f32.mrf.mxu0  ;;  %v2131_v0 = vrot.slane %v2130_v7, 2 }
 0x662   :  { %v3641_v55 = vadd.f32 %v5678_v39, %v3557_v41 }
 0x663   :  { %v3934_v47 = vpop.f32.mrf.mxu0  ;;  %v2132_v31 = vadd.f32 %v2131_v0, %v2130_v7 }
 0x664   :  { %3650 = vst.msk [vmem:[%s6169_s10 + $0x6b] sm:$0x1] %vm3643_vm5, %v3641_v55 }
 0x66d   :  { %v2074_v4 = vpop.xlane.xlu0 %2073 }
 0x66e   :  { %v2121_v12 = vsel %vm2120_vm7, %v2074_v4, 0.0 }
 0x66f   :  { %v2122_v32 = vrot.slane %v2121_v12, 4 }
 0x671   :  { %v2080_v6 = vpop.xlane.xlu0 %2079  ;;  %v2123_v62 = vadd.f32 %v2122_v32, %v2121_v12 }
 0x672   :  { %v2135_v63 = vsel %vm2120_vm7, %v2080_v6, 0.0 }
 0x673   :  { %v2136_v39 = vrot.slane %v2135_v63, 4  ;;  %v2124_v45 = vrot.slane %v2123_v62, 2 }
 0x675   :  { %v2086_v53 = vpop.xlane.xlu1 %2085  ;;  %v2083_v20 = vpop.xlane.xlu0 %2082  ;;  %v2137_v1 = vadd.f32 %v2136_v39, %v2135_v63  ;;  %v2125_v52 = vadd.f32 %v2124_v45, %v2123_v62 }
 0x676   :  { %v2149_v60 = vsel %vm2120_vm7, %v2086_v53, 0.0  ;;  %v2142_v50 = vsel %vm2120_vm7, %v2083_v20, 0.0 }
 0x677   :  { %v2150_v15 = vrot.slane %v2149_v60, 4  ;;  %v2143_v33 = vrot.slane %v2142_v50, 4  ;;  %v2138_v27 = vrot.slane %v2137_v1, 2  ;;  %v2126_v16 = vrot.slane %v2125_v52, 1 }
 0x679   :  { %v2151_v2 = vadd.f32 %v2150_v15, %v2149_v60  ;;  %v2092_v9 = vpop.xlane.xlu1 %2091  ;;  %v2089_v26 = vpop.xlane.xlu0 %2088  ;;  %v2144_v35 = vadd.f32 %v2143_v33, %v2142_v50  ;;  %v2139_v44 = vadd.f32 %v2138_v27, %v2137_v1  ;;  %v2133_v60 = vrot.slane %v2132_v31, 1 }
 0x67a   :  { %v2163_v23 = vsel %vm2120_vm7, %v2092_v9, 0.0  ;;  %v2156_v11 = vsel %vm2120_vm7, %v2089_v26, 0.0  ;;  %v2127_v50 = vadd.f32 %v2126_v16, %v2125_v52 }
 0x67b   :  { %v2152_v5 = vrot.slane %v2151_v2, 2  ;;  %v2164_v57 = vrot.slane %v2163_v23, 4  ;;  %v2157_v58 = vrot.slane %v2156_v11, 4  ;;  %v2145_v10 = vrot.slane %v2144_v35, 2 }
 0x67c   :  { %v2140_v15 = vrot.slane %v2139_v44, 1 }
 0x67d   :  { %v2153_v28 = vadd.f32 %v2152_v5, %v2151_v2  ;;  %v2165_v34 = vadd.f32 %v2164_v57, %v2163_v23  ;;  %v2098_v18 = vpop.xlane.xlu1 %2097  ;;  %v2095_v56 = vpop.xlane.xlu0 %2094  ;;  %v2158_v49 = vadd.f32 %v2157_v58, %v2156_v11  ;;  %v2146_v32 = vadd.f32 %v2145_v10, %v2144_v35 }
 0x67e   :  { %v2177_v8 = vsel %vm2120_vm7, %v2098_v18, 0.0  ;;  %v2170_v17 = vsel %vm2120_vm7, %v2095_v56, 0.0  ;;  %v2141_v0 = vadd.f32 %v2140_v15, %v2139_v44 }
 0x67f   :  { %v2166_v59 = vrot.slane %v2165_v34, 2  ;;  %v2178_v37 = vrot.slane %v2177_v8, 4  ;;  %v2154_v36 = vrot.slane %v2153_v28, 1  ;;  %v2159_v29 = vrot.slane %v2158_v49, 2 }
 0x680   :  { %v2171_v30 = vrot.slane %v2170_v17, 4  ;;  %v2147_v5 = vrot.slane %v2146_v32, 1 }
 0x681   :  { %v2167_v22 = vadd.f32 %v2166_v59, %v2165_v34  ;;  %v2179_v41 = vadd.f32 %v2178_v37, %v2177_v8  ;;  %v2104_v55 = vpop.xlane.xlu1 %2103  ;;  %v2101_v47 = vpop.xlane.xlu0 %2100  ;;  %v2160_v4 = vadd.f32 %v2159_v29, %v2158_v49  ;;  %v2155_v62 = vadd.f32 %v2154_v36, %v2153_v28 }
 0x682   :  { %v2172_v42 = vadd.f32 %v2171_v30, %v2170_v17  ;;  %v2191_v12 = vsel %vm2120_vm7, %v2104_v55, 0.0  ;;  %v2184_v25 = vsel %vm2120_vm7, %v2101_v47, 0.0  ;;  %v2134_v34 = vadd.f32 %v2133_v60, %v2132_v31 }
 0x683   :  { %v2168_v6 = vrot.slane %v2167_v22, 1  ;;  %v2180_v63 = vrot.slane %v2179_v41, 2  ;;  %v2192_v43 = vrot.slane %v2191_v12, 4  ;;  %v2161_v39 = vrot.slane %v2160_v4, 1 }
 0x684   :  { %v2173_v53 = vrot.slane %v2172_v42, 2  ;;  %v2185_v20 = vrot.slane %v2184_v25, 4  ;;  %v2233_v11 = vadd.f32 %v2155_v62, %v2127_v50  ;;  %v2148_v36 = vadd.f32 %v2147_v5, %v2146_v32 }
 0x685   :  { %v2110_v33 = vpop.xlane.xlu1 %2109  ;;  %v2107_v7 = vpop.xlane.xlu0 %2106  ;;  %v2193_v1 = vadd.f32 %v2192_v43, %v2191_v12  ;;  %v2169_v26 = vadd.f32 %v2168_v6, %v2167_v22  ;;  %v2181_v23 = vadd.f32 %v2180_v63, %v2179_v41  ;;  %v2162_v35 = vadd.f32 %v2161_v39, %v2160_v4 }
 0x686   :  { %v2174_v45 = vadd.f32 %v2173_v53, %v2172_v42  ;;  %v2186_v2 = vadd.f32 %v2185_v20, %v2184_v25  ;;  %v2205_v9 = vsel %vm2120_vm7, %v2110_v33, 0.0  ;;  %v2198_v27 = vsel %vm2120_vm7, %v2107_v7, 0.0 }
 0x687   :  { %v2206_v57 = vrot.slane %v2205_v9, 4  ;;  %v2194_v18 = vrot.slane %v2193_v1, 2  ;;  %v2235_v8 = vadd.f32 %v2169_v26, %v2141_v0  ;;  %v2182_v17 = vrot.slane %v2181_v23, 1 }
 0x688   :  { %v2175_v58 = vrot.slane %v2174_v45, 1  ;;  %v2187_v56 = vrot.slane %v2186_v2, 2  ;;  %v2199_v10 = vrot.slane %v2198_v27, 4  ;;  %v6025_v37 = vmul.f32 0.011904762, %v2233_v11 }
 0x689   :  { %v2116_v28 = vpop.xlane.xlu1 %2115  ;;  %v2113_v52 = vpop.xlane.xlu0 %2112  ;;  %v2207_v49 = vadd.f32 %v2206_v57, %v2205_v9  ;;  %v2234_v29 = vadd.f32 %v2162_v35, %v2134_v34  ;;  %v2195_v47 = vadd.f32 %v2194_v18, %v2193_v1  ;;  %v6028_v25 = vmul.f32 0.011904762, %v2235_v8 }
 0x68a   :  { %v2219_v59 = vsel %vm2120_vm7, %v2116_v28, 0.0  ;;  %v2176_v16 = vadd.f32 %v2175_v58, %v2174_v45  ;;  %v2200_v44 = vadd.f32 %v2199_v10, %v2198_v27  ;;  %v2212_v41 = vsel %vm2120_vm7, %v2113_v52, 0.0 }
 0x68b   :  { %v2208_v30 = vrot.slane %v2207_v49, 2  ;;  %v2220_v22 = vrot.slane %v2219_v59, 4  ;;  %v2188_v4 = vadd.f32 %v2187_v56, %v2186_v2  ;;  %v2213_v12 = vrot.slane %v2212_v41, 4 }
 0x68c   :  { %v2183_v6 = vadd.f32 %v2182_v17, %v2181_v23  ;;  %v2201_v63 = vrot.slane %v2200_v44, 2  ;;  %v6030_v62 = vmul.f32 0.011904762, %v2234_v29  ;;  %v2236_v20 = vadd.f32 %v2176_v16, %v2148_v36 }
 0x68d   :  { %v1156_v55 = vpop.permute.xlu1 %1155  ;;  %v2119_v31 = vpop.xlane.xlu0 %2118  ;;  %v2209_v42 = vadd.f32 %v2208_v30, %v2207_v49  ;;  %v2221_v43 = vadd.f32 %v2220_v22, %v2219_v59  ;;  %v2214_v39 = vadd.f32 %v2213_v12, %v2212_v41  ;;  %v2196_v7 = vrot.slane %v2195_v47, 1 }
 0x68e   :  { %v2226_v53 = vsel %vm2120_vm7, %v2119_v31, 0.0  ;;  %v2202_v60 = vadd.f32 %v2201_v63, %v2200_v44  ;;  %v2189_v45 = vrot.slane %v2188_v4, 1  ;;  %v2249_v9 = vmul.f32 %v6025_v37, %v6025_v37 }
 0x68f   :  { %v2210_v32 = vrot.slane %v2209_v42, 1  ;;  %v2222_v50 = vrot.slane %v2221_v43, 2  ;;  %v2227_v15 = vrot.slane %v2226_v53, 4  ;;  %v2215_v2 = vrot.slane %v2214_v39, 2 }
 0x690   :  { %v2251_v11 = vmul.f32 %v6028_v25, %v6028_v25  ;;  %v2250_v5 = vmul.f32 %v6030_v62, %v6030_v62  ;;  %v6039_v0 = vmul.f32 0.011904762, %v2236_v20  ;;  %v2203_v58 = vrot.slane %v2202_v60, 1  ;;  %v6352_v20 = vld [vmem:[#allocation7_spill] sm:$0xff] }
 0x691   :  { %v1164_v33 = vpop.permute.xlu1 %1163  ;;  %v2211_v1 = vadd.f32 %v2210_v32, %v2209_v42  ;;  %v2223_v26 = vadd.f32 %v2222_v50, %v2221_v43  ;;  %v2228_v23 = vadd.f32 %v2227_v15, %v2226_v53  ;;  %v2216_v57 = vadd.f32 %v2215_v2, %v2214_v39  ;;  %v6351_v53 = vld [vmem:[#allocation43_spill] sm:$0xff] }
 0x692   :  { %v2197_v18 = vadd.f32 %v2196_v7, %v2195_v47  ;;  %v2190_v56 = vadd.f32 %v2189_v45, %v2188_v4  ;;  %v1170_v10 = vmul.f32 %v5412_v54, %v1156_v55  ;;  %v1174_v59 = vmul.f32 %v5408_v51, %v1156_v55  ;;  %v6353_v7 = vld [vmem:[#allocation46_spill] sm:$0xff] }
 0x693   :  { %v2237_v35 = vadd.f32 %v2211_v1, %v2183_v6  ;;  %v2224_v27 = vrot.slane %v2223_v26, 1  ;;  %v2229_v28 = vrot.slane %v2228_v23, 2  ;;  %v2217_v8 = vrot.slane %v2216_v57, 1  ;;  %v6354_v1 = vld [vmem:[#allocation49_spill] sm:$0xff] }
 0x694   :  { %v2252_v22 = vmul.f32 %v6039_v0, %v6039_v0  ;;  %v2204_v41 = vadd.f32 %v2203_v58, %v2202_v60  ;;  %v1172_v45 = vmul.f32 %v6353_v7, %v1164_v33  ;;  %v1176_v2 = vmul.f32 %v6354_v1, %v1164_v33 }
 0x695   :  { %v1168_v52 = vpop.permute.xlu1 %1167  ;;  %v1160_v34 = vpop.permute.xlu0 %1159  ;;  %v2245_v49 = vmul.f32 0.011904762, %v2237_v35  ;;  %v2225_v17 = vadd.f32 %v2224_v27, %v2223_v26  ;;  %v2230_v36 = vadd.f32 %v2229_v28, %v2228_v23  ;;  %v2218_v30 = vadd.f32 %v2217_v8, %v2216_v57 }
 0x696   :  { %v1171_v16 = vmul.f32 %v5399_v13, %v1160_v34  ;;  %v1175_v44 = vmul.f32 %v5452_v48, %v1160_v34  ;;  %v1173_v48 = vmul.f32 %v6351_v53, %v1168_v52  ;;  %v1177_v50 = vmul.f32 %v6352_v20, %v1168_v52 }
 0x697   :  { %v2253_v29 = vsub.f32 %v2245_v49, %v2249_v9  ;;  %v2239_v31 = vadd.f32 %v2225_v17, %v2197_v18  ;;  %v2231_v47 = vrot.slane %v2230_v36, 1  ;;  %v2238_v6 = vadd.f32 %v2218_v30, %v2190_v56  ;;  %v3810_v49 = vld [vmem:[%s6162_s7 + $0x10] sm:$0x1] }
 0x699   :  { %v1204_v4 = vpop.permute.xlu1 %1203  ;;  %v1200_v42 = vpop.permute.xlu0 %1199  ;;  %v2257_v12 = vmax.f32 %v2253_v29, 0.0  ;;  %v2247_v51 = vmul.f32 0.011904762, %v2239_v31  ;;  %v2232_v55 = vadd.f32 %v2231_v47, %v2230_v36  ;;  %v2246_v13 = vmul.f32 0.011904762, %v2238_v6 }
 0x69a   :  { %v1215_v54 = vadd.f32 %v1204_v4, %v1171_v16  ;;  %v1219_v63 = vadd.f32 %v1204_v4, %v1175_v44  ;;  %v1214_v43 = vadd.f32 %v1200_v42, %v1170_v10  ;;  %v1218_v32 = vadd.f32 %v1200_v42, %v1174_v59  ;;  %v3812_v59 = vld [vmem:[%s6162_s7 + $0x12] sm:$0x1]  ;;  %v3811_v36 = vld [vmem:[%s6162_s7 + $0x11] sm:$0x1]  ;;  %v3813_v31 = vld [vmem:[%s6162_s7 + $0x13] sm:$0x1] }
 0x69b   :  { %v2261_v39 = vadd.f32 1e-05, %v2257_v12  ;;  %v2255_v60 = vsub.f32 %v2247_v51, %v2251_v11  ;;  %v2240_v15 = vadd.f32 %v2232_v55, %v2204_v41  ;;  %v2254_v23 = vsub.f32 %v2246_v13, %v2250_v5  ;;  %v3816_v51 = vld [vmem:[%s6162_s7 + $0x16] sm:$0x1]  ;;  %v3817_v13 = vld [vmem:[%s6162_s7 + $0x17] sm:$0x1] }
 0x69c   :  { %1223 = vst.msk [vmem:[%s6169_s10 + $0x10] sm:$0xff] %vm389_vm0, %v1215_v54  ;;  %1227 = vst.msk [vmem:[%s6169_s10 + $0x50] sm:$0xff] %vm389_vm0, %v1219_v63 }
 0x69d   :  { %1222 = vst.msk [vmem:[%s6169_s10] sm:$0xff] %vm389_vm0, %v1214_v43  ;;  %1226 = vst.msk [vmem:[%s6169_s10 + $0x40] sm:$0xff] %vm389_vm0, %v1218_v32  ;;  %v1212_v9 = vpop.permute.xlu1 %1211  ;;  %v1208_v26 = vpop.permute.xlu0 %1207  ;;  %4045 = vrsqrt.f32 %v2261_v39  ;;  %v2259_v57 = vmax.f32 %v2255_v60, 0.0  ;;  %v2248_v58 = vmul.f32 0.011904762, %v2240_v15  ;;  %v2258_v28 = vmax.f32 %v2254_v23, 0.0 }
 0x69e   :  { %v1217_v11 = vadd.f32 %v1212_v9, %v1173_v48  ;;  %v1221_v35 = vadd.f32 %v1212_v9, %v1177_v50  ;;  %v1216_v27 = vadd.f32 %v1208_v26, %v1172_v45  ;;  %v1220_v33 = vadd.f32 %v1208_v26, %v1176_v2 }
 0x69f   :  { %v2263_v52 = vadd.f32 1e-05, %v2259_v57  ;;  %v2256_v34 = vsub.f32 %v2248_v58, %v2252_v22  ;;  %v2262_v5 = vadd.f32 1e-05, %v2258_v28  ;;  %v3814_v22 = vld [vmem:[%s6162_s7 + $0x14] sm:$0x1] }
 0x6a0   :  { %1225 = vst.msk [vmem:[%s6169_s10 + $0x30] sm:$0xff] %vm389_vm0, %v1217_v11  ;;  %1229 = vst.msk [vmem:[%s6169_s10 + $0x70] sm:$0xff] %vm389_vm0, %v1221_v35 }
 0x6a1   :  { %1224 = vst.msk [vmem:[%s6169_s10 + $0x20] sm:$0xff] %vm389_vm0, %v1216_v27  ;;  %1228 = vst.msk [vmem:[%s6169_s10 + $0x60] sm:$0xff] %vm389_vm0, %v1220_v33  ;;  %4047 = vrsqrt.f32 %v2263_v52  ;;  %v2260_v18 = vmax.f32 %v2256_v34, 0.0 }
 0x6a2   :  { %4049 = vrsqrt.f32 %v2262_v5 }
 0x6a3   :  { %v2264_v56 = vadd.f32 1e-05, %v2260_v18 }
 0x6a5   :  { %4051 = vrsqrt.f32 %v2264_v56 }
 0x6aa   :  { %v4046_v8 = vpop.eup %4045 }
 0x6ab   :  { %v2274_v17 = vmul.f32 %v4046_v8, %v3810_v49 }
 0x6ad   :  { %v2298_v10 = vrot.slane %v2274_v17, %v4889_v3  ;;  %v2283_v30 = vmul.f32 %v2274_v17, %v6025_v37  ;;  %v3815_v37 = vld [vmem:[%s6162_s7 + $0x15] sm:$0x1] }
 0x6ae   :  { %v4048_v29 = vpop.eup %4047 }
 0x6af   :  { %2312 = vperm.xlu1 %3950, %v2298_v10   ;;  %v4050_v16 = vpop.eup %4049  ;;  %v2276_v44 = vmul.f32 %v4048_v29, %v3812_v59  ;;  %v2287_v12 = vsub.f32 %v3814_v22, %v2283_v30 }
 0x6b0   :  { %v2275_v41 = vmul.f32 %v4050_v16, %v3811_v36 }
 0x6b1   :  { %v2306_v47 = vrot.slane %v2276_v44, %v4889_v3  ;;  %v2285_v6 = vmul.f32 %v2276_v44, %v6028_v25  ;;  %v2342_v25 = vrot.slane %v2287_v12, %v4889_v3 }
 0x6b2   :  { %v4052_v4 = vpop.eup %4051  ;;  %v2302_v42 = vrot.slane %v2275_v41, %v4889_v3  ;;  %v2284_v54 = vmul.f32 %v2275_v41, %v6030_v62 }
 0x6b3   :  { %2320 = vperm.xlu1 %3950, %v2306_v47   ;;  %v2277_v63 = vmul.f32 %v4052_v4, %v3813_v31  ;;  %v2289_v39 = vsub.f32 %v3816_v51, %v2285_v6 }
 0x6b4   :  { %2316 = vperm.xlu0 %3949, %v2302_v42   ;;  %v2288_v43 = vsub.f32 %v3815_v37, %v2284_v54 }
 0x6b5   :  { %v2310_v55 = vrot.slane %v2277_v63, %v4889_v3  ;;  %v2286_v32 = vmul.f32 %v2277_v63, %v6039_v0  ;;  %v2350_v48 = vrot.slane %v2289_v39, %v4889_v3 }
 0x6b6   :  { %v2346_v62 = vrot.slane %v2288_v43, %v4889_v3 }
 0x6b7   :  { %2324 = vperm.xlu1 %3950, %v2310_v55   ;;  %v2290_v53 = vsub.f32 %v3817_v13, %v2286_v32 }
 0x6b8   :  { %2356 = vperm.xlu0 %3949, %v2342_v25  }
 0x6b9   :  { %v2354_v20 = vrot.slane %v2290_v53, %v4889_v3 }
 0x6bb   :  { %2360 = vperm.xlu1 %3950, %v2346_v62  }
 0x6bc   :  { %2364 = vperm.xlu0 %3949, %v2350_v48  }
 0x6bf   :  { %2368 = vperm.xlu1 %3950, %v2354_v20  }
 0x72a   :  { %v2313_v0 = vpop.permute.xlu1 %2312 }
 0x72b   :  { %v2327_v15 = vmul.f32 %v5901_v38, %v2313_v0  ;;  %v2331_v7 = vmul.f32 %v5911_v40, %v2313_v0 }
 0x72e   :  { %v2321_v50 = vpop.permute.xlu1 %2320 }
 0x72f   :  { %v2317_v60 = vpop.permute.xlu0 %2316  ;;  %v2329_v11 = vmul.f32 %v5905_v19, %v2321_v50  ;;  %v2333_v3 = vmul.f32 %v5919_v14, %v2321_v50 }
 0x730   :  { %v2328_v26 = vmul.f32 %v5875_v21, %v2317_v60  ;;  %v2332_v23 = vmul.f32 %v5917_v46, %v2317_v60 }
 0x732   :  { %v2325_v45 = vpop.permute.xlu1 %2324 }
 0x733   :  { %v2357_v1 = vpop.permute.xlu0 %2356  ;;  %v2330_v19 = vmul.f32 %v5907_v61, %v2325_v45  ;;  %v2334_v14 = vmul.f32 %v5927_v24, %v2325_v45 }
 0x734   :  { %v2371_v2 = vadd.f32 %v2357_v1, %v2327_v15  ;;  %v2375_v9 = vadd.f32 %v2357_v1, %v2331_v7 }
 0x736   :  { %2379 = vst.msk [vmem:[%s6169_s10 + $0x8] sm:$0x7] %vm2071_vm6, %v2371_v2  ;;  %2383 = vst.msk [vmem:[%s6169_s10 + $0x48] sm:$0x7] %vm2071_vm6, %v2375_v9  ;;  %v2361_v38 = vpop.permute.xlu1 %2360 }
 0x737   :  { %v2372_v40 = vadd.f32 %v2361_v38, %v2328_v26  ;;  %v2376_v35 = vadd.f32 %v2361_v38, %v2332_v23  ;;  %v2365_v21 = vpop.permute.xlu0 %2364 }
 0x738   :  { %v2373_v57 = vadd.f32 %v2365_v21, %v2329_v11  ;;  %v2377_v46 = vadd.f32 %v2365_v21, %v2333_v3 }
 0x739   :  { %2380 = vst.msk [vmem:[%s6169_s10 + $0x18] sm:$0x7] %vm2071_vm6, %v2372_v40  ;;  %2384 = vst.msk [vmem:[%s6169_s10 + $0x58] sm:$0x7] %vm2071_vm6, %v2376_v35 }
 0x73a   :  { %2381 = vst.msk [vmem:[%s6169_s10 + $0x28] sm:$0x7] %vm2071_vm6, %v2373_v57  ;;  %2385 = vst.msk [vmem:[%s6169_s10 + $0x68] sm:$0x7] %vm2071_vm6, %v2377_v46  ;;  %v2369_v61 = vpop.permute.xlu1 %2368 }
 0x73b   :  { %v2374_v24 = vadd.f32 %v2369_v61, %v2330_v19  ;;  %v2378_v58 = vadd.f32 %v2369_v61, %v2334_v14 }
 0x73d   :  { %2382 = vst.msk [vmem:[%s6169_s10 + $0x38] sm:$0x7] %vm2071_vm6, %v2374_v24  ;;  %2386 = vst.msk [vmem:[%s6169_s10 + $0x78] sm:$0x7] %vm2071_vm6, %v2378_v58 }

</bundles_post_ra>
